<compile_context>
chip_gen: v5e
topology: v5e:2x2
jax: 0.10.0
libtpu: 0.0.40
codegen_flags: <defaults>
</compile_context>

<pallas_src>
import functools
import math

import jax
import jax.numpy as jnp
from jax import lax
from jax.experimental import pallas as pl
from jax.experimental.pallas import tpu as pltpu

D_MODEL = 32
N_HEADS = 4
D_HEAD = D_MODEL // N_HEADS
D_FF = 64
N_LAYERS = 2
EPS = 1e-5
_SCALE = 1.0 / math.sqrt(D_HEAD)

# Row order of the packed per-layer (7, D_MODEL) LayerNorm / bias slab `lnp`.
_BF2, _G1, _BE1, _G2, _BE2, _G3, _BE3 = range(7)


# ---------------------------------------------------------------------------
# in-kernel helpers (traced inside the Pallas body)
# ---------------------------------------------------------------------------
def _layer_norm(x, w, b):
    mu = jnp.mean(x, axis=-1, keepdims=True)
    var = jnp.mean((x - mu) ** 2, axis=-1, keepdims=True)
    return (x - mu) * lax.rsqrt(var + EPS) * w + b


def _softmax_rows(s):
    s = s - jnp.max(s, axis=-1, keepdims=True)
    p = jnp.exp(s)
    return p * pl.reciprocal(jnp.sum(p, axis=-1, keepdims=True), approx=True)


def _mha(q_in, kv_in, w, b, *, fused_qkv):
    """Multi-head attention with lane-fused projections.

    w: (D, 4D) = [Wq | Wk | Wv | Wo] (each D x D, pre-transposed for x @ W)
    b: (1, 4D) = [bq | bk | bv | bo]
    Heads live in static lane slices of width D_HEAD (everything fits in one vreg).
    """
    D = D_MODEL
    if fused_qkv:
        # self-attention: single (L, D) @ (D, 3D) projection for Q, K, V
        qkv = jnp.dot(q_in, w[:, :3 * D], preferred_element_type=jnp.float32) + b[:, :3 * D]
        q, k, v = qkv[:, :D], qkv[:, D:2 * D], qkv[:, 2 * D:3 * D]
    else:
        # cross-attention: Q from the decoder stream, fused K/V from the encoder stream
        q = jnp.dot(q_in, w[:, :D], preferred_element_type=jnp.float32) + b[:, :D]
        kv = jnp.dot(kv_in, w[:, D:3 * D], preferred_element_type=jnp.float32) + b[:, D:3 * D]
        k, v = kv[:, :D], kv[:, D:2 * D]

    ctxs = []
    for h in range(N_HEADS):                      # static unroll over heads
        sl = slice(h * D_HEAD, (h + 1) * D_HEAD)
        s = lax.dot_general(q[:, sl], k[:, sl], (((1,), (1,)), ((), ())),
                            preferred_element_type=jnp.float32) * _SCALE     # (L, S)
        p = _softmax_rows(s)
        ctxs.append(jnp.dot(p, v[:, sl], preferred_element_type=jnp.float32))  # (L, dh)
    ctx = jnp.concatenate(ctxs, axis=-1)          # (L, D)

    # single output projection for all heads
    return jnp.dot(ctx, w[:, 3 * D:], preferred_element_type=jnp.float32) + b[:, 3 * D:]


# ---------------------------------------------------------------------------
# the single fused Pallas kernel: all layers + optional final LayerNorm
# ---------------------------------------------------------------------------
def _decoder_kernel(x_ref, cross_ref, w_self_ref, w_cross_ref, b_attn_ref,
                    wf1_ref, bf1_ref, wf2_ref, lnp_ref, fln_ref,
                    out_ref, *, apply_norm):
    n_layers = wf1_ref.shape[0]
    x = x_ref[0].astype(jnp.float32)        # (L, D)
    cr = cross_ref[0].astype(jnp.float32)   # (S, D)

    for l in range(n_layers):               # static unroll over layers (weights VMEM-resident)
        ln = lnp_ref[l]                     # (7, D)
        ba = b_attn_ref[l]                  # (2, 4D)

        # x = norm1(x + SelfAttn(x, x, x))
        a = _mha(x, x, w_self_ref[l], ba[0:1], fused_qkv=True)
        x = _layer_norm(x + a, ln[_G1:_G1 + 1], ln[_BE1:_BE1 + 1])

        # x = norm2(x + CrossAttn(x, cross, cross))
        a = _mha(x, cr, w_cross_ref[l], ba[1:2], fused_qkv=False)
        x = _layer_norm(x + a, ln[_G2:_G2 + 1], ln[_BE2:_BE2 + 1])

        # y = conv2(relu(conv1(x^T)))^T   (kernel_size=1 convs == matmuls)
        y = jnp.maximum(
            jnp.dot(x, wf1_ref[l], preferred_element_type=jnp.float32) + bf1_ref[l], 0.0)
        y = jnp.dot(y, wf2_ref[l], preferred_element_type=jnp.float32) + ln[_BF2:_BF2 + 1]

        # x = norm3(x + y)
        x = _layer_norm(x + y, ln[_G3:_G3 + 1], ln[_BE3:_BE3 + 1])

    if apply_norm:
        fln = fln_ref[...]                  # (2, D): [gamma; beta]
        x = _layer_norm(x, fln[0:1], fln[1:2])

    out_ref[0] = x.astype(out_ref.dtype)


# ---------------------------------------------------------------------------
# weight packing: per-layer tensors -> a few lane-dense stacked slabs
# ---------------------------------------------------------------------------
def pack_decoder_params(layer_params, norm_params=None):
    w_self, w_cross, b_attn, wf1, bf1, wf2, lnp = [], [], [], [], [], [], []
    for p in layer_params:
        w_self.append(jnp.concatenate([p["wq1"], p["wk1"], p["wv1"], p["wo1"]], axis=1))
        w_cross.append(jnp.concatenate([p["wq2"], p["wk2"], p["wv2"], p["wo2"]], axis=1))
        b_attn.append(jnp.concatenate(
            [jnp.concatenate([p["bq1"], p["bk1"], p["bv1"], p["bo1"]], axis=1),
             jnp.concatenate([p["bq2"], p["bk2"], p["bv2"], p["bo2"]], axis=1)], axis=0))
        wf1.append(p["wf1"])
        bf1.append(p["bf1"])
        wf2.append(p["wf2"])
        lnp.append(jnp.concatenate(
            [p["bf2"], p["g1"], p["be1"], p["g2"], p["be2"], p["g3"], p["be3"]], axis=0))

    packed = {
        "w_self": jnp.stack(w_self),      # (nl, D, 4D)    lane-dense (128 lanes)
        "w_cross": jnp.stack(w_cross),    # (nl, D, 4D)
        "b_attn": jnp.stack(b_attn),      # (nl, 2, 4D)
        "wf1": jnp.stack(wf1),            # (nl, D, D_FF)
        "bf1": jnp.stack(bf1),            # (nl, 1, D_FF)
        "wf2": jnp.stack(wf2),            # (nl, D_FF, D)
        "lnp": jnp.stack(lnp),            # (nl, 7, D)
        "final_ln": (None if norm_params is None
                     else jnp.concatenate([norm_params[0], norm_params[1]], axis=0)),
    }
    return packed


# ---------------------------------------------------------------------------
# wrapper: single pallas_call for the whole Decoder
# ---------------------------------------------------------------------------
def decoder_forward(x, cross, packed):
    B, L, D = x.shape
    S = cross.shape[1]
    apply_norm = packed["final_ln"] is not None
    fln = packed["final_ln"] if apply_norm else jnp.zeros((2, D), jnp.float32)
    weights = (packed["w_self"], packed["w_cross"], packed["b_attn"],
               packed["wf1"], packed["bf1"], packed["wf2"], packed["lnp"], fln)

    def const_spec(a):
        # constant block index across the grid -> DMA'd once, resident in VMEM
        return pl.BlockSpec(a.shape, lambda b, _nd=a.ndim: (0,) * _nd)

    grid_spec = pltpu.PrefetchScalarGridSpec(
        num_scalar_prefetch=0,
        grid=(B,),   # one step per batch element; "parallel" lets v7x's 2 TCs split it
        in_specs=[pl.BlockSpec((1, L, D), lambda b: (b, 0, 0)),
                  pl.BlockSpec((1, S, D), lambda b: (b, 0, 0))]
                 + [const_spec(w) for w in weights],
        out_specs=pl.BlockSpec((1, L, D), lambda b: (b, 0, 0)),
    )
    return pl.pallas_call(
        functools.partial(_decoder_kernel, apply_norm=apply_norm),
        out_shape=jax.ShapeDtypeStruct((B, L, D), x.dtype),
        grid_spec=grid_spec,
        compiler_params=pltpu.CompilerParams(dimension_semantics=("parallel",)),
    )(x, cross, *weights)


# ---------------------------------------------------------------------------
# deterministic parameter init (synthetic; PyTorch-Linear-like scaling)
# ---------------------------------------------------------------------------
def _linear(key, din, dout):
    kw, kb = jax.random.split(key)
    bound = 1.0 / math.sqrt(din)
    w = jax.random.uniform(kw, (din, dout), jnp.float32, -bound, bound)
    b = jax.random.uniform(kb, (1, dout), jnp.float32, -bound, bound)
    return w, b


def init_layer_params(key, d_model, d_ff):
    keys = jax.random.split(key, 10)
    p = {}
    p["wq1"], p["bq1"] = _linear(keys[0], d_model, d_model)
    p["wk1"], p["bk1"] = _linear(keys[1], d_model, d_model)
    p["wv1"], p["bv1"] = _linear(keys[2], d_model, d_model)
    p["wo1"], p["bo1"] = _linear(keys[3], d_model, d_model)
    p["wq2"], p["bq2"] = _linear(keys[4], d_model, d_model)
    p["wk2"], p["bk2"] = _linear(keys[5], d_model, d_model)
    p["wv2"], p["bv2"] = _linear(keys[6], d_model, d_model)
    p["wo2"], p["bo2"] = _linear(keys[7], d_model, d_model)
    p["wf1"], p["bf1"] = _linear(keys[8], d_model, d_ff)
    p["wf2"], p["bf2"] = _linear(keys[9], d_ff, d_model)
    for i in (1, 2, 3):
        p[f"g{i}"] = jnp.ones((1, d_model), jnp.float32)
        p[f"be{i}"] = jnp.zeros((1, d_model), jnp.float32)
    return p


# ---------------------------------------------------------------------------
# pure-JAX reference (unpacked params) for a loose numerical sanity check
# ---------------------------------------------------------------------------
def _reference_forward(x, cross, layer_params, norm_params):
    def ln(v, g, b):
        mu = jnp.mean(v, -1, keepdims=True)
        var = jnp.mean((v - mu) ** 2, -1, keepdims=True)
        return (v - mu) / jnp.sqrt(var + EPS) * g + b

    def mha(q_in, kv_in, p, sfx):
        q = q_in @ p["wq" + sfx] + p["bq" + sfx]
        k = kv_in @ p["wk" + sfx] + p["bk" + sfx]
        v = kv_in @ p["wv" + sfx] + p["bv" + sfx]
        B_, Lq, _ = q.shape
        Lk = k.shape[1]
        qh = q.reshape(B_, Lq, N_HEADS, D_HEAD)
        kh = k.reshape(B_, Lk, N_HEADS, D_HEAD)
        vh = v.reshape(B_, Lk, N_HEADS, D_HEAD)
        s = jnp.einsum("blhd,bkhd->bhlk", qh, kh) * _SCALE
        pr = jax.nn.softmax(s, axis=-1)
        o = jnp.einsum("bhlk,bkhd->blhd", pr, vh).reshape(B_, Lq, D_MODEL)
        return o @ p["wo" + sfx] + p["bo" + sfx]

    for p in layer_params:
        x = ln(x + mha(x, x, p, "1"), p["g1"], p["be1"])
        x = ln(x + mha(x, cross, p, "2"), p["g2"], p["be2"])
        y = jnp.maximum(x @ p["wf1"] + p["bf1"], 0.0)
        y = y @ p["wf2"] + p["bf2"]
        x = ln(x + y, p["g3"], p["be3"])
    if norm_params is not None:
        x = ln(x, norm_params[0], norm_params[1])
    return x


# ---------------------------------------------------------------------------
if __name__ == "__main__":
    key = jax.random.PRNGKey(0)
    kx, kc, kp = jax.random.split(key, 3)

    B, L, S = 2, 8, 16  # batch, target seq, encoder (cross) seq
    x = jax.random.normal(kx, (B, L, D_MODEL), jnp.float32)
    cross = jax.random.normal(kc, (B, S, D_MODEL), jnp.float32)

    layer_keys = jax.random.split(kp, N_LAYERS)
    layer_params = [init_layer_params(layer_keys[i], D_MODEL, D_FF)
                    for i in range(N_LAYERS)]
    norm_params = (jnp.ones((1, D_MODEL), jnp.float32),
                   jnp.zeros((1, D_MODEL), jnp.float32))

    packed = pack_decoder_params(layer_params, norm_params)

    out = jax.jit(decoder_forward)(x, cross, packed)
    out = jax.block_until_ready(out)

    assert out.shape == (B, L, D_MODEL) and out.dtype == jnp.float32
    assert bool(jnp.all(jnp.isfinite(out)))

    # loose tolerance: softmax uses the EUP approximate reciprocal inside the kernel
    ref = _reference_forward(x, cross, layer_params, norm_params)
    assert bool(jnp.allclose(out, ref, rtol=3e-2, atol=3e-2)), \
        float(jnp.max(jnp.abs(out - ref)))

    print("KERNEL_OK")
</pallas_src>

<mosaic_0001>
module attributes {stable_mosaic.version = 11 : i64} {
  func.func @_decoder_kernel(%arg0: i32, %arg1: memref<1x8x32xf32, #tpu.memory_space<vmem>>, %arg2: memref<1x16x32xf32, #tpu.memory_space<vmem>>, %arg3: memref<2x32x128xf32, #tpu.memory_space<vmem>>, %arg4: memref<2x32x128xf32, #tpu.memory_space<vmem>>, %arg5: memref<2x2x128xf32, #tpu.memory_space<vmem>>, %arg6: memref<2x32x64xf32, #tpu.memory_space<vmem>>, %arg7: memref<2x1x64xf32, #tpu.memory_space<vmem>>, %arg8: memref<2x64x32xf32, #tpu.memory_space<vmem>>, %arg9: memref<2x7x32xf32, #tpu.memory_space<vmem>>, %arg10: memref<2x32xf32, #tpu.memory_space<vmem>>, %arg11: memref<1x8x32xf32, #tpu.memory_space<vmem>>) attributes {dimension_semantics = [#tpu.dimension_semantics<parallel>], iteration_bounds = array<i64: 2>, scalar_prefetch = 0 : i64, scratch_operands = 0 : i64, tpu.core_type = #tpu.core_type<tc>, window_params = [{transform_indices = @transform_0, window_bounds = array<i64: 1, 8, 32>}, {transform_indices = @transform_1, window_bounds = array<i64: 1, 16, 32>}, {pipeline_mode = #tpu.pipeline_mode<synchronous>, transform_indices = @transform_2, window_bounds = array<i64: 2, 32, 128>}, {pipeline_mode = #tpu.pipeline_mode<synchronous>, transform_indices = @transform_3, window_bounds = array<i64: 2, 32, 128>}, {pipeline_mode = #tpu.pipeline_mode<synchronous>, transform_indices = @transform_4, window_bounds = array<i64: 2, 2, 128>}, {pipeline_mode = #tpu.pipeline_mode<synchronous>, transform_indices = @transform_5, window_bounds = array<i64: 2, 32, 64>}, {pipeline_mode = #tpu.pipeline_mode<synchronous>, transform_indices = @transform_6, window_bounds = array<i64: 2, 1, 64>}, {pipeline_mode = #tpu.pipeline_mode<synchronous>, transform_indices = @transform_7, window_bounds = array<i64: 2, 64, 32>}, {pipeline_mode = #tpu.pipeline_mode<synchronous>, transform_indices = @transform_8, window_bounds = array<i64: 2, 7, 32>}, {pipeline_mode = #tpu.pipeline_mode<synchronous>, transform_indices = @transform_9, window_bounds = array<i64: 2, 32>}, {transform_indices = @transform_10, window_bounds = array<i64: 1, 8, 32>}]} {
    %c0 = arith.constant 0 : index
    %c0_0 = arith.constant 0 : index
    %c0_1 = arith.constant 0 : index
    %0 = vector.load %arg1[%c0, %c0_0, %c0_1] : memref<1x8x32xf32, #tpu.memory_space<vmem>>, vector<1x8x32xf32>
    %1 = vector.shape_cast %0 : vector<1x8x32xf32> to vector<8x32xf32>
    %c0_2 = arith.constant 0 : index
    %c0_3 = arith.constant 0 : index
    %c0_4 = arith.constant 0 : index
    %2 = vector.load %arg2[%c0_2, %c0_3, %c0_4] : memref<1x16x32xf32, #tpu.memory_space<vmem>>, vector<1x16x32xf32>
    %3 = vector.shape_cast %2 : vector<1x16x32xf32> to vector<16x32xf32>
    %c0_5 = arith.constant 0 : index
    %c0_6 = arith.constant 0 : index
    %c0_7 = arith.constant 0 : index
    %4 = vector.load %arg9[%c0_5, %c0_6, %c0_7] : memref<2x7x32xf32, #tpu.memory_space<vmem>>, vector<1x7x32xf32>
    %5 = vector.shape_cast %4 : vector<1x7x32xf32> to vector<7x32xf32>
    %c0_8 = arith.constant 0 : index
    %c0_9 = arith.constant 0 : index
    %c0_10 = arith.constant 0 : index
    %6 = vector.load %arg5[%c0_8, %c0_9, %c0_10] : memref<2x2x128xf32, #tpu.memory_space<vmem>>, vector<1x2x128xf32>
    %7 = vector.shape_cast %6 : vector<1x2x128xf32> to vector<2x128xf32>
    %c0_11 = arith.constant 0 : index
    %c0_12 = arith.constant 0 : index
    %c0_13 = arith.constant 0 : index
    %8 = vector.load %arg3[%c0_11, %c0_12, %c0_13] : memref<2x32x128xf32, #tpu.memory_space<vmem>>, vector<1x32x128xf32>
    %9 = vector.shape_cast %8 : vector<1x32x128xf32> to vector<32x128xf32>
    %10 = vector.extract_strided_slice %7 {offsets = [0, 0], sizes = [1, 128], strides = [1, 1]} : vector<2x128xf32> to vector<1x128xf32>
    %11 = vector.extract_strided_slice %9 {offsets = [0, 0], sizes = [32, 96], strides = [1, 1]} : vector<32x128xf32> to vector<32x96xf32>
    %cst = arith.constant dense<0.000000e+00> : vector<8x96xf32>
    %12 = tpu.matmul %1, %11, %cst {dimension_numbers = #tpu.dot_dimension_numbers<[1], [0], [0], [1], [0, 0, 1, 1], [], []>} : vector<8x32xf32>, vector<32x96xf32>, vector<8x96xf32> -> vector<8x96xf32>
    %13 = vector.extract_strided_slice %10 {offsets = [0, 0], sizes = [1, 96], strides = [1, 1]} : vector<1x128xf32> to vector<1x96xf32>
    %14 = vector.broadcast %13 : vector<1x96xf32> to vector<8x96xf32>
    %15 = arith.addf %12, %14 : vector<8x96xf32>
    %16 = vector.extract_strided_slice %15 {offsets = [0, 0], sizes = [8, 32], strides = [1, 1]} : vector<8x96xf32> to vector<8x32xf32>
    %17 = vector.extract_strided_slice %15 {offsets = [0, 32], sizes = [8, 32], strides = [1, 1]} : vector<8x96xf32> to vector<8x32xf32>
    %18 = vector.extract_strided_slice %15 {offsets = [0, 64], sizes = [8, 32], strides = [1, 1]} : vector<8x96xf32> to vector<8x32xf32>
    %19 = vector.extract_strided_slice %16 {offsets = [0, 0], sizes = [8, 8], strides = [1, 1]} : vector<8x32xf32> to vector<8x8xf32>
    %20 = vector.extract_strided_slice %17 {offsets = [0, 0], sizes = [8, 8], strides = [1, 1]} : vector<8x32xf32> to vector<8x8xf32>
    %cst_14 = arith.constant dense<0.000000e+00> : vector<8x8xf32>
    %21 = tpu.matmul %19, %20, %cst_14 {dimension_numbers = #tpu.dot_dimension_numbers<[1], [1], [0], [0], [0, 0, 1, 0], [], []>} : vector<8x8xf32>, vector<8x8xf32>, vector<8x8xf32> -> vector<8x8xf32>
    %cst_15 = arith.constant 0.353553385 : f32
    %22 = vector.broadcast %cst_15 : f32 to vector<8x8xf32>
    %23 = arith.mulf %21, %22 : vector<8x8xf32>
    %cst_16 = arith.constant dense<0xFF800000> : vector<8xf32>
    %24 = vector.multi_reduction <maximumf>, %23, %cst_16 [1] : vector<8x8xf32> to vector<8xf32>
    %25 = vector.shape_cast %24 : vector<8xf32> to vector<8x1xf32>
    %26 = vector.broadcast %25 : vector<8x1xf32> to vector<8x8xf32>
    %27 = arith.subf %23, %26 : vector<8x8xf32>
    %28 = math.exp %27 : vector<8x8xf32>
    %cst_17 = arith.constant dense<0.000000e+00> : vector<8xf32>
    %29 = vector.multi_reduction <add>, %28, %cst_17 [1] : vector<8x8xf32> to vector<8xf32>
    %30 = vector.shape_cast %29 : vector<8xf32> to vector<8x1xf32>
    %31 = tpu.reciprocal %30 {approx = true} : vector<8x1xf32> -> vector<8x1xf32>
    %32 = vector.broadcast %31 : vector<8x1xf32> to vector<8x8xf32>
    %33 = arith.mulf %28, %32 : vector<8x8xf32>
    %34 = vector.extract_strided_slice %18 {offsets = [0, 0], sizes = [8, 8], strides = [1, 1]} : vector<8x32xf32> to vector<8x8xf32>
    %cst_18 = arith.constant dense<0.000000e+00> : vector<8x8xf32>
    %35 = tpu.matmul %33, %34, %cst_18 {dimension_numbers = #tpu.dot_dimension_numbers<[1], [0], [0], [1], [0, 0, 1, 1], [], []>} : vector<8x8xf32>, vector<8x8xf32>, vector<8x8xf32> -> vector<8x8xf32>
    %36 = vector.extract_strided_slice %16 {offsets = [0, 8], sizes = [8, 8], strides = [1, 1]} : vector<8x32xf32> to vector<8x8xf32>
    %37 = vector.extract_strided_slice %17 {offsets = [0, 8], sizes = [8, 8], strides = [1, 1]} : vector<8x32xf32> to vector<8x8xf32>
    %cst_19 = arith.constant dense<0.000000e+00> : vector<8x8xf32>
    %38 = tpu.matmul %36, %37, %cst_19 {dimension_numbers = #tpu.dot_dimension_numbers<[1], [1], [0], [0], [0, 0, 1, 0], [], []>} : vector<8x8xf32>, vector<8x8xf32>, vector<8x8xf32> -> vector<8x8xf32>
    %cst_20 = arith.constant 0.353553385 : f32
    %39 = vector.broadcast %cst_20 : f32 to vector<8x8xf32>
    %40 = arith.mulf %38, %39 : vector<8x8xf32>
    %cst_21 = arith.constant dense<0xFF800000> : vector<8xf32>
    %41 = vector.multi_reduction <maximumf>, %40, %cst_21 [1] : vector<8x8xf32> to vector<8xf32>
    %42 = vector.shape_cast %41 : vector<8xf32> to vector<8x1xf32>
    %43 = vector.broadcast %42 : vector<8x1xf32> to vector<8x8xf32>
    %44 = arith.subf %40, %43 : vector<8x8xf32>
    %45 = math.exp %44 : vector<8x8xf32>
    %cst_22 = arith.constant dense<0.000000e+00> : vector<8xf32>
    %46 = vector.multi_reduction <add>, %45, %cst_22 [1] : vector<8x8xf32> to vector<8xf32>
    %47 = vector.shape_cast %46 : vector<8xf32> to vector<8x1xf32>
    %48 = tpu.reciprocal %47 {approx = true} : vector<8x1xf32> -> vector<8x1xf32>
    %49 = vector.broadcast %48 : vector<8x1xf32> to vector<8x8xf32>
    %50 = arith.mulf %45, %49 : vector<8x8xf32>
    %51 = vector.extract_strided_slice %18 {offsets = [0, 8], sizes = [8, 8], strides = [1, 1]} : vector<8x32xf32> to vector<8x8xf32>
    %cst_23 = arith.constant dense<0.000000e+00> : vector<8x8xf32>
    %52 = tpu.matmul %50, %51, %cst_23 {dimension_numbers = #tpu.dot_dimension_numbers<[1], [0], [0], [1], [0, 0, 1, 1], [], []>} : vector<8x8xf32>, vector<8x8xf32>, vector<8x8xf32> -> vector<8x8xf32>
    %53 = vector.extract_strided_slice %16 {offsets = [0, 16], sizes = [8, 8], strides = [1, 1]} : vector<8x32xf32> to vector<8x8xf32>
    %54 = vector.extract_strided_slice %17 {offsets = [0, 16], sizes = [8, 8], strides = [1, 1]} : vector<8x32xf32> to vector<8x8xf32>
    %cst_24 = arith.constant dense<0.000000e+00> : vector<8x8xf32>
    %55 = tpu.matmul %53, %54, %cst_24 {dimension_numbers = #tpu.dot_dimension_numbers<[1], [1], [0], [0], [0, 0, 1, 0], [], []>} : vector<8x8xf32>, vector<8x8xf32>, vector<8x8xf32> -> vector<8x8xf32>
    %cst_25 = arith.constant 0.353553385 : f32
    %56 = vector.broadcast %cst_25 : f32 to vector<8x8xf32>
    %57 = arith.mulf %55, %56 : vector<8x8xf32>
    %cst_26 = arith.constant dense<0xFF800000> : vector<8xf32>
    %58 = vector.multi_reduction <maximumf>, %57, %cst_26 [1] : vector<8x8xf32> to vector<8xf32>
    %59 = vector.shape_cast %58 : vector<8xf32> to vector<8x1xf32>
    %60 = vector.broadcast %59 : vector<8x1xf32> to vector<8x8xf32>
    %61 = arith.subf %57, %60 : vector<8x8xf32>
    %62 = math.exp %61 : vector<8x8xf32>
    %cst_27 = arith.constant dense<0.000000e+00> : vector<8xf32>
    %63 = vector.multi_reduction <add>, %62, %cst_27 [1] : vector<8x8xf32> to vector<8xf32>
    %64 = vector.shape_cast %63 : vector<8xf32> to vector<8x1xf32>
    %65 = tpu.reciprocal %64 {approx = true} : vector<8x1xf32> -> vector<8x1xf32>
    %66 = vector.broadcast %65 : vector<8x1xf32> to vector<8x8xf32>
    %67 = arith.mulf %62, %66 : vector<8x8xf32>
    %68 = vector.extract_strided_slice %18 {offsets = [0, 16], sizes = [8, 8], strides = [1, 1]} : vector<8x32xf32> to vector<8x8xf32>
    %cst_28 = arith.constant dense<0.000000e+00> : vector<8x8xf32>
    %69 = tpu.matmul %67, %68, %cst_28 {dimension_numbers = #tpu.dot_dimension_numbers<[1], [0], [0], [1], [0, 0, 1, 1], [], []>} : vector<8x8xf32>, vector<8x8xf32>, vector<8x8xf32> -> vector<8x8xf32>
    %70 = vector.extract_strided_slice %16 {offsets = [0, 24], sizes = [8, 8], strides = [1, 1]} : vector<8x32xf32> to vector<8x8xf32>
    %71 = vector.extract_strided_slice %17 {offsets = [0, 24], sizes = [8, 8], strides = [1, 1]} : vector<8x32xf32> to vector<8x8xf32>
    %cst_29 = arith.constant dense<0.000000e+00> : vector<8x8xf32>
    %72 = tpu.matmul %70, %71, %cst_29 {dimension_numbers = #tpu.dot_dimension_numbers<[1], [1], [0], [0], [0, 0, 1, 0], [], []>} : vector<8x8xf32>, vector<8x8xf32>, vector<8x8xf32> -> vector<8x8xf32>
    %cst_30 = arith.constant 0.353553385 : f32
    %73 = vector.broadcast %cst_30 : f32 to vector<8x8xf32>
    %74 = arith.mulf %72, %73 : vector<8x8xf32>
    %cst_31 = arith.constant dense<0xFF800000> : vector<8xf32>
    %75 = vector.multi_reduction <maximumf>, %74, %cst_31 [1] : vector<8x8xf32> to vector<8xf32>
    %76 = vector.shape_cast %75 : vector<8xf32> to vector<8x1xf32>
    %77 = vector.broadcast %76 : vector<8x1xf32> to vector<8x8xf32>
    %78 = arith.subf %74, %77 : vector<8x8xf32>
    %79 = math.exp %78 : vector<8x8xf32>
    %cst_32 = arith.constant dense<0.000000e+00> : vector<8xf32>
    %80 = vector.multi_reduction <add>, %79, %cst_32 [1] : vector<8x8xf32> to vector<8xf32>
    %81 = vector.shape_cast %80 : vector<8xf32> to vector<8x1xf32>
    %82 = tpu.reciprocal %81 {approx = true} : vector<8x1xf32> -> vector<8x1xf32>
    %83 = vector.broadcast %82 : vector<8x1xf32> to vector<8x8xf32>
    %84 = arith.mulf %79, %83 : vector<8x8xf32>
    %85 = vector.extract_strided_slice %18 {offsets = [0, 24], sizes = [8, 8], strides = [1, 1]} : vector<8x32xf32> to vector<8x8xf32>
    %cst_33 = arith.constant dense<0.000000e+00> : vector<8x8xf32>
    %86 = tpu.matmul %84, %85, %cst_33 {dimension_numbers = #tpu.dot_dimension_numbers<[1], [0], [0], [1], [0, 0, 1, 1], [], []>} : vector<8x8xf32>, vector<8x8xf32>, vector<8x8xf32> -> vector<8x8xf32>
    %87 = tpu.concatenate %35, %52, %69, %86 in 1 : vector<8x8xf32>, vector<8x8xf32>, vector<8x8xf32>, vector<8x8xf32> -> vector<8x32xf32>
    %88 = vector.extract_strided_slice %9 {offsets = [0, 96], sizes = [32, 32], strides = [1, 1]} : vector<32x128xf32> to vector<32x32xf32>
    %cst_34 = arith.constant dense<0.000000e+00> : vector<8x32xf32>
    %89 = tpu.matmul %87, %88, %cst_34 {dimension_numbers = #tpu.dot_dimension_numbers<[1], [0], [0], [1], [0, 0, 1, 1], [], []>} : vector<8x32xf32>, vector<32x32xf32>, vector<8x32xf32> -> vector<8x32xf32>
    %90 = vector.extract_strided_slice %10 {offsets = [0, 96], sizes = [1, 32], strides = [1, 1]} : vector<1x128xf32> to vector<1x32xf32>
    %91 = vector.broadcast %90 : vector<1x32xf32> to vector<8x32xf32>
    %92 = arith.addf %89, %91 : vector<8x32xf32>
    %93 = arith.addf %1, %92 : vector<8x32xf32>
    %94 = vector.extract_strided_slice %5 {offsets = [1, 0], sizes = [1, 32], strides = [1, 1]} : vector<7x32xf32> to vector<1x32xf32>
    %95 = vector.extract_strided_slice %5 {offsets = [2, 0], sizes = [1, 32], strides = [1, 1]} : vector<7x32xf32> to vector<1x32xf32>
    %cst_35 = arith.constant dense<0.000000e+00> : vector<8xf32>
    %96 = vector.multi_reduction <add>, %93, %cst_35 [1] : vector<8x32xf32> to vector<8xf32>
    %97 = vector.shape_cast %96 : vector<8xf32> to vector<8x1xf32>
    %cst_36 = arith.constant 3.200000e+01 : f32
    %98 = vector.broadcast %cst_36 : f32 to vector<8x1xf32>
    %99 = arith.divf %97, %98 : vector<8x1xf32>
    %100 = vector.broadcast %99 : vector<8x1xf32> to vector<8x32xf32>
    %101 = arith.subf %93, %100 : vector<8x32xf32>
    %102 = arith.mulf %101, %101 : vector<8x32xf32>
    %cst_37 = arith.constant dense<0.000000e+00> : vector<8xf32>
    %103 = vector.multi_reduction <add>, %102, %cst_37 [1] : vector<8x32xf32> to vector<8xf32>
    %104 = vector.shape_cast %103 : vector<8xf32> to vector<8x1xf32>
    %cst_38 = arith.constant 3.200000e+01 : f32
    %105 = vector.broadcast %cst_38 : f32 to vector<8x1xf32>
    %106 = arith.divf %104, %105 : vector<8x1xf32>
    %107 = vector.broadcast %99 : vector<8x1xf32> to vector<8x32xf32>
    %108 = arith.subf %93, %107 : vector<8x32xf32>
    %cst_39 = arith.constant 9.99999974E-6 : f32
    %109 = vector.broadcast %cst_39 : f32 to vector<8x1xf32>
    %110 = arith.addf %106, %109 : vector<8x1xf32>
    %111 = math.rsqrt %110 : vector<8x1xf32>
    %112 = vector.broadcast %111 : vector<8x1xf32> to vector<8x32xf32>
    %113 = arith.mulf %108, %112 : vector<8x32xf32>
    %114 = vector.broadcast %94 : vector<1x32xf32> to vector<8x32xf32>
    %115 = arith.mulf %113, %114 : vector<8x32xf32>
    %116 = vector.broadcast %95 : vector<1x32xf32> to vector<8x32xf32>
    %117 = arith.addf %115, %116 : vector<8x32xf32>
    %c0_40 = arith.constant 0 : index
    %c0_41 = arith.constant 0 : index
    %c0_42 = arith.constant 0 : index
    %118 = vector.load %arg4[%c0_40, %c0_41, %c0_42] : memref<2x32x128xf32, #tpu.memory_space<vmem>>, vector<1x32x128xf32>
    %119 = vector.shape_cast %118 : vector<1x32x128xf32> to vector<32x128xf32>
    %120 = vector.extract_strided_slice %7 {offsets = [1, 0], sizes = [1, 128], strides = [1, 1]} : vector<2x128xf32> to vector<1x128xf32>
    %121 = vector.extract_strided_slice %119 {offsets = [0, 0], sizes = [32, 32], strides = [1, 1]} : vector<32x128xf32> to vector<32x32xf32>
    %cst_43 = arith.constant dense<0.000000e+00> : vector<8x32xf32>
    %122 = tpu.matmul %117, %121, %cst_43 {dimension_numbers = #tpu.dot_dimension_numbers<[1], [0], [0], [1], [0, 0, 1, 1], [], []>} : vector<8x32xf32>, vector<32x32xf32>, vector<8x32xf32> -> vector<8x32xf32>
    %123 = vector.extract_strided_slice %120 {offsets = [0, 0], sizes = [1, 32], strides = [1, 1]} : vector<1x128xf32> to vector<1x32xf32>
    %124 = vector.broadcast %123 : vector<1x32xf32> to vector<8x32xf32>
    %125 = arith.addf %122, %124 : vector<8x32xf32>
    %126 = vector.extract_strided_slice %119 {offsets = [0, 32], sizes = [32, 64], strides = [1, 1]} : vector<32x128xf32> to vector<32x64xf32>
    %cst_44 = arith.constant dense<0.000000e+00> : vector<16x64xf32>
    %127 = tpu.matmul %3, %126, %cst_44 {dimension_numbers = #tpu.dot_dimension_numbers<[1], [0], [0], [1], [0, 0, 1, 1], [], []>} : vector<16x32xf32>, vector<32x64xf32>, vector<16x64xf32> -> vector<16x64xf32>
    %128 = vector.extract_strided_slice %120 {offsets = [0, 32], sizes = [1, 64], strides = [1, 1]} : vector<1x128xf32> to vector<1x64xf32>
    %129 = vector.broadcast %128 : vector<1x64xf32> to vector<16x64xf32>
    %130 = arith.addf %127, %129 : vector<16x64xf32>
    %131 = vector.extract_strided_slice %130 {offsets = [0, 0], sizes = [16, 32], strides = [1, 1]} : vector<16x64xf32> to vector<16x32xf32>
    %132 = vector.extract_strided_slice %130 {offsets = [0, 32], sizes = [16, 32], strides = [1, 1]} : vector<16x64xf32> to vector<16x32xf32>
    %133 = vector.extract_strided_slice %125 {offsets = [0, 0], sizes = [8, 8], strides = [1, 1]} : vector<8x32xf32> to vector<8x8xf32>
    %134 = vector.extract_strided_slice %131 {offsets = [0, 0], sizes = [16, 8], strides = [1, 1]} : vector<16x32xf32> to vector<16x8xf32>
    %cst_45 = arith.constant dense<0.000000e+00> : vector<8x16xf32>
    %135 = tpu.matmul %133, %134, %cst_45 {dimension_numbers = #tpu.dot_dimension_numbers<[1], [1], [0], [0], [0, 0, 1, 0], [], []>} : vector<8x8xf32>, vector<16x8xf32>, vector<8x16xf32> -> vector<8x16xf32>
    %cst_46 = arith.constant 0.353553385 : f32
    %136 = vector.broadcast %cst_46 : f32 to vector<8x16xf32>
    %137 = arith.mulf %135, %136 : vector<8x16xf32>
    %cst_47 = arith.constant dense<0xFF800000> : vector<8xf32>
    %138 = vector.multi_reduction <maximumf>, %137, %cst_47 [1] : vector<8x16xf32> to vector<8xf32>
    %139 = vector.shape_cast %138 : vector<8xf32> to vector<8x1xf32>
    %140 = vector.broadcast %139 : vector<8x1xf32> to vector<8x16xf32>
    %141 = arith.subf %137, %140 : vector<8x16xf32>
    %142 = math.exp %141 : vector<8x16xf32>
    %cst_48 = arith.constant dense<0.000000e+00> : vector<8xf32>
    %143 = vector.multi_reduction <add>, %142, %cst_48 [1] : vector<8x16xf32> to vector<8xf32>
    %144 = vector.shape_cast %143 : vector<8xf32> to vector<8x1xf32>
    %145 = tpu.reciprocal %144 {approx = true} : vector<8x1xf32> -> vector<8x1xf32>
    %146 = vector.broadcast %145 : vector<8x1xf32> to vector<8x16xf32>
    %147 = arith.mulf %142, %146 : vector<8x16xf32>
    %148 = vector.extract_strided_slice %132 {offsets = [0, 0], sizes = [16, 8], strides = [1, 1]} : vector<16x32xf32> to vector<16x8xf32>
    %cst_49 = arith.constant dense<0.000000e+00> : vector<8x8xf32>
    %149 = tpu.matmul %147, %148, %cst_49 {dimension_numbers = #tpu.dot_dimension_numbers<[1], [0], [0], [1], [0, 0, 1, 1], [], []>} : vector<8x16xf32>, vector<16x8xf32>, vector<8x8xf32> -> vector<8x8xf32>
    %150 = vector.extract_strided_slice %125 {offsets = [0, 8], sizes = [8, 8], strides = [1, 1]} : vector<8x32xf32> to vector<8x8xf32>
    %151 = vector.extract_strided_slice %131 {offsets = [0, 8], sizes = [16, 8], strides = [1, 1]} : vector<16x32xf32> to vector<16x8xf32>
    %cst_50 = arith.constant dense<0.000000e+00> : vector<8x16xf32>
    %152 = tpu.matmul %150, %151, %cst_50 {dimension_numbers = #tpu.dot_dimension_numbers<[1], [1], [0], [0], [0, 0, 1, 0], [], []>} : vector<8x8xf32>, vector<16x8xf32>, vector<8x16xf32> -> vector<8x16xf32>
    %cst_51 = arith.constant 0.353553385 : f32
    %153 = vector.broadcast %cst_51 : f32 to vector<8x16xf32>
    %154 = arith.mulf %152, %153 : vector<8x16xf32>
    %cst_52 = arith.constant dense<0xFF800000> : vector<8xf32>
    %155 = vector.multi_reduction <maximumf>, %154, %cst_52 [1] : vector<8x16xf32> to vector<8xf32>
    %156 = vector.shape_cast %155 : vector<8xf32> to vector<8x1xf32>
    %157 = vector.broadcast %156 : vector<8x1xf32> to vector<8x16xf32>
    %158 = arith.subf %154, %157 : vector<8x16xf32>
    %159 = math.exp %158 : vector<8x16xf32>
    %cst_53 = arith.constant dense<0.000000e+00> : vector<8xf32>
    %160 = vector.multi_reduction <add>, %159, %cst_53 [1] : vector<8x16xf32> to vector<8xf32>
    %161 = vector.shape_cast %160 : vector<8xf32> to vector<8x1xf32>
    %162 = tpu.reciprocal %161 {approx = true} : vector<8x1xf32> -> vector<8x1xf32>
    %163 = vector.broadcast %162 : vector<8x1xf32> to vector<8x16xf32>
    %164 = arith.mulf %159, %163 : vector<8x16xf32>
    %165 = vector.extract_strided_slice %132 {offsets = [0, 8], sizes = [16, 8], strides = [1, 1]} : vector<16x32xf32> to vector<16x8xf32>
    %cst_54 = arith.constant dense<0.000000e+00> : vector<8x8xf32>
    %166 = tpu.matmul %164, %165, %cst_54 {dimension_numbers = #tpu.dot_dimension_numbers<[1], [0], [0], [1], [0, 0, 1, 1], [], []>} : vector<8x16xf32>, vector<16x8xf32>, vector<8x8xf32> -> vector<8x8xf32>
    %167 = vector.extract_strided_slice %125 {offsets = [0, 16], sizes = [8, 8], strides = [1, 1]} : vector<8x32xf32> to vector<8x8xf32>
    %168 = vector.extract_strided_slice %131 {offsets = [0, 16], sizes = [16, 8], strides = [1, 1]} : vector<16x32xf32> to vector<16x8xf32>
    %cst_55 = arith.constant dense<0.000000e+00> : vector<8x16xf32>
    %169 = tpu.matmul %167, %168, %cst_55 {dimension_numbers = #tpu.dot_dimension_numbers<[1], [1], [0], [0], [0, 0, 1, 0], [], []>} : vector<8x8xf32>, vector<16x8xf32>, vector<8x16xf32> -> vector<8x16xf32>
    %cst_56 = arith.constant 0.353553385 : f32
    %170 = vector.broadcast %cst_56 : f32 to vector<8x16xf32>
    %171 = arith.mulf %169, %170 : vector<8x16xf32>
    %cst_57 = arith.constant dense<0xFF800000> : vector<8xf32>
    %172 = vector.multi_reduction <maximumf>, %171, %cst_57 [1] : vector<8x16xf32> to vector<8xf32>
    %173 = vector.shape_cast %172 : vector<8xf32> to vector<8x1xf32>
    %174 = vector.broadcast %173 : vector<8x1xf32> to vector<8x16xf32>
    %175 = arith.subf %171, %174 : vector<8x16xf32>
    %176 = math.exp %175 : vector<8x16xf32>
    %cst_58 = arith.constant dense<0.000000e+00> : vector<8xf32>
    %177 = vector.multi_reduction <add>, %176, %cst_58 [1] : vector<8x16xf32> to vector<8xf32>
    %178 = vector.shape_cast %177 : vector<8xf32> to vector<8x1xf32>
    %179 = tpu.reciprocal %178 {approx = true} : vector<8x1xf32> -> vector<8x1xf32>
    %180 = vector.broadcast %179 : vector<8x1xf32> to vector<8x16xf32>
    %181 = arith.mulf %176, %180 : vector<8x16xf32>
    %182 = vector.extract_strided_slice %132 {offsets = [0, 16], sizes = [16, 8], strides = [1, 1]} : vector<16x32xf32> to vector<16x8xf32>
    %cst_59 = arith.constant dense<0.000000e+00> : vector<8x8xf32>
    %183 = tpu.matmul %181, %182, %cst_59 {dimension_numbers = #tpu.dot_dimension_numbers<[1], [0], [0], [1], [0, 0, 1, 1], [], []>} : vector<8x16xf32>, vector<16x8xf32>, vector<8x8xf32> -> vector<8x8xf32>
    %184 = vector.extract_strided_slice %125 {offsets = [0, 24], sizes = [8, 8], strides = [1, 1]} : vector<8x32xf32> to vector<8x8xf32>
    %185 = vector.extract_strided_slice %131 {offsets = [0, 24], sizes = [16, 8], strides = [1, 1]} : vector<16x32xf32> to vector<16x8xf32>
    %cst_60 = arith.constant dense<0.000000e+00> : vector<8x16xf32>
    %186 = tpu.matmul %184, %185, %cst_60 {dimension_numbers = #tpu.dot_dimension_numbers<[1], [1], [0], [0], [0, 0, 1, 0], [], []>} : vector<8x8xf32>, vector<16x8xf32>, vector<8x16xf32> -> vector<8x16xf32>
    %cst_61 = arith.constant 0.353553385 : f32
    %187 = vector.broadcast %cst_61 : f32 to vector<8x16xf32>
    %188 = arith.mulf %186, %187 : vector<8x16xf32>
    %cst_62 = arith.constant dense<0xFF800000> : vector<8xf32>
    %189 = vector.multi_reduction <maximumf>, %188, %cst_62 [1] : vector<8x16xf32> to vector<8xf32>
    %190 = vector.shape_cast %189 : vector<8xf32> to vector<8x1xf32>
    %191 = vector.broadcast %190 : vector<8x1xf32> to vector<8x16xf32>
    %192 = arith.subf %188, %191 : vector<8x16xf32>
    %193 = math.exp %192 : vector<8x16xf32>
    %cst_63 = arith.constant dense<0.000000e+00> : vector<8xf32>
    %194 = vector.multi_reduction <add>, %193, %cst_63 [1] : vector<8x16xf32> to vector<8xf32>
    %195 = vector.shape_cast %194 : vector<8xf32> to vector<8x1xf32>
    %196 = tpu.reciprocal %195 {approx = true} : vector<8x1xf32> -> vector<8x1xf32>
    %197 = vector.broadcast %196 : vector<8x1xf32> to vector<8x16xf32>
    %198 = arith.mulf %193, %197 : vector<8x16xf32>
    %199 = vector.extract_strided_slice %132 {offsets = [0, 24], sizes = [16, 8], strides = [1, 1]} : vector<16x32xf32> to vector<16x8xf32>
    %cst_64 = arith.constant dense<0.000000e+00> : vector<8x8xf32>
    %200 = tpu.matmul %198, %199, %cst_64 {dimension_numbers = #tpu.dot_dimension_numbers<[1], [0], [0], [1], [0, 0, 1, 1], [], []>} : vector<8x16xf32>, vector<16x8xf32>, vector<8x8xf32> -> vector<8x8xf32>
    %201 = tpu.concatenate %149, %166, %183, %200 in 1 : vector<8x8xf32>, vector<8x8xf32>, vector<8x8xf32>, vector<8x8xf32> -> vector<8x32xf32>
    %202 = vector.extract_strided_slice %119 {offsets = [0, 96], sizes = [32, 32], strides = [1, 1]} : vector<32x128xf32> to vector<32x32xf32>
    %cst_65 = arith.constant dense<0.000000e+00> : vector<8x32xf32>
    %203 = tpu.matmul %201, %202, %cst_65 {dimension_numbers = #tpu.dot_dimension_numbers<[1], [0], [0], [1], [0, 0, 1, 1], [], []>} : vector<8x32xf32>, vector<32x32xf32>, vector<8x32xf32> -> vector<8x32xf32>
    %204 = vector.extract_strided_slice %120 {offsets = [0, 96], sizes = [1, 32], strides = [1, 1]} : vector<1x128xf32> to vector<1x32xf32>
    %205 = vector.broadcast %204 : vector<1x32xf32> to vector<8x32xf32>
    %206 = arith.addf %203, %205 : vector<8x32xf32>
    %207 = arith.addf %117, %206 : vector<8x32xf32>
    %208 = vector.extract_strided_slice %5 {offsets = [3, 0], sizes = [1, 32], strides = [1, 1]} : vector<7x32xf32> to vector<1x32xf32>
    %209 = vector.extract_strided_slice %5 {offsets = [4, 0], sizes = [1, 32], strides = [1, 1]} : vector<7x32xf32> to vector<1x32xf32>
    %cst_66 = arith.constant dense<0.000000e+00> : vector<8xf32>
    %210 = vector.multi_reduction <add>, %207, %cst_66 [1] : vector<8x32xf32> to vector<8xf32>
    %211 = vector.shape_cast %210 : vector<8xf32> to vector<8x1xf32>
    %cst_67 = arith.constant 3.200000e+01 : f32
    %212 = vector.broadcast %cst_67 : f32 to vector<8x1xf32>
    %213 = arith.divf %211, %212 : vector<8x1xf32>
    %214 = vector.broadcast %213 : vector<8x1xf32> to vector<8x32xf32>
    %215 = arith.subf %207, %214 : vector<8x32xf32>
    %216 = arith.mulf %215, %215 : vector<8x32xf32>
    %cst_68 = arith.constant dense<0.000000e+00> : vector<8xf32>
    %217 = vector.multi_reduction <add>, %216, %cst_68 [1] : vector<8x32xf32> to vector<8xf32>
    %218 = vector.shape_cast %217 : vector<8xf32> to vector<8x1xf32>
    %cst_69 = arith.constant 3.200000e+01 : f32
    %219 = vector.broadcast %cst_69 : f32 to vector<8x1xf32>
    %220 = arith.divf %218, %219 : vector<8x1xf32>
    %221 = vector.broadcast %213 : vector<8x1xf32> to vector<8x32xf32>
    %222 = arith.subf %207, %221 : vector<8x32xf32>
    %cst_70 = arith.constant 9.99999974E-6 : f32
    %223 = vector.broadcast %cst_70 : f32 to vector<8x1xf32>
    %224 = arith.addf %220, %223 : vector<8x1xf32>
    %225 = math.rsqrt %224 : vector<8x1xf32>
    %226 = vector.broadcast %225 : vector<8x1xf32> to vector<8x32xf32>
    %227 = arith.mulf %222, %226 : vector<8x32xf32>
    %228 = vector.broadcast %208 : vector<1x32xf32> to vector<8x32xf32>
    %229 = arith.mulf %227, %228 : vector<8x32xf32>
    %230 = vector.broadcast %209 : vector<1x32xf32> to vector<8x32xf32>
    %231 = arith.addf %229, %230 : vector<8x32xf32>
    %c0_71 = arith.constant 0 : index
    %c0_72 = arith.constant 0 : index
    %c0_73 = arith.constant 0 : index
    %232 = vector.load %arg6[%c0_71, %c0_72, %c0_73] : memref<2x32x64xf32, #tpu.memory_space<vmem>>, vector<1x32x64xf32>
    %233 = vector.shape_cast %232 : vector<1x32x64xf32> to vector<32x64xf32>
    %cst_74 = arith.constant dense<0.000000e+00> : vector<8x64xf32>
    %234 = tpu.matmul %231, %233, %cst_74 {dimension_numbers = #tpu.dot_dimension_numbers<[1], [0], [0], [1], [0, 0, 1, 1], [], []>} : vector<8x32xf32>, vector<32x64xf32>, vector<8x64xf32> -> vector<8x64xf32>
    %c0_75 = arith.constant 0 : index
    %c0_76 = arith.constant 0 : index
    %c0_77 = arith.constant 0 : index
    %235 = vector.load %arg7[%c0_75, %c0_76, %c0_77] : memref<2x1x64xf32, #tpu.memory_space<vmem>>, vector<1x1x64xf32>
    %236 = vector.shape_cast %235 : vector<1x1x64xf32> to vector<1x64xf32>
    %237 = vector.broadcast %236 : vector<1x64xf32> to vector<8x64xf32>
    %238 = arith.addf %234, %237 : vector<8x64xf32>
    %cst_78 = arith.constant 0.000000e+00 : f32
    %239 = vector.broadcast %cst_78 : f32 to vector<8x64xf32>
    %240 = arith.maximumf %238, %239 : vector<8x64xf32>
    %c0_79 = arith.constant 0 : index
    %c0_80 = arith.constant 0 : index
    %c0_81 = arith.constant 0 : index
    %241 = vector.load %arg8[%c0_79, %c0_80, %c0_81] : memref<2x64x32xf32, #tpu.memory_space<vmem>>, vector<1x64x32xf32>
    %242 = vector.shape_cast %241 : vector<1x64x32xf32> to vector<64x32xf32>
    %cst_82 = arith.constant dense<0.000000e+00> : vector<8x32xf32>
    %243 = tpu.matmul %240, %242, %cst_82 {dimension_numbers = #tpu.dot_dimension_numbers<[1], [0], [0], [1], [0, 0, 1, 1], [], []>} : vector<8x64xf32>, vector<64x32xf32>, vector<8x32xf32> -> vector<8x32xf32>
    %244 = vector.extract_strided_slice %5 {offsets = [0, 0], sizes = [1, 32], strides = [1, 1]} : vector<7x32xf32> to vector<1x32xf32>
    %245 = vector.broadcast %244 : vector<1x32xf32> to vector<8x32xf32>
    %246 = arith.addf %243, %245 : vector<8x32xf32>
    %247 = arith.addf %231, %246 : vector<8x32xf32>
    %248 = vector.extract_strided_slice %5 {offsets = [5, 0], sizes = [1, 32], strides = [1, 1]} : vector<7x32xf32> to vector<1x32xf32>
    %249 = vector.extract_strided_slice %5 {offsets = [6, 0], sizes = [1, 32], strides = [1, 1]} : vector<7x32xf32> to vector<1x32xf32>
    %cst_83 = arith.constant dense<0.000000e+00> : vector<8xf32>
    %250 = vector.multi_reduction <add>, %247, %cst_83 [1] : vector<8x32xf32> to vector<8xf32>
    %251 = vector.shape_cast %250 : vector<8xf32> to vector<8x1xf32>
    %cst_84 = arith.constant 3.200000e+01 : f32
    %252 = vector.broadcast %cst_84 : f32 to vector<8x1xf32>
    %253 = arith.divf %251, %252 : vector<8x1xf32>
    %254 = vector.broadcast %253 : vector<8x1xf32> to vector<8x32xf32>
    %255 = arith.subf %247, %254 : vector<8x32xf32>
    %256 = arith.mulf %255, %255 : vector<8x32xf32>
    %cst_85 = arith.constant dense<0.000000e+00> : vector<8xf32>
    %257 = vector.multi_reduction <add>, %256, %cst_85 [1] : vector<8x32xf32> to vector<8xf32>
    %258 = vector.shape_cast %257 : vector<8xf32> to vector<8x1xf32>
    %cst_86 = arith.constant 3.200000e+01 : f32
    %259 = vector.broadcast %cst_86 : f32 to vector<8x1xf32>
    %260 = arith.divf %258, %259 : vector<8x1xf32>
    %261 = vector.broadcast %253 : vector<8x1xf32> to vector<8x32xf32>
    %262 = arith.subf %247, %261 : vector<8x32xf32>
    %cst_87 = arith.constant 9.99999974E-6 : f32
    %263 = vector.broadcast %cst_87 : f32 to vector<8x1xf32>
    %264 = arith.addf %260, %263 : vector<8x1xf32>
    %265 = math.rsqrt %264 : vector<8x1xf32>
    %266 = vector.broadcast %265 : vector<8x1xf32> to vector<8x32xf32>
    %267 = arith.mulf %262, %266 : vector<8x32xf32>
    %268 = vector.broadcast %248 : vector<1x32xf32> to vector<8x32xf32>
    %269 = arith.mulf %267, %268 : vector<8x32xf32>
    %270 = vector.broadcast %249 : vector<1x32xf32> to vector<8x32xf32>
    %271 = arith.addf %269, %270 : vector<8x32xf32>
    %c1 = arith.constant 1 : index
    %c0_88 = arith.constant 0 : index
    %c0_89 = arith.constant 0 : index
    %272 = vector.load %arg9[%c1, %c0_88, %c0_89] : memref<2x7x32xf32, #tpu.memory_space<vmem>>, vector<1x7x32xf32>
    %273 = vector.shape_cast %272 : vector<1x7x32xf32> to vector<7x32xf32>
    %c1_90 = arith.constant 1 : index
    %c0_91 = arith.constant 0 : index
    %c0_92 = arith.constant 0 : index
    %274 = vector.load %arg5[%c1_90, %c0_91, %c0_92] : memref<2x2x128xf32, #tpu.memory_space<vmem>>, vector<1x2x128xf32>
    %275 = vector.shape_cast %274 : vector<1x2x128xf32> to vector<2x128xf32>
    %c1_93 = arith.constant 1 : index
    %c0_94 = arith.constant 0 : index
    %c0_95 = arith.constant 0 : index
    %276 = vector.load %arg3[%c1_93, %c0_94, %c0_95] : memref<2x32x128xf32, #tpu.memory_space<vmem>>, vector<1x32x128xf32>
    %277 = vector.shape_cast %276 : vector<1x32x128xf32> to vector<32x128xf32>
    %278 = vector.extract_strided_slice %275 {offsets = [0, 0], sizes = [1, 128], strides = [1, 1]} : vector<2x128xf32> to vector<1x128xf32>
    %279 = vector.extract_strided_slice %277 {offsets = [0, 0], sizes = [32, 96], strides = [1, 1]} : vector<32x128xf32> to vector<32x96xf32>
    %cst_96 = arith.constant dense<0.000000e+00> : vector<8x96xf32>
    %280 = tpu.matmul %271, %279, %cst_96 {dimension_numbers = #tpu.dot_dimension_numbers<[1], [0], [0], [1], [0, 0, 1, 1], [], []>} : vector<8x32xf32>, vector<32x96xf32>, vector<8x96xf32> -> vector<8x96xf32>
    %281 = vector.extract_strided_slice %278 {offsets = [0, 0], sizes = [1, 96], strides = [1, 1]} : vector<1x128xf32> to vector<1x96xf32>
    %282 = vector.broadcast %281 : vector<1x96xf32> to vector<8x96xf32>
    %283 = arith.addf %280, %282 : vector<8x96xf32>
    %284 = vector.extract_strided_slice %283 {offsets = [0, 0], sizes = [8, 32], strides = [1, 1]} : vector<8x96xf32> to vector<8x32xf32>
    %285 = vector.extract_strided_slice %283 {offsets = [0, 32], sizes = [8, 32], strides = [1, 1]} : vector<8x96xf32> to vector<8x32xf32>
    %286 = vector.extract_strided_slice %283 {offsets = [0, 64], sizes = [8, 32], strides = [1, 1]} : vector<8x96xf32> to vector<8x32xf32>
    %287 = vector.extract_strided_slice %284 {offsets = [0, 0], sizes = [8, 8], strides = [1, 1]} : vector<8x32xf32> to vector<8x8xf32>
    %288 = vector.extract_strided_slice %285 {offsets = [0, 0], sizes = [8, 8], strides = [1, 1]} : vector<8x32xf32> to vector<8x8xf32>
    %cst_97 = arith.constant dense<0.000000e+00> : vector<8x8xf32>
    %289 = tpu.matmul %287, %288, %cst_97 {dimension_numbers = #tpu.dot_dimension_numbers<[1], [1], [0], [0], [0, 0, 1, 0], [], []>} : vector<8x8xf32>, vector<8x8xf32>, vector<8x8xf32> -> vector<8x8xf32>
    %cst_98 = arith.constant 0.353553385 : f32
    %290 = vector.broadcast %cst_98 : f32 to vector<8x8xf32>
    %291 = arith.mulf %289, %290 : vector<8x8xf32>
    %cst_99 = arith.constant dense<0xFF800000> : vector<8xf32>
    %292 = vector.multi_reduction <maximumf>, %291, %cst_99 [1] : vector<8x8xf32> to vector<8xf32>
    %293 = vector.shape_cast %292 : vector<8xf32> to vector<8x1xf32>
    %294 = vector.broadcast %293 : vector<8x1xf32> to vector<8x8xf32>
    %295 = arith.subf %291, %294 : vector<8x8xf32>
    %296 = math.exp %295 : vector<8x8xf32>
    %cst_100 = arith.constant dense<0.000000e+00> : vector<8xf32>
    %297 = vector.multi_reduction <add>, %296, %cst_100 [1] : vector<8x8xf32> to vector<8xf32>
    %298 = vector.shape_cast %297 : vector<8xf32> to vector<8x1xf32>
    %299 = tpu.reciprocal %298 {approx = true} : vector<8x1xf32> -> vector<8x1xf32>
    %300 = vector.broadcast %299 : vector<8x1xf32> to vector<8x8xf32>
    %301 = arith.mulf %296, %300 : vector<8x8xf32>
    %302 = vector.extract_strided_slice %286 {offsets = [0, 0], sizes = [8, 8], strides = [1, 1]} : vector<8x32xf32> to vector<8x8xf32>
    %cst_101 = arith.constant dense<0.000000e+00> : vector<8x8xf32>
    %303 = tpu.matmul %301, %302, %cst_101 {dimension_numbers = #tpu.dot_dimension_numbers<[1], [0], [0], [1], [0, 0, 1, 1], [], []>} : vector<8x8xf32>, vector<8x8xf32>, vector<8x8xf32> -> vector<8x8xf32>
    %304 = vector.extract_strided_slice %284 {offsets = [0, 8], sizes = [8, 8], strides = [1, 1]} : vector<8x32xf32> to vector<8x8xf32>
    %305 = vector.extract_strided_slice %285 {offsets = [0, 8], sizes = [8, 8], strides = [1, 1]} : vector<8x32xf32> to vector<8x8xf32>
    %cst_102 = arith.constant dense<0.000000e+00> : vector<8x8xf32>
    %306 = tpu.matmul %304, %305, %cst_102 {dimension_numbers = #tpu.dot_dimension_numbers<[1], [1], [0], [0], [0, 0, 1, 0], [], []>} : vector<8x8xf32>, vector<8x8xf32>, vector<8x8xf32> -> vector<8x8xf32>
    %cst_103 = arith.constant 0.353553385 : f32
    %307 = vector.broadcast %cst_103 : f32 to vector<8x8xf32>
    %308 = arith.mulf %306, %307 : vector<8x8xf32>
    %cst_104 = arith.constant dense<0xFF800000> : vector<8xf32>
    %309 = vector.multi_reduction <maximumf>, %308, %cst_104 [1] : vector<8x8xf32> to vector<8xf32>
    %310 = vector.shape_cast %309 : vector<8xf32> to vector<8x1xf32>
    %311 = vector.broadcast %310 : vector<8x1xf32> to vector<8x8xf32>
    %312 = arith.subf %308, %311 : vector<8x8xf32>
    %313 = math.exp %312 : vector<8x8xf32>
    %cst_105 = arith.constant dense<0.000000e+00> : vector<8xf32>
    %314 = vector.multi_reduction <add>, %313, %cst_105 [1] : vector<8x8xf32> to vector<8xf32>
    %315 = vector.shape_cast %314 : vector<8xf32> to vector<8x1xf32>
    %316 = tpu.reciprocal %315 {approx = true} : vector<8x1xf32> -> vector<8x1xf32>
    %317 = vector.broadcast %316 : vector<8x1xf32> to vector<8x8xf32>
    %318 = arith.mulf %313, %317 : vector<8x8xf32>
    %319 = vector.extract_strided_slice %286 {offsets = [0, 8], sizes = [8, 8], strides = [1, 1]} : vector<8x32xf32> to vector<8x8xf32>
    %cst_106 = arith.constant dense<0.000000e+00> : vector<8x8xf32>
    %320 = tpu.matmul %318, %319, %cst_106 {dimension_numbers = #tpu.dot_dimension_numbers<[1], [0], [0], [1], [0, 0, 1, 1], [], []>} : vector<8x8xf32>, vector<8x8xf32>, vector<8x8xf32> -> vector<8x8xf32>
    %321 = vector.extract_strided_slice %284 {offsets = [0, 16], sizes = [8, 8], strides = [1, 1]} : vector<8x32xf32> to vector<8x8xf32>
    %322 = vector.extract_strided_slice %285 {offsets = [0, 16], sizes = [8, 8], strides = [1, 1]} : vector<8x32xf32> to vector<8x8xf32>
    %cst_107 = arith.constant dense<0.000000e+00> : vector<8x8xf32>
    %323 = tpu.matmul %321, %322, %cst_107 {dimension_numbers = #tpu.dot_dimension_numbers<[1], [1], [0], [0], [0, 0, 1, 0], [], []>} : vector<8x8xf32>, vector<8x8xf32>, vector<8x8xf32> -> vector<8x8xf32>
    %cst_108 = arith.constant 0.353553385 : f32
    %324 = vector.broadcast %cst_108 : f32 to vector<8x8xf32>
    %325 = arith.mulf %323, %324 : vector<8x8xf32>
    %cst_109 = arith.constant dense<0xFF800000> : vector<8xf32>
    %326 = vector.multi_reduction <maximumf>, %325, %cst_109 [1] : vector<8x8xf32> to vector<8xf32>
    %327 = vector.shape_cast %326 : vector<8xf32> to vector<8x1xf32>
    %328 = vector.broadcast %327 : vector<8x1xf32> to vector<8x8xf32>
    %329 = arith.subf %325, %328 : vector<8x8xf32>
    %330 = math.exp %329 : vector<8x8xf32>
    %cst_110 = arith.constant dense<0.000000e+00> : vector<8xf32>
    %331 = vector.multi_reduction <add>, %330, %cst_110 [1] : vector<8x8xf32> to vector<8xf32>
    %332 = vector.shape_cast %331 : vector<8xf32> to vector<8x1xf32>
    %333 = tpu.reciprocal %332 {approx = true} : vector<8x1xf32> -> vector<8x1xf32>
    %334 = vector.broadcast %333 : vector<8x1xf32> to vector<8x8xf32>
    %335 = arith.mulf %330, %334 : vector<8x8xf32>
    %336 = vector.extract_strided_slice %286 {offsets = [0, 16], sizes = [8, 8], strides = [1, 1]} : vector<8x32xf32> to vector<8x8xf32>
    %cst_111 = arith.constant dense<0.000000e+00> : vector<8x8xf32>
    %337 = tpu.matmul %335, %336, %cst_111 {dimension_numbers = #tpu.dot_dimension_numbers<[1], [0], [0], [1], [0, 0, 1, 1], [], []>} : vector<8x8xf32>, vector<8x8xf32>, vector<8x8xf32> -> vector<8x8xf32>
    %338 = vector.extract_strided_slice %284 {offsets = [0, 24], sizes = [8, 8], strides = [1, 1]} : vector<8x32xf32> to vector<8x8xf32>
    %339 = vector.extract_strided_slice %285 {offsets = [0, 24], sizes = [8, 8], strides = [1, 1]} : vector<8x32xf32> to vector<8x8xf32>
    %cst_112 = arith.constant dense<0.000000e+00> : vector<8x8xf32>
    %340 = tpu.matmul %338, %339, %cst_112 {dimension_numbers = #tpu.dot_dimension_numbers<[1], [1], [0], [0], [0, 0, 1, 0], [], []>} : vector<8x8xf32>, vector<8x8xf32>, vector<8x8xf32> -> vector<8x8xf32>
    %cst_113 = arith.constant 0.353553385 : f32
    %341 = vector.broadcast %cst_113 : f32 to vector<8x8xf32>
    %342 = arith.mulf %340, %341 : vector<8x8xf32>
    %cst_114 = arith.constant dense<0xFF800000> : vector<8xf32>
    %343 = vector.multi_reduction <maximumf>, %342, %cst_114 [1] : vector<8x8xf32> to vector<8xf32>
    %344 = vector.shape_cast %343 : vector<8xf32> to vector<8x1xf32>
    %345 = vector.broadcast %344 : vector<8x1xf32> to vector<8x8xf32>
    %346 = arith.subf %342, %345 : vector<8x8xf32>
    %347 = math.exp %346 : vector<8x8xf32>
    %cst_115 = arith.constant dense<0.000000e+00> : vector<8xf32>
    %348 = vector.multi_reduction <add>, %347, %cst_115 [1] : vector<8x8xf32> to vector<8xf32>
    %349 = vector.shape_cast %348 : vector<8xf32> to vector<8x1xf32>
    %350 = tpu.reciprocal %349 {approx = true} : vector<8x1xf32> -> vector<8x1xf32>
    %351 = vector.broadcast %350 : vector<8x1xf32> to vector<8x8xf32>
    %352 = arith.mulf %347, %351 : vector<8x8xf32>
    %353 = vector.extract_strided_slice %286 {offsets = [0, 24], sizes = [8, 8], strides = [1, 1]} : vector<8x32xf32> to vector<8x8xf32>
    %cst_116 = arith.constant dense<0.000000e+00> : vector<8x8xf32>
    %354 = tpu.matmul %352, %353, %cst_116 {dimension_numbers = #tpu.dot_dimension_numbers<[1], [0], [0], [1], [0, 0, 1, 1], [], []>} : vector<8x8xf32>, vector<8x8xf32>, vector<8x8xf32> -> vector<8x8xf32>
    %355 = tpu.concatenate %303, %320, %337, %354 in 1 : vector<8x8xf32>, vector<8x8xf32>, vector<8x8xf32>, vector<8x8xf32> -> vector<8x32xf32>
    %356 = vector.extract_strided_slice %277 {offsets = [0, 96], sizes = [32, 32], strides = [1, 1]} : vector<32x128xf32> to vector<32x32xf32>
    %cst_117 = arith.constant dense<0.000000e+00> : vector<8x32xf32>
    %357 = tpu.matmul %355, %356, %cst_117 {dimension_numbers = #tpu.dot_dimension_numbers<[1], [0], [0], [1], [0, 0, 1, 1], [], []>} : vector<8x32xf32>, vector<32x32xf32>, vector<8x32xf32> -> vector<8x32xf32>
    %358 = vector.extract_strided_slice %278 {offsets = [0, 96], sizes = [1, 32], strides = [1, 1]} : vector<1x128xf32> to vector<1x32xf32>
    %359 = vector.broadcast %358 : vector<1x32xf32> to vector<8x32xf32>
    %360 = arith.addf %357, %359 : vector<8x32xf32>
    %361 = arith.addf %271, %360 : vector<8x32xf32>
    %362 = vector.extract_strided_slice %273 {offsets = [1, 0], sizes = [1, 32], strides = [1, 1]} : vector<7x32xf32> to vector<1x32xf32>
    %363 = vector.extract_strided_slice %273 {offsets = [2, 0], sizes = [1, 32], strides = [1, 1]} : vector<7x32xf32> to vector<1x32xf32>
    %cst_118 = arith.constant dense<0.000000e+00> : vector<8xf32>
    %364 = vector.multi_reduction <add>, %361, %cst_118 [1] : vector<8x32xf32> to vector<8xf32>
    %365 = vector.shape_cast %364 : vector<8xf32> to vector<8x1xf32>
    %cst_119 = arith.constant 3.200000e+01 : f32
    %366 = vector.broadcast %cst_119 : f32 to vector<8x1xf32>
    %367 = arith.divf %365, %366 : vector<8x1xf32>
    %368 = vector.broadcast %367 : vector<8x1xf32> to vector<8x32xf32>
    %369 = arith.subf %361, %368 : vector<8x32xf32>
    %370 = arith.mulf %369, %369 : vector<8x32xf32>
    %cst_120 = arith.constant dense<0.000000e+00> : vector<8xf32>
    %371 = vector.multi_reduction <add>, %370, %cst_120 [1] : vector<8x32xf32> to vector<8xf32>
    %372 = vector.shape_cast %371 : vector<8xf32> to vector<8x1xf32>
    %cst_121 = arith.constant 3.200000e+01 : f32
    %373 = vector.broadcast %cst_121 : f32 to vector<8x1xf32>
    %374 = arith.divf %372, %373 : vector<8x1xf32>
    %375 = vector.broadcast %367 : vector<8x1xf32> to vector<8x32xf32>
    %376 = arith.subf %361, %375 : vector<8x32xf32>
    %cst_122 = arith.constant 9.99999974E-6 : f32
    %377 = vector.broadcast %cst_122 : f32 to vector<8x1xf32>
    %378 = arith.addf %374, %377 : vector<8x1xf32>
    %379 = math.rsqrt %378 : vector<8x1xf32>
    %380 = vector.broadcast %379 : vector<8x1xf32> to vector<8x32xf32>
    %381 = arith.mulf %376, %380 : vector<8x32xf32>
    %382 = vector.broadcast %362 : vector<1x32xf32> to vector<8x32xf32>
    %383 = arith.mulf %381, %382 : vector<8x32xf32>
    %384 = vector.broadcast %363 : vector<1x32xf32> to vector<8x32xf32>
    %385 = arith.addf %383, %384 : vector<8x32xf32>
    %c1_123 = arith.constant 1 : index
    %c0_124 = arith.constant 0 : index
    %c0_125 = arith.constant 0 : index
    %386 = vector.load %arg4[%c1_123, %c0_124, %c0_125] : memref<2x32x128xf32, #tpu.memory_space<vmem>>, vector<1x32x128xf32>
    %387 = vector.shape_cast %386 : vector<1x32x128xf32> to vector<32x128xf32>
    %388 = vector.extract_strided_slice %275 {offsets = [1, 0], sizes = [1, 128], strides = [1, 1]} : vector<2x128xf32> to vector<1x128xf32>
    %389 = vector.extract_strided_slice %387 {offsets = [0, 0], sizes = [32, 32], strides = [1, 1]} : vector<32x128xf32> to vector<32x32xf32>
    %cst_126 = arith.constant dense<0.000000e+00> : vector<8x32xf32>
    %390 = tpu.matmul %385, %389, %cst_126 {dimension_numbers = #tpu.dot_dimension_numbers<[1], [0], [0], [1], [0, 0, 1, 1], [], []>} : vector<8x32xf32>, vector<32x32xf32>, vector<8x32xf32> -> vector<8x32xf32>
    %391 = vector.extract_strided_slice %388 {offsets = [0, 0], sizes = [1, 32], strides = [1, 1]} : vector<1x128xf32> to vector<1x32xf32>
    %392 = vector.broadcast %391 : vector<1x32xf32> to vector<8x32xf32>
    %393 = arith.addf %390, %392 : vector<8x32xf32>
    %394 = vector.extract_strided_slice %387 {offsets = [0, 32], sizes = [32, 64], strides = [1, 1]} : vector<32x128xf32> to vector<32x64xf32>
    %cst_127 = arith.constant dense<0.000000e+00> : vector<16x64xf32>
    %395 = tpu.matmul %3, %394, %cst_127 {dimension_numbers = #tpu.dot_dimension_numbers<[1], [0], [0], [1], [0, 0, 1, 1], [], []>} : vector<16x32xf32>, vector<32x64xf32>, vector<16x64xf32> -> vector<16x64xf32>
    %396 = vector.extract_strided_slice %388 {offsets = [0, 32], sizes = [1, 64], strides = [1, 1]} : vector<1x128xf32> to vector<1x64xf32>
    %397 = vector.broadcast %396 : vector<1x64xf32> to vector<16x64xf32>
    %398 = arith.addf %395, %397 : vector<16x64xf32>
    %399 = vector.extract_strided_slice %398 {offsets = [0, 0], sizes = [16, 32], strides = [1, 1]} : vector<16x64xf32> to vector<16x32xf32>
    %400 = vector.extract_strided_slice %398 {offsets = [0, 32], sizes = [16, 32], strides = [1, 1]} : vector<16x64xf32> to vector<16x32xf32>
    %401 = vector.extract_strided_slice %393 {offsets = [0, 0], sizes = [8, 8], strides = [1, 1]} : vector<8x32xf32> to vector<8x8xf32>
    %402 = vector.extract_strided_slice %399 {offsets = [0, 0], sizes = [16, 8], strides = [1, 1]} : vector<16x32xf32> to vector<16x8xf32>
    %cst_128 = arith.constant dense<0.000000e+00> : vector<8x16xf32>
    %403 = tpu.matmul %401, %402, %cst_128 {dimension_numbers = #tpu.dot_dimension_numbers<[1], [1], [0], [0], [0, 0, 1, 0], [], []>} : vector<8x8xf32>, vector<16x8xf32>, vector<8x16xf32> -> vector<8x16xf32>
    %cst_129 = arith.constant 0.353553385 : f32
    %404 = vector.broadcast %cst_129 : f32 to vector<8x16xf32>
    %405 = arith.mulf %403, %404 : vector<8x16xf32>
    %cst_130 = arith.constant dense<0xFF800000> : vector<8xf32>
    %406 = vector.multi_reduction <maximumf>, %405, %cst_130 [1] : vector<8x16xf32> to vector<8xf32>
    %407 = vector.shape_cast %406 : vector<8xf32> to vector<8x1xf32>
    %408 = vector.broadcast %407 : vector<8x1xf32> to vector<8x16xf32>
    %409 = arith.subf %405, %408 : vector<8x16xf32>
    %410 = math.exp %409 : vector<8x16xf32>
    %cst_131 = arith.constant dense<0.000000e+00> : vector<8xf32>
    %411 = vector.multi_reduction <add>, %410, %cst_131 [1] : vector<8x16xf32> to vector<8xf32>
    %412 = vector.shape_cast %411 : vector<8xf32> to vector<8x1xf32>
    %413 = tpu.reciprocal %412 {approx = true} : vector<8x1xf32> -> vector<8x1xf32>
    %414 = vector.broadcast %413 : vector<8x1xf32> to vector<8x16xf32>
    %415 = arith.mulf %410, %414 : vector<8x16xf32>
    %416 = vector.extract_strided_slice %400 {offsets = [0, 0], sizes = [16, 8], strides = [1, 1]} : vector<16x32xf32> to vector<16x8xf32>
    %cst_132 = arith.constant dense<0.000000e+00> : vector<8x8xf32>
    %417 = tpu.matmul %415, %416, %cst_132 {dimension_numbers = #tpu.dot_dimension_numbers<[1], [0], [0], [1], [0, 0, 1, 1], [], []>} : vector<8x16xf32>, vector<16x8xf32>, vector<8x8xf32> -> vector<8x8xf32>
    %418 = vector.extract_strided_slice %393 {offsets = [0, 8], sizes = [8, 8], strides = [1, 1]} : vector<8x32xf32> to vector<8x8xf32>
    %419 = vector.extract_strided_slice %399 {offsets = [0, 8], sizes = [16, 8], strides = [1, 1]} : vector<16x32xf32> to vector<16x8xf32>
    %cst_133 = arith.constant dense<0.000000e+00> : vector<8x16xf32>
    %420 = tpu.matmul %418, %419, %cst_133 {dimension_numbers = #tpu.dot_dimension_numbers<[1], [1], [0], [0], [0, 0, 1, 0], [], []>} : vector<8x8xf32>, vector<16x8xf32>, vector<8x16xf32> -> vector<8x16xf32>
    %cst_134 = arith.constant 0.353553385 : f32
    %421 = vector.broadcast %cst_134 : f32 to vector<8x16xf32>
    %422 = arith.mulf %420, %421 : vector<8x16xf32>
    %cst_135 = arith.constant dense<0xFF800000> : vector<8xf32>
    %423 = vector.multi_reduction <maximumf>, %422, %cst_135 [1] : vector<8x16xf32> to vector<8xf32>
    %424 = vector.shape_cast %423 : vector<8xf32> to vector<8x1xf32>
    %425 = vector.broadcast %424 : vector<8x1xf32> to vector<8x16xf32>
    %426 = arith.subf %422, %425 : vector<8x16xf32>
    %427 = math.exp %426 : vector<8x16xf32>
    %cst_136 = arith.constant dense<0.000000e+00> : vector<8xf32>
    %428 = vector.multi_reduction <add>, %427, %cst_136 [1] : vector<8x16xf32> to vector<8xf32>
    %429 = vector.shape_cast %428 : vector<8xf32> to vector<8x1xf32>
    %430 = tpu.reciprocal %429 {approx = true} : vector<8x1xf32> -> vector<8x1xf32>
    %431 = vector.broadcast %430 : vector<8x1xf32> to vector<8x16xf32>
    %432 = arith.mulf %427, %431 : vector<8x16xf32>
    %433 = vector.extract_strided_slice %400 {offsets = [0, 8], sizes = [16, 8], strides = [1, 1]} : vector<16x32xf32> to vector<16x8xf32>
    %cst_137 = arith.constant dense<0.000000e+00> : vector<8x8xf32>
    %434 = tpu.matmul %432, %433, %cst_137 {dimension_numbers = #tpu.dot_dimension_numbers<[1], [0], [0], [1], [0, 0, 1, 1], [], []>} : vector<8x16xf32>, vector<16x8xf32>, vector<8x8xf32> -> vector<8x8xf32>
    %435 = vector.extract_strided_slice %393 {offsets = [0, 16], sizes = [8, 8], strides = [1, 1]} : vector<8x32xf32> to vector<8x8xf32>
    %436 = vector.extract_strided_slice %399 {offsets = [0, 16], sizes = [16, 8], strides = [1, 1]} : vector<16x32xf32> to vector<16x8xf32>
    %cst_138 = arith.constant dense<0.000000e+00> : vector<8x16xf32>
    %437 = tpu.matmul %435, %436, %cst_138 {dimension_numbers = #tpu.dot_dimension_numbers<[1], [1], [0], [0], [0, 0, 1, 0], [], []>} : vector<8x8xf32>, vector<16x8xf32>, vector<8x16xf32> -> vector<8x16xf32>
    %cst_139 = arith.constant 0.353553385 : f32
    %438 = vector.broadcast %cst_139 : f32 to vector<8x16xf32>
    %439 = arith.mulf %437, %438 : vector<8x16xf32>
    %cst_140 = arith.constant dense<0xFF800000> : vector<8xf32>
    %440 = vector.multi_reduction <maximumf>, %439, %cst_140 [1] : vector<8x16xf32> to vector<8xf32>
    %441 = vector.shape_cast %440 : vector<8xf32> to vector<8x1xf32>
    %442 = vector.broadcast %441 : vector<8x1xf32> to vector<8x16xf32>
    %443 = arith.subf %439, %442 : vector<8x16xf32>
    %444 = math.exp %443 : vector<8x16xf32>
    %cst_141 = arith.constant dense<0.000000e+00> : vector<8xf32>
    %445 = vector.multi_reduction <add>, %444, %cst_141 [1] : vector<8x16xf32> to vector<8xf32>
    %446 = vector.shape_cast %445 : vector<8xf32> to vector<8x1xf32>
    %447 = tpu.reciprocal %446 {approx = true} : vector<8x1xf32> -> vector<8x1xf32>
    %448 = vector.broadcast %447 : vector<8x1xf32> to vector<8x16xf32>
    %449 = arith.mulf %444, %448 : vector<8x16xf32>
    %450 = vector.extract_strided_slice %400 {offsets = [0, 16], sizes = [16, 8], strides = [1, 1]} : vector<16x32xf32> to vector<16x8xf32>
    %cst_142 = arith.constant dense<0.000000e+00> : vector<8x8xf32>
    %451 = tpu.matmul %449, %450, %cst_142 {dimension_numbers = #tpu.dot_dimension_numbers<[1], [0], [0], [1], [0, 0, 1, 1], [], []>} : vector<8x16xf32>, vector<16x8xf32>, vector<8x8xf32> -> vector<8x8xf32>
    %452 = vector.extract_strided_slice %393 {offsets = [0, 24], sizes = [8, 8], strides = [1, 1]} : vector<8x32xf32> to vector<8x8xf32>
    %453 = vector.extract_strided_slice %399 {offsets = [0, 24], sizes = [16, 8], strides = [1, 1]} : vector<16x32xf32> to vector<16x8xf32>
    %cst_143 = arith.constant dense<0.000000e+00> : vector<8x16xf32>
    %454 = tpu.matmul %452, %453, %cst_143 {dimension_numbers = #tpu.dot_dimension_numbers<[1], [1], [0], [0], [0, 0, 1, 0], [], []>} : vector<8x8xf32>, vector<16x8xf32>, vector<8x16xf32> -> vector<8x16xf32>
    %cst_144 = arith.constant 0.353553385 : f32
    %455 = vector.broadcast %cst_144 : f32 to vector<8x16xf32>
    %456 = arith.mulf %454, %455 : vector<8x16xf32>
    %cst_145 = arith.constant dense<0xFF800000> : vector<8xf32>
    %457 = vector.multi_reduction <maximumf>, %456, %cst_145 [1] : vector<8x16xf32> to vector<8xf32>
    %458 = vector.shape_cast %457 : vector<8xf32> to vector<8x1xf32>
    %459 = vector.broadcast %458 : vector<8x1xf32> to vector<8x16xf32>
    %460 = arith.subf %456, %459 : vector<8x16xf32>
    %461 = math.exp %460 : vector<8x16xf32>
    %cst_146 = arith.constant dense<0.000000e+00> : vector<8xf32>
    %462 = vector.multi_reduction <add>, %461, %cst_146 [1] : vector<8x16xf32> to vector<8xf32>
    %463 = vector.shape_cast %462 : vector<8xf32> to vector<8x1xf32>
    %464 = tpu.reciprocal %463 {approx = true} : vector<8x1xf32> -> vector<8x1xf32>
    %465 = vector.broadcast %464 : vector<8x1xf32> to vector<8x16xf32>
    %466 = arith.mulf %461, %465 : vector<8x16xf32>
    %467 = vector.extract_strided_slice %400 {offsets = [0, 24], sizes = [16, 8], strides = [1, 1]} : vector<16x32xf32> to vector<16x8xf32>
    %cst_147 = arith.constant dense<0.000000e+00> : vector<8x8xf32>
    %468 = tpu.matmul %466, %467, %cst_147 {dimension_numbers = #tpu.dot_dimension_numbers<[1], [0], [0], [1], [0, 0, 1, 1], [], []>} : vector<8x16xf32>, vector<16x8xf32>, vector<8x8xf32> -> vector<8x8xf32>
    %469 = tpu.concatenate %417, %434, %451, %468 in 1 : vector<8x8xf32>, vector<8x8xf32>, vector<8x8xf32>, vector<8x8xf32> -> vector<8x32xf32>
    %470 = vector.extract_strided_slice %387 {offsets = [0, 96], sizes = [32, 32], strides = [1, 1]} : vector<32x128xf32> to vector<32x32xf32>
    %cst_148 = arith.constant dense<0.000000e+00> : vector<8x32xf32>
    %471 = tpu.matmul %469, %470, %cst_148 {dimension_numbers = #tpu.dot_dimension_numbers<[1], [0], [0], [1], [0, 0, 1, 1], [], []>} : vector<8x32xf32>, vector<32x32xf32>, vector<8x32xf32> -> vector<8x32xf32>
    %472 = vector.extract_strided_slice %388 {offsets = [0, 96], sizes = [1, 32], strides = [1, 1]} : vector<1x128xf32> to vector<1x32xf32>
    %473 = vector.broadcast %472 : vector<1x32xf32> to vector<8x32xf32>
    %474 = arith.addf %471, %473 : vector<8x32xf32>
    %475 = arith.addf %385, %474 : vector<8x32xf32>
    %476 = vector.extract_strided_slice %273 {offsets = [3, 0], sizes = [1, 32], strides = [1, 1]} : vector<7x32xf32> to vector<1x32xf32>
    %477 = vector.extract_strided_slice %273 {offsets = [4, 0], sizes = [1, 32], strides = [1, 1]} : vector<7x32xf32> to vector<1x32xf32>
    %cst_149 = arith.constant dense<0.000000e+00> : vector<8xf32>
    %478 = vector.multi_reduction <add>, %475, %cst_149 [1] : vector<8x32xf32> to vector<8xf32>
    %479 = vector.shape_cast %478 : vector<8xf32> to vector<8x1xf32>
    %cst_150 = arith.constant 3.200000e+01 : f32
    %480 = vector.broadcast %cst_150 : f32 to vector<8x1xf32>
    %481 = arith.divf %479, %480 : vector<8x1xf32>
    %482 = vector.broadcast %481 : vector<8x1xf32> to vector<8x32xf32>
    %483 = arith.subf %475, %482 : vector<8x32xf32>
    %484 = arith.mulf %483, %483 : vector<8x32xf32>
    %cst_151 = arith.constant dense<0.000000e+00> : vector<8xf32>
    %485 = vector.multi_reduction <add>, %484, %cst_151 [1] : vector<8x32xf32> to vector<8xf32>
    %486 = vector.shape_cast %485 : vector<8xf32> to vector<8x1xf32>
    %cst_152 = arith.constant 3.200000e+01 : f32
    %487 = vector.broadcast %cst_152 : f32 to vector<8x1xf32>
    %488 = arith.divf %486, %487 : vector<8x1xf32>
    %489 = vector.broadcast %481 : vector<8x1xf32> to vector<8x32xf32>
    %490 = arith.subf %475, %489 : vector<8x32xf32>
    %cst_153 = arith.constant 9.99999974E-6 : f32
    %491 = vector.broadcast %cst_153 : f32 to vector<8x1xf32>
    %492 = arith.addf %488, %491 : vector<8x1xf32>
    %493 = math.rsqrt %492 : vector<8x1xf32>
    %494 = vector.broadcast %493 : vector<8x1xf32> to vector<8x32xf32>
    %495 = arith.mulf %490, %494 : vector<8x32xf32>
    %496 = vector.broadcast %476 : vector<1x32xf32> to vector<8x32xf32>
    %497 = arith.mulf %495, %496 : vector<8x32xf32>
    %498 = vector.broadcast %477 : vector<1x32xf32> to vector<8x32xf32>
    %499 = arith.addf %497, %498 : vector<8x32xf32>
    %c1_154 = arith.constant 1 : index
    %c0_155 = arith.constant 0 : index
    %c0_156 = arith.constant 0 : index
    %500 = vector.load %arg6[%c1_154, %c0_155, %c0_156] : memref<2x32x64xf32, #tpu.memory_space<vmem>>, vector<1x32x64xf32>
    %501 = vector.shape_cast %500 : vector<1x32x64xf32> to vector<32x64xf32>
    %cst_157 = arith.constant dense<0.000000e+00> : vector<8x64xf32>
    %502 = tpu.matmul %499, %501, %cst_157 {dimension_numbers = #tpu.dot_dimension_numbers<[1], [0], [0], [1], [0, 0, 1, 1], [], []>} : vector<8x32xf32>, vector<32x64xf32>, vector<8x64xf32> -> vector<8x64xf32>
    %c1_158 = arith.constant 1 : index
    %c0_159 = arith.constant 0 : index
    %c0_160 = arith.constant 0 : index
    %503 = vector.load %arg7[%c1_158, %c0_159, %c0_160] : memref<2x1x64xf32, #tpu.memory_space<vmem>>, vector<1x1x64xf32>
    %504 = vector.shape_cast %503 : vector<1x1x64xf32> to vector<1x64xf32>
    %505 = vector.broadcast %504 : vector<1x64xf32> to vector<8x64xf32>
    %506 = arith.addf %502, %505 : vector<8x64xf32>
    %cst_161 = arith.constant 0.000000e+00 : f32
    %507 = vector.broadcast %cst_161 : f32 to vector<8x64xf32>
    %508 = arith.maximumf %506, %507 : vector<8x64xf32>
    %c1_162 = arith.constant 1 : index
    %c0_163 = arith.constant 0 : index
    %c0_164 = arith.constant 0 : index
    %509 = vector.load %arg8[%c1_162, %c0_163, %c0_164] : memref<2x64x32xf32, #tpu.memory_space<vmem>>, vector<1x64x32xf32>
    %510 = vector.shape_cast %509 : vector<1x64x32xf32> to vector<64x32xf32>
    %cst_165 = arith.constant dense<0.000000e+00> : vector<8x32xf32>
    %511 = tpu.matmul %508, %510, %cst_165 {dimension_numbers = #tpu.dot_dimension_numbers<[1], [0], [0], [1], [0, 0, 1, 1], [], []>} : vector<8x64xf32>, vector<64x32xf32>, vector<8x32xf32> -> vector<8x32xf32>
    %512 = vector.extract_strided_slice %273 {offsets = [0, 0], sizes = [1, 32], strides = [1, 1]} : vector<7x32xf32> to vector<1x32xf32>
    %513 = vector.broadcast %512 : vector<1x32xf32> to vector<8x32xf32>
    %514 = arith.addf %511, %513 : vector<8x32xf32>
    %515 = arith.addf %499, %514 : vector<8x32xf32>
    %516 = vector.extract_strided_slice %273 {offsets = [5, 0], sizes = [1, 32], strides = [1, 1]} : vector<7x32xf32> to vector<1x32xf32>
    %517 = vector.extract_strided_slice %273 {offsets = [6, 0], sizes = [1, 32], strides = [1, 1]} : vector<7x32xf32> to vector<1x32xf32>
    %cst_166 = arith.constant dense<0.000000e+00> : vector<8xf32>
    %518 = vector.multi_reduction <add>, %515, %cst_166 [1] : vector<8x32xf32> to vector<8xf32>
    %519 = vector.shape_cast %518 : vector<8xf32> to vector<8x1xf32>
    %cst_167 = arith.constant 3.200000e+01 : f32
    %520 = vector.broadcast %cst_167 : f32 to vector<8x1xf32>
    %521 = arith.divf %519, %520 : vector<8x1xf32>
    %522 = vector.broadcast %521 : vector<8x1xf32> to vector<8x32xf32>
    %523 = arith.subf %515, %522 : vector<8x32xf32>
    %524 = arith.mulf %523, %523 : vector<8x32xf32>
    %cst_168 = arith.constant dense<0.000000e+00> : vector<8xf32>
    %525 = vector.multi_reduction <add>, %524, %cst_168 [1] : vector<8x32xf32> to vector<8xf32>
    %526 = vector.shape_cast %525 : vector<8xf32> to vector<8x1xf32>
    %cst_169 = arith.constant 3.200000e+01 : f32
    %527 = vector.broadcast %cst_169 : f32 to vector<8x1xf32>
    %528 = arith.divf %526, %527 : vector<8x1xf32>
    %529 = vector.broadcast %521 : vector<8x1xf32> to vector<8x32xf32>
    %530 = arith.subf %515, %529 : vector<8x32xf32>
    %cst_170 = arith.constant 9.99999974E-6 : f32
    %531 = vector.broadcast %cst_170 : f32 to vector<8x1xf32>
    %532 = arith.addf %528, %531 : vector<8x1xf32>
    %533 = math.rsqrt %532 : vector<8x1xf32>
    %534 = vector.broadcast %533 : vector<8x1xf32> to vector<8x32xf32>
    %535 = arith.mulf %530, %534 : vector<8x32xf32>
    %536 = vector.broadcast %516 : vector<1x32xf32> to vector<8x32xf32>
    %537 = arith.mulf %535, %536 : vector<8x32xf32>
    %538 = vector.broadcast %517 : vector<1x32xf32> to vector<8x32xf32>
    %539 = arith.addf %537, %538 : vector<8x32xf32>
    %c0_171 = arith.constant 0 : index
    %c0_172 = arith.constant 0 : index
    %540 = vector.load %arg10[%c0_171, %c0_172] : memref<2x32xf32, #tpu.memory_space<vmem>>, vector<2x32xf32>
    %541 = vector.extract_strided_slice %540 {offsets = [0, 0], sizes = [1, 32], strides = [1, 1]} : vector<2x32xf32> to vector<1x32xf32>
    %542 = vector.extract_strided_slice %540 {offsets = [1, 0], sizes = [1, 32], strides = [1, 1]} : vector<2x32xf32> to vector<1x32xf32>
    %cst_173 = arith.constant dense<0.000000e+00> : vector<8xf32>
    %543 = vector.multi_reduction <add>, %539, %cst_173 [1] : vector<8x32xf32> to vector<8xf32>
    %544 = vector.shape_cast %543 : vector<8xf32> to vector<8x1xf32>
    %cst_174 = arith.constant 3.200000e+01 : f32
    %545 = vector.broadcast %cst_174 : f32 to vector<8x1xf32>
    %546 = arith.divf %544, %545 : vector<8x1xf32>
    %547 = vector.broadcast %546 : vector<8x1xf32> to vector<8x32xf32>
    %548 = arith.subf %539, %547 : vector<8x32xf32>
    %549 = arith.mulf %548, %548 : vector<8x32xf32>
    %cst_175 = arith.constant dense<0.000000e+00> : vector<8xf32>
    %550 = vector.multi_reduction <add>, %549, %cst_175 [1] : vector<8x32xf32> to vector<8xf32>
    %551 = vector.shape_cast %550 : vector<8xf32> to vector<8x1xf32>
    %cst_176 = arith.constant 3.200000e+01 : f32
    %552 = vector.broadcast %cst_176 : f32 to vector<8x1xf32>
    %553 = arith.divf %551, %552 : vector<8x1xf32>
    %554 = vector.broadcast %546 : vector<8x1xf32> to vector<8x32xf32>
    %555 = arith.subf %539, %554 : vector<8x32xf32>
    %cst_177 = arith.constant 9.99999974E-6 : f32
    %556 = vector.broadcast %cst_177 : f32 to vector<8x1xf32>
    %557 = arith.addf %553, %556 : vector<8x1xf32>
    %558 = math.rsqrt %557 : vector<8x1xf32>
    %559 = vector.broadcast %558 : vector<8x1xf32> to vector<8x32xf32>
    %560 = arith.mulf %555, %559 : vector<8x32xf32>
    %561 = vector.broadcast %541 : vector<1x32xf32> to vector<8x32xf32>
    %562 = arith.mulf %560, %561 : vector<8x32xf32>
    %563 = vector.broadcast %542 : vector<1x32xf32> to vector<8x32xf32>
    %564 = arith.addf %562, %563 : vector<8x32xf32>
    %c0_178 = arith.constant 0 : index
    %c0_179 = arith.constant 0 : index
    %c0_180 = arith.constant 0 : index
    %565 = vector.load %arg11[%c0_178, %c0_179, %c0_180] : memref<1x8x32xf32, #tpu.memory_space<vmem>>, vector<1x8x32xf32>
    %566 = vector.shape_cast %565 : vector<1x8x32xf32> to vector<8x32xf32>
    %567 = vector.shape_cast %564 : vector<8x32xf32> to vector<1x8x32xf32>
    tpu.vector_store %arg11[%c0_178, %c0_179, %c0_180], %567 {strides = array<i32>} : memref<1x8x32xf32, #tpu.memory_space<vmem>>, vector<1x8x32xf32>,
    return
  }
  func.func @transform_0(%arg0: i32) -> (i32, i32, i32) {
    %c0_i32 = arith.constant 0 : i32
    %c0_i32_0 = arith.constant 0 : i32
    %c0_i32_1 = arith.constant 0 : i32
    return %arg0, %c0_i32, %c0_i32_0 : i32, i32, i32
  }
  func.func @transform_1(%arg0: i32) -> (i32, i32, i32) {
    %c0_i32 = arith.constant 0 : i32
    %c0_i32_0 = arith.constant 0 : i32
    %c0_i32_1 = arith.constant 0 : i32
    return %arg0, %c0_i32, %c0_i32_0 : i32, i32, i32
  }
  func.func @transform_2(%arg0: i32) -> (i32, i32, i32) {
    %c0_i32 = arith.constant 0 : i32
    %c0_i32_0 = arith.constant 0 : i32
    %c0_i32_1 = arith.constant 0 : i32
    %c0_i32_2 = arith.constant 0 : i32
    return %c0_i32, %c0_i32_0, %c0_i32_1 : i32, i32, i32
  }
  func.func @transform_3(%arg0: i32) -> (i32, i32, i32) {
    %c0_i32 = arith.constant 0 : i32
    %c0_i32_0 = arith.constant 0 : i32
    %c0_i32_1 = arith.constant 0 : i32
    %c0_i32_2 = arith.constant 0 : i32
    return %c0_i32, %c0_i32_0, %c0_i32_1 : i32, i32, i32
  }
  func.func @transform_4(%arg0: i32) -> (i32, i32, i32) {
    %c0_i32 = arith.constant 0 : i32
    %c0_i32_0 = arith.constant 0 : i32
    %c0_i32_1 = arith.constant 0 : i32
    %c0_i32_2 = arith.constant 0 : i32
    return %c0_i32, %c0_i32_0, %c0_i32_1 : i32, i32, i32
  }
  func.func @transform_5(%arg0: i32) -> (i32, i32, i32) {
    %c0_i32 = arith.constant 0 : i32
    %c0_i32_0 = arith.constant 0 : i32
    %c0_i32_1 = arith.constant 0 : i32
    %c0_i32_2 = arith.constant 0 : i32
    return %c0_i32, %c0_i32_0, %c0_i32_1 : i32, i32, i32
  }
  func.func @transform_6(%arg0: i32) -> (i32, i32, i32) {
    %c0_i32 = arith.constant 0 : i32
    %c0_i32_0 = arith.constant 0 : i32
    %c0_i32_1 = arith.constant 0 : i32
    %c0_i32_2 = arith.constant 0 : i32
    return %c0_i32, %c0_i32_0, %c0_i32_1 : i32, i32, i32
  }
  func.func @transform_7(%arg0: i32) -> (i32, i32, i32) {
    %c0_i32 = arith.constant 0 : i32
    %c0_i32_0 = arith.constant 0 : i32
    %c0_i32_1 = arith.constant 0 : i32
    %c0_i32_2 = arith.constant 0 : i32
    return %c0_i32, %c0_i32_0, %c0_i32_1 : i32, i32, i32
  }
  func.func @transform_8(%arg0: i32) -> (i32, i32, i32) {
    %c0_i32 = arith.constant 0 : i32
    %c0_i32_0 = arith.constant 0 : i32
    %c0_i32_1 = arith.constant 0 : i32
    %c0_i32_2 = arith.constant 0 : i32
    return %c0_i32, %c0_i32_0, %c0_i32_1 : i32, i32, i32
  }
  func.func @transform_9(%arg0: i32) -> (i32, i32) {
    %c0_i32 = arith.constant 0 : i32
    %c0_i32_0 = arith.constant 0 : i32
    %c0_i32_1 = arith.constant 0 : i32
    return %c0_i32, %c0_i32_0 : i32, i32
  }
  func.func @transform_10(%arg0: i32) -> (i32, i32, i32) {
    %c0_i32 = arith.constant 0 : i32
    %c0_i32_0 = arith.constant 0 : i32
    %c0_i32_1 = arith.constant 0 : i32
    return %arg0, %c0_i32, %c0_i32_0 : i32, i32, i32
  }
}

</mosaic_0001>

<bundles_post_ra>
// kernel: decoder_forward.1
= control target key start
LH: loop header
LB: loop body
LE: loop exit
PB: predicated region body
PF: predicated region fallthrough
CT: control target
= control target key end

     0   :  { %s3579_s0 = inlined_call_operand.vmem [shape: f32[2,8,32], index: 0, kind: input, shape index: {}]   ;;  %s3580_s1 = inlined_call_operand.hbm [shape: f32[2,16,32], index: 1, kind: input, shape index: {}]   ;;  %s3581_s2 = inlined_call_operand.vmem [shape: f32[2,32,128], index: 2, kind: input, shape index: {}]   ;;  %s3582_s3 = inlined_call_operand.vmem [shape: f32[2,32,128], index: 3, kind: input, shape index: {}]   ;;  %s3583_s4 = inlined_call_operand.vmem [shape: f32[2,2,128], index: 4, kind: input, shape index: {}]   ;;  %s3584_s5 = inlined_call_operand.vmem [shape: f32[2,32,64], index: 5, kind: input, shape index: {}]   ;;  %s3585_s6 = inlined_call_operand.vmem [shape: f32[2,1,64], index: 6, kind: input, shape index: {}]   ;;  %s3586_s7 = inlined_call_operand.vmem [shape: f32[2,64,32], index: 7, kind: input, shape index: {}]   ;;  %s3587_s8 = inlined_call_operand.vmem [shape: f32[2,7,32], index: 8, kind: input, shape index: {}]   ;;  %s3588_s9 = inlined_call_operand.vmem [shape: f32[2,32], index: 9, kind: input, shape index: {}]   ;;  %s3589_s10 = inlined_call_operand.hbm [shape: f32[2,8,32], index: 10, kind: output, shape index: {}]  }
   0x1   :  { %3621 = sst [smem:[#allocation13_spill]] %s3579_s0 }
   0x2   :  { %3622 = sst [smem:[#allocation14_spill]] %s3580_s1 }
   0x3   :  { %3623 = sst [smem:[#allocation15_spill]] %s3581_s2 }
   0x4   :  { %3624 = sst [smem:[#allocation16_spill]] %s3583_s4 }
   0x5   :  { %15 = vsyncpa [#allocation3], 0 }
   0x6   :  { %17 = vsyncpa [#allocation3 + $0x1], 0 }
   0x7   :  { %18 = vsyncpa [#allocation4], 0 }
   0x8   :  { %20 = vsyncpa [#allocation4 + $0x1], 0  ;;  %s2896_s13 = smov 0   ;;  %s2898_s14 = smov 0  }
   0x9   :  { %s2900_s15 = smov 0   ;;  %s2902_s16 = smov 0  }
   0xa LB: > { %3625 = sst [smem:[#allocation8_spill]] %s2813_s14  ;;  %s2917_s17 = sadd.s32 4294967295, %s2821_s16   ;;  %s2821_s16 = sphi %s2902_s16, %s3656_s16   ;;  %s2817_s15 = sphi %s2900_s15, %s3659_s15   ;;  %s2813_s14 = sphi %s2898_s14, %s3658_s14   ;;  %s2809_s13 = sphi %s2896_s13, %s3657_s13  }
   0xb   : > { %3626 = sst [smem:[#allocation9_spill]] %s2817_s15  ;;  %s2369_s18 = sadd.s32 4294967294, %s2821_s16  }
   0xc   : > { %s2921_s19 = sadd.s32 1, %s2821_s16   ;;  %s59_s20 = sadd.s32 1, %s2817_s15 }
   0xd   : > { %3627 = sst [smem:[#allocation10_spill]] %s2921_s19  ;;  %s56_s21 = ssub.s32 %s2821_s16, %s2921_s19 }
   0xe   : > { %p66_p0 = scmp.ne.s32.totalorder %s2817_s15, %s2813_s14  ;;  %p57_p1 = scmp.eq.s32.totalorder %s56_s21, 0 }
   0xf   : > { %p67_p2 = scmp.eq.s32.totalorder %s2821_s16, 0  ;;  %p72_p3 = scmp.ne.s32.totalorder %s2813_s14, %s2809_s13 }
  0x10   : > { %p73_p4 = scmp.eq.s32.totalorder %s2917_s17, 0  ;;  %p264_p7 = scmp.eq.s32.totalorder %s2917_s17, 1 }
  0x11   : > { %s2933_s22 = scalar_select %p57_p1, %s2817_s15, %s59_s20  }
  0x12   : > { %p2935_p5 = por %p67_p2, %p66_p0  ;;  %p2939_p6 = por %p73_p4, %p72_p3 }
  0x13   : > { %3628 = sst [smem:[#allocation11_spill]] %s2933_s22  ;;  %p270_p8 = scmp.eq.s32.totalorder %s2369_s18, 1 }
  0x14   : > { %p2491_p10 = scmp.lt.s32.totalorder %s2821_s16, 2  ;;  %p2946_p11 = por %p264_p7, %p66_p0 }
  0x15   : > { %p2950_p12 = por %p270_p8, %p72_p3  ;;  %s321_s27 = sand.u32 1, %s2817_s15  }
  0x16   : > { %s2478_s28 = sshll.u32 %s2821_s16, 4  ;;  %s2372_s29 = sshll.u32 %s321_s27, 4 }
  0x17   : > { %s3632_s26 = scalar_select %p2950_p12, 1, 0 }
  0x18   : > { %s3634_s1 = sld [smem:[#allocation14_spill]]  ;;  %s325_s18 = scalar_lea.vmem [#allocation2], %s2372_s29 }
  0x19   : > { %3633 = sst [smem:[#allocation12_spill]] %s3632_s26  ;;  %s333_s21 = sshll.u32 %s325_s18, 4  ;;  %s334_s21 = int_to_ptr.vmem [resolvable:$true] %s333_s21 }
  0x1a   : > { %p2961_p13 = pnand %p2491_p10, %p2935_p5  ;;  %p2375_p0 = scmp.ge.s32.totalorder %s2821_s16, 1 }
  0x1b   : > { %p341_p1 = scmp.lt.s32.totalorder %s2821_s16, 3  ;;  %s322_s15 = scalar_lea.sflag [#allocation3], %s321_s27 }
  0x1c   : > { %p2729_p3 = pneg %p2961_p13 }
  0x1e   : > { %s330_s12 = scalar_lea.hbm %s3634_s1, %s2478_s28  ;;  %s2732_s23 = scalar_lea.hbm %s3634_s1, 32 }
  0x1f   : > { %s331_s20 = sshll.u32 %s330_s12, 4  ;;  %s332_s20 = int_to_ptr.hbm [resolvable:$true] %s331_s20 }
  0x20   : > { %s2725_s19 = sshra.s32 %s332_s20, 4  ;;  %s2726_s19 = int_to_ptr.hbm [resolvable:$true] %s2725_s19 }
  0x21   : > { %s2727_s26 = scalar_lea.hbm %s2726_s19, 16  ;;  %p2733_p5 = scmp.lt.s32.totalorder %s2726_s19, %s3634_s1 }
  0x22   : > { %p2728_p2 = scmp.ne.s32.totalorder %s2726_s19, %s2727_s26  ;;  %p2734_p8 = scmp.lt.s32.totalorder %s2732_s23, %s2727_s26 }
  0x24   : > { %p2730_p4 = pnand %p2729_p3, %p2728_p2  ;;  %p2735_p10 = por %p2734_p8, %p2733_p5 }
  0x26   : > { %p2731_p7 = pneg %p2730_p4 }
  0x28   : > { %p2736_p9 = pnand %p2735_p10, %p2731_p7 }
  0x2a   : > { %2739 = shalt.err (!%p2736_p9)
}
  0x2b   : > { %s2823_s27 = smov 128   ;;  %s2824_s12 = smov 8  }
  0x2c   : > { %2486 = dma.hbm_to_vmem [thread:$0]  (!%p2961_p13), %s332_s20, 256, %s334_s21, %s322_s15, %s2823_s27, %s2823_s27, %s2824_s12  }
  0x2d   : > { %p342_p2 = pnand %p2375_p0, %p341_p1 }
  0x2e   : > { %s2982_s18 = sand.u32 (!%p342_p2), 1, %s2813_s14  }
  0x2f   : > { %345 = sbr.rel (%p342_p2) target bundleno = 7907 (0x1ee3), region = 60  ;;  %s2376_s19 = sshll.u32 (!%p342_p2), %s2982_s18, 4 }
  0x30   : > { %s348_s26 = scalar_lea.sflag (!%p342_p2), [#allocation3], %s2982_s18  ;;  %s2986_s28 = scalar_lea.vmem (!%p342_p2), [#allocation2], %s2376_s19 }
  0x34   : > { %2800 = dma.done.wait (%p2939_p6), %s348_s26, 256  }
  0x35   : > { %2802 = vsyncadd (%p2939_p6), %s348_s26, 4294967040  ;;  %p393_p9 = scmp.lt.s32.totalorder %s2917_s17, 1  ;;  %s3636_s2 = sld [smem:[#allocation15_spill]]  ;;  %vm407_vm0 = vcmask 261120   ;;  %vm434_vm1 = vcmask 64512   ;;  %vm708_vm2 = vcmask 130048  }
  0x36   : > { %s3637_s0 = sld [smem:[#allocation13_spill]]  ;;  %s3597_s21 = smov 64   ;;  %vm710_vm3 = vcmask 195584   ;;  %vm1276_vm11 = vcmask 523264  }
  0x37   : > { %s394_s15 = scalar_select %p393_p9, %s2917_s17, 1 }
  0x38   : > { %s3638_s4 = sld [smem:[#allocation16_spill]]  ;;  %s3618_s29 = smov 96  }
  0x39   : > { %s2378_s22 = sshll.u32 %s394_s15, 3  ;;  %s3616_s23 = smov 120  }
  0x3a   : > { %s3606_s24 = smov 80   ;;  %s3608_s30 = smov 72  }
  0x3b   : > { %v2997_v0 = vld [vmem:[%s3636_s2 + $0x18] sm:$0xff]  ;;  %v3002_v1 = vld [vmem:[%s3636_s2 + $0x10] sm:$0xff]  ;;  %v3010_v3 = vld [vmem:[%s3636_s2 + $0x8] sm:$0xff]  ;;  %s3610_s11 = smov 112   ;;  %s3614_s27 = smov 104  }
  0x3c   : > { %423 = vmatpush.msra.mxu0 %v2997_v0  ;;  %v2543_v2 = vpack.i.bf16 %v3002_v1, %v2997_v0  ;;  %v3015_v4 = vld [vmem:[%s3636_s2] sm:$0xff]  ;;  %s396_s26 = scalar_lea.vmem %s3637_s0, %s2378_s22  ;;  %s3612_s22 = smov 88  }
  0x3d   : > { %v2548_v5 = vpack.i.bf16 %v3015_v4, %v3010_v3  ;;  %v3024_v6 = vld [vmem:[%s396_s26] sm:$0xff]  ;;  %s3595_s12 = smov 40   ;;  %s3596_s19 = smov 56  }
  0x3e   : > { %424 = vmatpush.msra.mxu0 %v3002_v1  ;;  %v3032_v7 = vld [vmem:[%s3638_s4] sm:$0x3]  ;;  %s3594_s26 = smov 48   ;;  %s3604_s15 = smov 32  }
  0x3f   : > { %v406_v8 = vperm.slane %v3032_v7, 0  ;;  %s3602_s20 = smov 8   ;;  %s3645_s0 = smov 64  }
  0x40   : > { %425 = vmatpush.msra.mxu0 %v3010_v3  ;;  %s3646_s1 = smov 96  }
  0x42   : > { %426 = vmatpush.msra.mxu0 %v3015_v4 }
  0x43   : > { %2379 = vmatmul.msk.f32.vlgmr.msra.gmra.mxu0 %vm407_vm0, %v3024_v6 }
  0xc0   : > { %v428_v9 = vpop.f32.mrf.mxu0 }
  0xc1   : > { %v3037_v10 = vadd.f32 %v428_v9, %v406_v8 }
  0xc3   : > { %499 = vrot.lane.b32.xlu2 %v3037_v10, %s3612_s22  ;;  %471 = vrot.lane.b32.xlu1 %v3037_v10, %s3597_s21  ;;  %s3652_s21 = smov 40  }
  0xc4   : > { %432 = vrot.lane.b32.xlu0 %v3037_v10, %s3618_s29 }
  0xcb   : > { %497 = vrot.lane.b32.xlu2 %v3037_v10, %s3616_s23 }
  0xd3   : > { %565 = vrot.lane.b32.xlu2 %v3037_v10, %s3606_s24  ;;  %s3639_s24 = smov 72  }
  0xdb   : > { %631 = vrot.lane.b32.xlu2 %v3037_v10, %s3608_s30  ;;  %s3640_s30 = smov 80  }
  0xe3   : > { %563 = vrot.lane.b32.xlu2 %v3037_v10, %s3610_s11 }
 0x11d   : > { %v500_v11 = vpop.permute.xlu2 %499 }
 0x125   : > { %v498_v12 = vpop.permute.xlu2 %497 }
 0x12d   : > { %v566_v13 = vpop.permute.xlu2 %565 }
 0x135   : > { %v632_v14 = vpop.permute.xlu2 %631  ;;  %v472_v15 = vpop.permute.xlu1 %471 }
 0x136   : > { %v433_v16 = vpop.permute.xlu0 %432  ;;  %492 = vmatpush.msra.mxu3 %v472_v15  ;;  %2389 = vmatpush.xpose.msk.msrb.mxu0 %vm434_vm1, %v632_v14 }
 0x137   : > { %2380 = vmatpush.xpose.msk.msra.mxu1 %vm434_vm1, %v433_v16 }
 0x138   : > { %2383 = vmatpush.xpose.msk.msrb.mxu3 %vm434_vm1, %v500_v11 }
 0x13a   : > { %2381 = vmatmul.msk.f32.vlgmr.msra.gmra.mxu1 %vm434_vm1, %v3037_v10 }
 0x13b   : > { %2386 = vmatpush.xpose.msk.msrb.mxu1 %vm434_vm1, %v566_v13 }
 0x13d   : > { %v564_v17 = vpop.permute.xlu2 %563 }
 0x142   : > { %2387 = vmatmul.msk.f32.vlgmr.msrb.gmra.mxu1 %vm434_vm1, %v564_v17 }
 0x1b7   : > { %v456_v18 = vpop.f32.mrf.mxu1 }
 0x1b8   : > { %v459_v19 = vmul.f32 0.35355338, %v456_v18 }
 0x1ba   : > { %v460_v20 = vsel %vm434_vm1, %v459_v19, -inf }
 0x1bb   : > { %461 = vmax.xlane.f32.xlu0 %v460_v20  ;;  %v791_v20 = vld [vmem:[%s3582_s3 + $0x10] sm:$0xff] }
 0x1bf   : > { %v588_v26 = vpop.f32.mrf.mxu1 }
 0x1c0   : > { %v591_v27 = vmul.f32 0.35355338, %v588_v26 }
 0x1c2   : > { %v592_v28 = vsel %vm434_vm1, %v591_v27, -inf }
 0x22e   : > { %v462_v21 = vpop.xlane.xlu0 %461 }
 0x22f   : > { %v463_v22 = vsub.f32 %v459_v19, %v462_v21  ;;  %v792_v21 = vld [vmem:[%s3582_s3 + $0x18] sm:$0xff] }
 0x231   : > { %v464_v23 = vmul.f32 1.442695, %v463_v22  ;;  %v3109_v22 = vpack.i.bf16 %v791_v20, %v792_v21 }
 0x233   : > { %2645 = vpow2.f32 %v464_v23  ;;  %v789_v23 = vld [vmem:[%s3582_s3] sm:$0xff] }
 0x239   : > { %v2646_v24 = vpop.eup %2645 }
 0x23a   : > { %v466_v25 = vsel %vm434_vm1, %v2646_v24, 0.0 }
 0x23b   : > { %467 = vadd.xlane.f32.xlu1 %v466_v25 }
 0x254   : > { %629 = vrot.lane.b32.xlu1 %v3037_v10, %s3614_s27 }
 0x27e   : > { %593 = vmax.xlane.f32.xlu1 %v592_v28 }
 0x297   : > { %669 = vrot.lane.b32.xlu1 %v3037_v10, %s3595_s12  ;;  %s3600_s12 = smov 16  }
 0x29f   : > { %2549 = vrot.lane.b32.xlu1 %v2548_v5, %s3604_s15 }
 0x2a7   : > { %729 = vrot.lane.b32.xlu1 %v406_v8, %s3604_s15 }
 0x2ae   : > { %v468_v29 = vpop.xlane.xlu1 %467 }
 0x2af   : > { %2647 = vrcp.f32 %v468_v29  ;;  %2554 = vrot.lane.b32.xlu1 %v3109_v22, %s3618_s29 }
 0x2b5   : > { %v2648_v30 = vpop.eup %2647 }
 0x2b6   : > { %v470_v31 = vmul.f32 %v2648_v30, %v2646_v24  ;;  %v790_v24 = vld [vmem:[%s3582_s3 + $0x8] sm:$0xff] }
 0x2b7   : > { %v3119_v25 = vpack.i.bf16 %v789_v23, %v790_v24 }
 0x2b8   : > { %2382 = vmatmul.msk.f32.vlgmr.msra.gmra.mxu3 %vm434_vm1, %v470_v31  ;;  %v2840_v31 = vmov 32.0  }
 0x2b9   : > { %2559 = vrot.lane.b32.xlu1 %v3119_v25, %s3618_s29 }
 0x2c0   : > { %2384 = vmatmul.msk.f32.vlgmr.msrb.gmra.mxu3 %vm434_vm1, %v498_v12 }
 0x2c6   : > { %v630_v32 = vpop.permute.xlu1 %629 }
 0x2c7   : > { %2390 = vmatmul.msk.f32.vlgmr.msrb.gmra.mxu0 %vm434_vm1, %v630_v32 }
 0x2f1   : > { %v594_v33 = vpop.xlane.xlu1 %593 }
 0x2f2   : > { %v595_v35 = vsub.f32 %v591_v27, %v594_v33 }
 0x2f4   : > { %v596_v36 = vmul.f32 1.442695, %v595_v35 }
 0x2f6   : > { %2649 = vpow2.f32 %v596_v36 }
 0x2fc   : > { %v2650_v43 = vpop.eup %2649 }
 0x2fd   : > { %v598_v44 = vsel %vm434_vm1, %v2650_v43, 0.0 }
 0x309   : > { %v670_v52 = vpop.permute.xlu1 %669 }
 0x311   : > { %v2550_v4 = vpop.permute.xlu1 %2549 }
 0x312   : > { %v2551_v13 = vunpack.i.l.bf16 %v2550_v4  ;;  %v2552_v8 = vunpack.i.h.bf16 %v2550_v4 }
 0x319   : > { %v730_v26 = vpop.permute.xlu1 %729 }
 0x321   : > { %v2555_v32 = vpop.permute.xlu1 %2554 }
 0x322   : > { %v2557_v33 = vunpack.i.h.bf16 %v2555_v32 }
 0x33b   : > { %v3070_v34 = vpop.f32.mrf.mxu3 }
 0x343   : > { %v522_v37 = vpop.f32.mrf.mxu3 }
 0x344   : > { %v525_v38 = vmul.f32 0.35355338, %v522_v37  ;;  %v654_v39 = vpop.f32.mrf.mxu0  ;;  %v2560_v37 = vpop.permute.xlu1 %2559 }
 0x345   : > { %v657_v40 = vmul.f32 0.35355338, %v654_v39  ;;  %v2561_v39 = vunpack.i.l.bf16 %v2560_v37 }
 0x346   : > { %v526_v41 = vsel %vm434_vm1, %v525_v38, -inf }
 0x347   : > { %527 = vmax.xlane.f32.xlu2 %v526_v41  ;;  %v658_v42 = vsel %vm434_vm1, %v657_v40, -inf }
 0x348   : > { %659 = vmax.xlane.f32.xlu0 %v658_v42 }
 0x350   : > { %599 = vadd.xlane.f32.xlu0 %v598_v44 }
 0x35f   : > { %537 = vrot.lane.b32.xlu2 %v3037_v10, %s3596_s19  ;;  %s3642_s19 = smov 8  }
 0x3ba   : > { %v528_v45 = vpop.xlane.xlu2 %527 }
 0x3bb   : > { %v660_v46 = vpop.xlane.xlu0 %659  ;;  %v529_v48 = vsub.f32 %v525_v38, %v528_v45  ;;  %v2562_v38 = vunpack.i.h.bf16 %v2560_v37 }
 0x3bc   : > { %v661_v47 = vsub.f32 %v657_v40, %v660_v46 }
 0x3bd   : > { %v530_v50 = vmul.f32 1.442695, %v529_v48 }
 0x3be   : > { %v662_v49 = vmul.f32 1.442695, %v661_v47 }
 0x3c0   : > { %2651 = vpow2.f32 %v662_v49 }
 0x3c1   : > { %2653 = vpow2.f32 %v530_v50  ;;  %v3140_v50 = vperm.slane %v3032_v7, 1 }
 0x3c2   : > { %v538_v51 = vpop.permute.xlu2 %537 }
 0x3c3   : > { %558 = vmatpush.msra.mxu2 %v538_v51  ;;  %v600_v57 = vpop.xlane.xlu0 %599  ;;  %834 = vrot.lane.b32.xlu1 %v3140_v50, %s3618_s29 }
 0x3c5   : > { %690 = vmatpush.msrb.mxu2 %v670_v52 }
 0x3c6   : > { %v2652_v53 = vpop.eup %2651 }
 0x3c7   : > { %v664_v54 = vsel %vm434_vm1, %v2652_v53, 0.0  ;;  %v2654_v55 = vpop.eup %2653 }
 0x3c8   : > { %665 = vadd.xlane.f32.xlu0 %v664_v54  ;;  %v532_v56 = vsel %vm434_vm1, %v2654_v55, 0.0 }
 0x3d0   : > { %533 = vadd.xlane.f32.xlu0 %v532_v56 }
 0x3e4   : > { %603 = vrot.lane.b32.xlu0 %v3037_v10, %s3594_s26  ;;  %s3598_s26 = smov 24  }
 0x3ec   : > { %2544 = vrot.lane.b32.xlu0 %v2543_v2, %s3604_s15  ;;  %s3644_s15 = smov 24  }
 0x43b   : > { %v666_v58 = vpop.xlane.xlu0 %665 }
 0x443   : > { %v534_v59 = vpop.xlane.xlu0 %533 }
 0x444   : > { %2655 = vrcp.f32 %v534_v59 }
 0x445   : > { %2657 = vrcp.f32 %v666_v58  ;;  %v3148_v58 = vld [vmem:[%s3587_s8] sm:$0x7f] }
 0x446   : > { %2659 = vrcp.f32 %v600_v57 }
 0x447   : > { %2661 = vrcp.f32 %v2840_v31 }
 0x44a   : > { %v2656_v60 = vpop.eup %2655 }
 0x44b   : > { %v536_v61 = vmul.f32 %v2656_v60, %v2654_v55  ;;  %v2658_v62 = vpop.eup %2657  ;;  %v785_v60 = vperm.slane %v3148_v58, 1 }
 0x44c   : > { %v2660_v63 = vpop.eup %2659  ;;  %v668_v9 = vmul.f32 %v2658_v62, %v2652_v53 }
 0x44d   : > { %2385 = vmatmul.msk.f32.vlgmr.msra.gmra.mxu2 %vm434_vm1, %v536_v61  ;;  %v602_v10 = vmul.f32 %v2660_v63, %v2650_v43  ;;  %v2662_v35 = vpop.eup %2661  ;;  %v3131_v43 = vld [vmem:[%s2986_s28 + $0x8] sm:$0xff]  ;;  %v787_v63 = vperm.slane %v3148_v58, 2 }
 0x44e   : > { %v760_v36 = vmul.f32 32.0, %v2662_v35  ;;  %vm764_vm4 = vweird.f32 %v2662_v35 }
 0x450   : > { %v761_v40 = vsub.f32 1.0, %v760_v36 }
 0x452   : > { %v762_v41 = vmul.f32 %v2662_v35, %v761_v40 }
 0x454   : > { %v763_v42 = vadd.f32 %v2662_v35, %v762_v41 }
 0x455   : > { %2391 = vmatmul.msk.f32.vlgmr.msrb.gmra.mxu2 %vm434_vm1, %v668_v9 }
 0x456   : > { %v604_v11 = vpop.permute.xlu0 %603  ;;  %v3133_v44 = vsel %vm764_vm4, %v2662_v35, %v763_v42 }
 0x457   : > { %624 = vmatpush.msra.mxu3 %v604_v11 }
 0x458   : > { %2388 = vmatmul.msk.f32.vlgmr.msra.gmra.mxu3 %vm434_vm1, %v602_v10 }
 0x459   : > { %809 = vmatpush.msrb.mxu3 %v792_v21 }
 0x45b   : > { %810 = vmatpush.msrb.mxu3 %v791_v20 }
 0x45d   : > { %811 = vmatpush.msrb.mxu3 %v790_v24 }
 0x45e   : > { %v2545_v3 = vpop.permute.xlu0 %2544 }
 0x45f   : > { %v2547_v5 = vunpack.i.h.bf16 %v2545_v3  ;;  %v2546_v12 = vunpack.i.l.bf16 %v2545_v3  ;;  %812 = vmatpush.msrb.mxu3 %v789_v23 }
 0x461   : > { %747 = vmatpush.msra.mxu1 %v2546_v12 }
 0x463   : > { %748 = vmatpush.msra.mxu1 %v2547_v5 }
 0x465   : > { %749 = vmatpush.msra.mxu1 %v2551_v13 }
 0x467   : > { %750 = vmatpush.msra.mxu1 %v2552_v8 }
 0x4d0   : > { %v560_v0 = vpop.f32.mrf.mxu2 }
 0x4d1   : > { %696 = vrot.lane.b32.xlu2 %v560_v0, %s3602_s20  ;;  %s3649_s20 = smov 88  }
 0x4d8   : > { %v692_v1 = vpop.f32.mrf.mxu2 }
 0x4d9   : > { %704 = vrot.lane.b32.xlu2 %v692_v1, %s3598_s26  ;;  %v835_v1 = vpop.permute.xlu1 %834  ;;  %s3643_s26 = smov 16  }
 0x4db   : > { %v626_v2 = vpop.f32.mrf.mxu3 }
 0x4dc   : > { %700 = vrot.lane.b32.xlu0 %v626_v2, %s3600_s12  ;;  %s3641_s12 = smov 32  }
 0x52b   : > { %v697_v14 = vpop.permute.xlu2 %696 }
 0x52c   : > { %v707_v15 = vsel %vm434_vm1, %v3070_v34, %v697_v14  ;;  %v2556_v34 = vunpack.i.l.bf16 %v2555_v32 }
 0x52e   : > { %855 = vmatpush.msra.mxu0 %v2556_v34 }
 0x530   : > { %856 = vmatpush.msra.mxu0 %v2557_v33 }
 0x532   : > { %857 = vmatpush.msra.mxu0 %v2561_v39 }
 0x533   : > { %v705_v17 = vpop.permute.xlu2 %704 }
 0x534   : > { %858 = vmatpush.msra.mxu0 %v2562_v38 }
 0x54e   : > { %v701_v16 = vpop.permute.xlu0 %700 }
 0x54f   : > { %v709_v18 = vsel %vm708_vm2, %v707_v15, %v701_v16 }
 0x550   : > { %v711_v19 = vsel %vm710_vm3, %v709_v18, %v705_v17 }
 0x551   : > { %2392 = vmatmul.msk.f32.vlgmr.msra.gmra.mxu1 %vm407_vm0, %v711_v19 }
 0x5ce   : > { %v752_v27 = vpop.f32.mrf.mxu1 }
 0x5cf   : > { %v753_v28 = vadd.f32 %v752_v27, %v730_v26 }
 0x5d1   : > { %v755_v29 = vadd.f32 %v753_v28, %v3024_v6  ;;  %v3126_v6 = vld [vmem:[%s2986_s28] sm:$0xff]  ;;  %s3650_s28 = smov 112  }
 0x5d2   : > { %2394 = vmatmul.msk.f32.vlgmr.msra.gmra.mxu0 %vm407_vm0, %v3126_v6 }
 0x5d3   : > { %v756_v30 = vsel %vm407_vm0, %v755_v29, 0.0 }
 0x5d4   : > { %757 = vadd.xlane.f32.xlu0 %v756_v30 }
 0x5da   : > { %2395 = vmatmul.msk.f32.gmra.mxu0 %vm407_vm0, %v3131_v43 }
 0x647   : > { %v758_v45 = vpop.xlane.xlu0 %757 }
 0x648   : > { %v766_v46 = vmul.f32 %v3133_v44, %v758_v45 }
 0x64a   : > { %v767_v47 = vsub.f32 %v755_v29, %v766_v46 }
 0x64c   : > { %v768_v48 = vmul.f32 %v767_v47, %v767_v47 }
 0x64e   : > { %v769_v49 = vsel %vm407_vm0, %v768_v48, 0.0 }
 0x64f   : > { %770 = vadd.xlane.f32.xlu2 %v769_v49  ;;  %v860_v11 = vpop.f32.mrf.mxu0 }
 0x650   : > { %v861_v2 = vadd.f32 %v860_v11, %v835_v1 }
 0x657   : > { %v863_v0 = vpop.f32.mrf.mxu0 }
 0x658   : > { %v864_v3 = vadd.f32 %v863_v0, %v835_v1 }
 0x65a   : > { %940 = vrot.lane.b32.xlu0 %v864_v3, %s3616_s23  ;;  %2396 = vmatpush.xpose.msk.msra.mxu2 %vm434_vm1, %v864_v3  ;;  %v3165_v12 = vpack.i.bf16 %v861_v2, %v864_v3 }
 0x65e   : > { %2397 = vmatpush.xpose.msk.msra.mxu2 %vm434_vm1, %v861_v2 }
 0x667   : > { %938 = vrot.lane.b32.xlu2 %v861_v2, %s3616_s23 }
 0x66f   : > { %1086 = vrot.lane.b32.xlu2 %v864_v3, %s3614_s27 }
 0x677   : > { %1084 = vrot.lane.b32.xlu2 %v861_v2, %s3614_s27 }
 0x6c2   : > { %v771_v51 = vpop.xlane.xlu2 %770 }
 0x6c3   : > { %v772_v52 = vmul.f32 %v771_v51, %v3133_v44 }
 0x6c5   : > { %v773_v53 = vadd.f32 1e-05, %v772_v52 }
 0x6c7   : > { %2663 = vrsqrt.f32 %v773_v53  ;;  %vm780_vm6 = vweird.f32 %v773_v53 }
 0x6ca   : > { %v939_v13 = vpop.permute.xlu2 %938 }
 0x6cc   : > { %v941_v15 = vpop.permute.xlu0 %940 }
 0x6cd   : > { %v2664_v54 = vpop.eup %2663  ;;  %2400 = vmatpush.xpose.msk.msra.mxu3 %vm434_vm1, %v941_v15 }
 0x6ce   : > { %v775_v55 = vmul.f32 %v2664_v54, %v773_v53  ;;  %vm781_vm5 = vweird.f32 %v2664_v54 }
 0x6cf   : > { %vm782_vm7 = vmor %vm780_vm6, %vm781_vm5 }
 0x6d0   : > { %v776_v56 = vmul.f32 %v2664_v54, %v775_v55 }
 0x6d1   : > { %2401 = vmatpush.xpose.msk.msra.mxu3 %vm434_vm1, %v939_v13 }
 0x6d2   : > { %v777_v57 = vmul.f32 0.5, %v776_v56  ;;  %v1087_v8 = vpop.permute.xlu2 %1086 }
 0x6d3   : > { %2408 = vmatpush.xpose.msk.msrb.mxu0 %vm434_vm1, %v1087_v8 }
 0x6d4   : > { %v778_v59 = vsub.f32 1.5, %v777_v57 }
 0x6d6   : > { %v779_v7 = vmul.f32 %v2664_v54, %v778_v59 }
 0x6d8   : > { %v783_v61 = vsel %vm782_vm7, %v2664_v54, %v779_v7 }
 0x6d9   : > { %v784_v62 = vmul.f32 %v783_v61, %v767_v47 }
 0x6da   : > { %v1085_v14 = vpop.permute.xlu2 %1084 }
 0x6db   : > { %v786_v9 = vmul.f32 %v785_v60, %v784_v62  ;;  %2409 = vmatpush.xpose.msk.msrb.mxu0 %vm434_vm1, %v1085_v14 }
 0x6dd   : > { %v3152_v10 = vadd.f32 %v787_v63, %v786_v9 }
 0x6df   : > { %2393 = vmatmul.msk.f32.vlgmr.msrb.gmra.mxu3 %vm407_vm0, %v3152_v10 }
 0x762   : > { %v814_v4 = vpop.f32.mrf.mxu3 }
 0x763   : > { %v815_v5 = vadd.f32 %v814_v4, %v3140_v50 }
 0x765   : > { %936 = vrot.lane.b32.xlu0 %v815_v5, %s3616_s23  ;;  %2398 = vmatmul.msk.f32.vlgmr.msra.gmra.mxu2 %vm434_vm1, %v815_v5  ;;  %s3647_s23 = smov 120  }
 0x76d   : > { %2564 = vrot.lane.b32.xlu0 %v3165_v12, %s3618_s29 }
 0x775   : > { %1011 = vrot.lane.b32.xlu0 %v861_v2, %s3610_s11 }
 0x77d   : > { %1009 = vrot.lane.b32.xlu0 %v815_v5, %s3610_s11 }
 0x7d7   : > { %v937_v16 = vpop.permute.xlu0 %936 }
 0x7d8   : > { %2402 = vmatmul.msk.f32.vlgmr.msra.gmra.mxu3 %vm434_vm1, %v937_v16 }
 0x7df   : > { %v2565_v17 = vpop.permute.xlu0 %2564 }
 0x7e0   : > { %v2566_v18 = vunpack.i.l.bf16 %v2565_v17  ;;  %v2567_v19 = vunpack.i.h.bf16 %v2565_v17 }
 0x7e2   : > { %930 = vmatpush.msrb.mxu1 %v2566_v18 }
 0x7e4   : > { %931 = vmatpush.msrb.mxu1 %v2567_v19 }
 0x7e7   : > { %v1012_v34 = vpop.permute.xlu0 %1011 }
 0x7e8   : > { %v892_v20 = vpop.f32.mrf.mxu2 }
 0x7e9   : > { %v895_v21 = vmul.f32 0.35355338, %v892_v20 }
 0x7eb   : > { %v896_v23 = vsel %vm708_vm2, %v895_v21, -inf }
 0x7ec   : > { %897 = vmax.xlane.f32.xlu1 %v896_v23 }
 0x7ef   : > { %v1010_v35 = vpop.permute.xlu0 %1009 }
 0x805   : > { %1013 = vrot.lane.b32.xlu1 %v864_v3, %s3610_s11  ;;  %s3651_s11 = smov 56  }
 0x85b   : > { %v965_v24 = vpop.f32.mrf.mxu3 }
 0x85c   : > { %v968_v26 = vmul.f32 0.35355338, %v965_v24 }
 0x85e   : > { %v969_v27 = vsel %vm708_vm2, %v968_v26, -inf }
 0x85f   : > { %v898_v28 = vpop.xlane.xlu1 %897  ;;  %970 = vmax.xlane.f32.xlu0 %v969_v27 }
 0x860   : > { %v899_v29 = vsub.f32 %v895_v21, %v898_v28 }
 0x862   : > { %v900_v30 = vmul.f32 1.442695, %v899_v29 }
 0x864   : > { %2665 = vpow2.f32 %v900_v30 }
 0x86a   : > { %v2666_v31 = vpop.eup %2665 }
 0x86b   : > { %v902_v32 = vsel %vm708_vm2, %v2666_v31, 0.0 }
 0x86c   : > { %903 = vadd.xlane.f32.xlu2 %v902_v32 }
 0x877   : > { %v1014_v33 = vpop.permute.xlu1 %1013 }
 0x878   : > { %2404 = vmatpush.xpose.msk.msra.mxu1 %vm434_vm1, %v1014_v33 }
 0x87c   : > { %2405 = vmatpush.xpose.msk.msra.mxu1 %vm434_vm1, %v1012_v34 }
 0x884   : > { %1082 = vrot.lane.b32.xlu2 %v815_v5, %s3614_s27  ;;  %s3648_s27 = smov 104  }
 0x8d2   : > { %v971_v36 = vpop.xlane.xlu0 %970 }
 0x8d3   : > { %v972_v37 = vsub.f32 %v968_v26, %v971_v36 }
 0x8d5   : > { %v973_v38 = vmul.f32 1.442695, %v972_v37 }
 0x8d7   : > { %2667 = vpow2.f32 %v973_v38 }
 0x8dd   : > { %v2668_v39 = vpop.eup %2667 }
 0x8de   : > { %v975_v40 = vsel %vm708_vm2, %v2668_v39, 0.0 }
 0x8df   : > { %v904_v41 = vpop.xlane.xlu2 %903  ;;  %976 = vadd.xlane.f32.xlu0 %v975_v40 }
 0x8e0   : > { %2669 = vrcp.f32 %v904_v41 }
 0x8e6   : > { %v2670_v42 = vpop.eup %2669 }
 0x8e7   : > { %v906_v45 = vmul.f32 %v2670_v42, %v2666_v31  ;;  %v1083_v46 = vpop.permute.xlu2 %1082 }
 0x8e8   : > { %2410 = vmatmul.msk.f32.vlgmr.msrb.gmra.mxu0 %vm434_vm1, %v1083_v46 }
 0x8e9   : > { %2399 = vmatmul.msk.f32.vlgmr.msrb.gmra.mxu1 %vm708_vm2, %v906_v45 }
 0x8f1   : > { %2406 = vmatmul.msk.f32.vlgmr.msra.gmra.mxu1 %vm434_vm1, %v1010_v35 }
 0x952   : > { %v977_v11 = vpop.xlane.xlu0 %976 }
 0x965   : > { %v1111_v47 = vpop.f32.mrf.mxu0 }
 0x966   : > { %v1114_v48 = vmul.f32 0.35355338, %v1111_v47  ;;  %v3187_v49 = vpop.f32.mrf.mxu1 }
 0x968   : > { %v1115_v51 = vsel %vm708_vm2, %v1114_v48, -inf }
 0x969   : > { %1116 = vmax.xlane.f32.xlu2 %v1115_v51  ;;  %v1235_v51 = vld [vmem:[%s3584_s5] sm:$0xff] }
 0x96e   : > { %v1038_v52 = vpop.f32.mrf.mxu1 }
 0x96f   : > { %v1041_v53 = vmul.f32 0.35355338, %v1038_v52  ;;  %v1274_v52 = vld [vmem:[%s3586_s7 + $0x38] sm:$0xff] }
 0x970   : > { %1288 = vmatpush.msra.mxu0 %v1274_v52 }
 0x971   : > { %v1042_v54 = vsel %vm708_vm2, %v1041_v53, -inf }
 0x972   : > { %1043 = vmax.xlane.f32.xlu1 %v1042_v54  ;;  %v1272_v54 = vld [vmem:[%s3586_s7 + $0x28] sm:$0xff] }
 0x98b   : > { %2569 = vrot.lane.b32.xlu1 %v3165_v12, %s3612_s22  ;;  %s3653_s22 = smov 48  }
 0x993   : > { %2584 = vrot.lane.b32.xlu1 %v3109_v22, %s3641_s12 }
 0x99b   : > { %2589 = vrot.lane.b32.xlu1 %v3119_v25, %s3641_s12 }
 0x9a3   : > { %1182 = vrot.lane.b32.xlu1 %v3140_v50, %s3641_s12 }
 0x9dc   : > { %v1117_v55 = vpop.xlane.xlu2 %1116 }
 0x9dd   : > { %v1118_v56 = vsub.f32 %v1114_v48, %v1117_v55  ;;  %v1238_v48 = vld [vmem:[%s3584_s5 + $0x18] sm:$0xff] }
 0x9df   : > { %v1119_v57 = vmul.f32 1.442695, %v1118_v56 }
 0x9e1   : > { %2671 = vpow2.f32 %v1119_v57  ;;  %v1271_v57 = vld [vmem:[%s3586_s7 + $0x20] sm:$0xff] }
 0x9e5   : > { %v1044_v59 = vpop.xlane.xlu1 %1043 }
 0x9e6   : > { %v1045_v7 = vsub.f32 %v1041_v53, %v1044_v59  ;;  %v1273_v53 = vld [vmem:[%s3586_s7 + $0x30] sm:$0xff] }
 0x9e7   : > { %v2672_v60 = vpop.eup %2671  ;;  %1289 = vmatpush.msra.mxu0 %v1273_v53 }
 0x9e8   : > { %v1046_v61 = vmul.f32 1.442695, %v1045_v7  ;;  %v1121_v62 = vsel %vm708_vm2, %v2672_v60, 0.0  ;;  %v1270_v7 = vld [vmem:[%s3586_s7 + $0x18] sm:$0xff] }
 0x9e9   : > { %1122 = vadd.xlane.f32.xlu0 %v1121_v62  ;;  %1290 = vmatpush.msra.mxu0 %v1272_v54 }
 0x9ea   : > { %2673 = vpow2.f32 %v1046_v61 }
 0x9eb   : > { %2675 = vrcp.f32 %v977_v11  ;;  %1291 = vmatpush.msra.mxu0 %v1271_v57 }
 0x9ed   : > { %1292 = vmatpush.msra.mxu0 %v1270_v7 }
 0x9f0   : > { %v2674_v63 = vpop.eup %2673 }
 0x9f1   : > { %v1048_v9 = vsel %vm708_vm2, %v2674_v63, 0.0  ;;  %v2676_v1 = vpop.eup %2675 }
 0x9f2   : > { %1049 = vadd.xlane.f32.xlu2 %v1048_v9  ;;  %v979_v4 = vmul.f32 %v2676_v1, %v2668_v39 }
 0x9fd   : > { %2579 = vrot.lane.b32.xlu0 %v3165_v12, %s3639_s24  ;;  %v2570_v0 = vpop.permute.xlu1 %2569 }
 0x9fe   : > { %v2571_v2 = vunpack.i.l.bf16 %v2570_v0  ;;  %v2572_v3 = vunpack.i.h.bf16 %v2570_v0  ;;  %v1231_v0 = vperm.slane %v3148_v58, 3 }
 0xa00   : > { %1003 = vmatpush.msrb.mxu2 %v2571_v2 }
 0xa02   : > { %1004 = vmatpush.msrb.mxu2 %v2572_v3  ;;  %v1233_v3 = vperm.slane %v3148_v58, 4 }
 0xa03   : > { %2403 = vmatmul.msk.f32.vlgmr.msrb.gmra.mxu2 %vm708_vm2, %v979_v4 }
 0xa05   : > { %v2585_v25 = vpop.permute.xlu1 %2584 }
 0xa06   : > { %v2587_v26 = vunpack.i.h.bf16 %v2585_v25  ;;  %v2586_v27 = vunpack.i.l.bf16 %v2585_v25 }
 0xa08   : > { %1200 = vmatpush.msrb.mxu1 %v2586_v27 }
 0xa0a   : > { %2574 = vrot.lane.b32.xlu2 %v3165_v12, %s3640_s30  ;;  %1201 = vmatpush.msrb.mxu1 %v2587_v26 }
 0xa0d   : > { %v2590_v28 = vpop.permute.xlu1 %2589 }
 0xa0e   : > { %v2592_v29 = vunpack.i.h.bf16 %v2590_v28  ;;  %v2591_v30 = vunpack.i.l.bf16 %v2590_v28  ;;  %v3271_v28 = vld [vmem:[%s3636_s2 + $0x38] sm:$0xff] }
 0xa10   : > { %1202 = vmatpush.msrb.mxu1 %v2591_v30 }
 0xa12   : > { %1203 = vmatpush.msrb.mxu1 %v2592_v29  ;;  %v3277_v29 = vld [vmem:[%s3636_s2 + $0x30] sm:$0xff] }
 0xa13   : > { %v2593_v30 = vpack.i.bf16 %v3277_v29, %v3271_v28 }
 0xa15   : > { %v1183_v36 = vpop.permute.xlu1 %1182 }
 0xa5c   : > { %v1123_v13 = vpop.xlane.xlu0 %1122 }
 0xa65   : > { %v1050_v5 = vpop.xlane.xlu2 %1049 }
 0xa66   : > { %2677 = vrcp.f32 %v1050_v5 }
 0xa67   : > { %2679 = vrcp.f32 %v1123_v13  ;;  %v1269_v13 = vld [vmem:[%s3586_s7 + $0x10] sm:$0xff] }
 0xa68   : > { %1293 = vmatpush.msra.mxu0 %v1269_v13 }
 0xa6c   : > { %v2678_v14 = vpop.eup %2677 }
 0xa6d   : > { %v2575_v8 = vpop.permute.xlu2 %2574  ;;  %v2680_v17 = vpop.eup %2679  ;;  %v1052_v20 = vmul.f32 %v2678_v14, %v2674_v63  ;;  %v1267_v14 = vld [vmem:[%s3586_s7] sm:$0xff] }
 0xa6e   : > { %v2576_v15 = vunpack.i.l.bf16 %v2575_v8  ;;  %v2577_v18 = vunpack.i.h.bf16 %v2575_v8  ;;  %v1125_v21 = vmul.f32 %v2680_v17, %v2672_v60  ;;  %v1268_v8 = vld [vmem:[%s3586_s7 + $0x8] sm:$0xff] }
 0xa6f   : > { %v2580_v16 = vpop.permute.xlu0 %2579  ;;  %1294 = vmatpush.msra.mxu0 %v1268_v8 }
 0xa70   : > { %v2581_v19 = vunpack.i.l.bf16 %v2580_v16  ;;  %1076 = vmatpush.msrb.mxu3 %v2576_v15  ;;  %v2582_v12 = vunpack.i.h.bf16 %v2580_v16  ;;  %v2643_v15 = vld [vmem:[%s3585_s6] ss:$0 sm:$0xff] }
 0xa71   : > { %1295 = vmatpush.msra.mxu0 %v1267_v14 }
 0xa72   : > { %1077 = vmatpush.msrb.mxu3 %v2577_v18  ;;  %1149 = vmatpush.msra.mxu2 %v2581_v19  ;;  %v1275_v19 = vperm.slane %v3148_v58, 0 }
 0xa73   : > { %2407 = vmatmul.msk.f32.vlgmr.msrb.gmra.mxu3 %vm708_vm2, %v1052_v20 }
 0xa74   : > { %1150 = vmatpush.msra.mxu2 %v2582_v12  ;;  %1258 = vmatpush.msra.mxu3 %v1238_v48 }
 0xa75   : > { %2411 = vmatmul.msk.f32.vlgmr.msra.gmra.mxu2 %vm708_vm2, %v1125_v21 }
 0xa76   : > { %1352 = vmatpush.msrb.mxu2 %v3271_v28 }
 0xa78   : > { %1353 = vmatpush.msrb.mxu2 %v3277_v29 }
 0xa86   : > { %v1006_v22 = vpop.f32.mrf.mxu2 }
 0xa87   : > { %1156 = vrot.lane.b32.xlu0 %v1006_v22, %s3642_s19 }
 0xaf6   : > { %v1079_v23 = vpop.f32.mrf.mxu3 }
 0xaf7   : > { %1160 = vrot.lane.b32.xlu2 %v1079_v23, %s3643_s26 }
 0xaf8   : > { %v1152_v24 = vpop.f32.mrf.mxu2 }
 0xaf9   : > { %1164 = vrot.lane.b32.xlu0 %v1152_v24, %s3644_s15  ;;  %v1157_v50 = vpop.permute.xlu0 %1156 }
 0xafa   : > { %v1167_v32 = vsel %vm434_vm1, %v3187_v49, %v1157_v50  ;;  %v1236_v49 = vld [vmem:[%s3584_s5 + $0x8] sm:$0xff] }
 0xafb   : > { %v3285_v50 = vld [vmem:[%s3636_s2 + $0x28] sm:$0xff] }
 0xafc   : > { %1354 = vmatpush.msrb.mxu2 %v3285_v50 }
 0xb51   : > { %v1161_v31 = vpop.permute.xlu2 %1160 }
 0xb52   : > { %v1168_v33 = vsel %vm708_vm2, %v1167_v32, %v1161_v31  ;;  %v3290_v31 = vld [vmem:[%s3636_s2 + $0x20] sm:$0xff] }
 0xb53   : > { %v2598_v32 = vpack.i.bf16 %v3290_v31, %v3285_v50  ;;  %1355 = vmatpush.msrb.mxu2 %v3290_v31 }
 0xb6b   : > { %v1165_v34 = vpop.permute.xlu0 %1164 }
 0xb6c   : > { %v1169_v35 = vsel %vm710_vm3, %v1168_v33, %v1165_v34 }
 0xb6d   : > { %2412 = vmatmul.msk.f32.vlgmr.msrb.gmra.mxu1 %vm407_vm0, %v1169_v35 }
 0xbea   : > { %v1205_v37 = vpop.f32.mrf.mxu1 }
 0xbeb   : > { %v1206_v38 = vadd.f32 %v1205_v37, %v1183_v36 }
 0xbed   : > { %v1208_v39 = vadd.f32 %v1206_v38, %v3152_v10  ;;  %v1237_v10 = vld [vmem:[%s3584_s5 + $0x10] sm:$0xff] }
 0xbee   : > { %1259 = vmatpush.msra.mxu3 %v1237_v10 }
 0xbef   : > { %v1209_v40 = vsel %vm407_vm0, %v1208_v39, 0.0 }
 0xbf0   : > { %1210 = vadd.xlane.f32.xlu2 %v1209_v40  ;;  %1260 = vmatpush.msra.mxu3 %v1236_v49  ;;  %v3306_v49 = vld [vmem:[%s3638_s4 + $0x2] sm:$0x3] }
 0xbf2   : > { %1261 = vmatpush.msra.mxu3 %v1235_v51  ;;  %v1336_v51 = vperm.slane %v3306_v49, 0 }
 0xc63   : > { %v1211_v41 = vpop.xlane.xlu2 %1210 }
 0xc64   : > { %v1212_v42 = vmul.f32 %v1211_v41, %v3133_v44 }
 0xc66   : > { %v1213_v45 = vsub.f32 %v1208_v39, %v1212_v42  ;;  %v1323_v42 = vperm.slane %v3148_v58, 5 }
 0xc68   : > { %v1214_v46 = vmul.f32 %v1213_v45, %v1213_v45 }
 0xc6a   : > { %v1215_v47 = vsel %vm407_vm0, %v1214_v46, 0.0 }
 0xc6b   : > { %1216 = vadd.xlane.f32.xlu0 %v1215_v47  ;;  %v1325_v47 = vperm.slane %v3148_v58, 6 }
 0xcde   : > { %v1217_v55 = vpop.xlane.xlu0 %1216 }
 0xcdf   : > { %v1218_v56 = vmul.f32 %v1217_v55, %v3133_v44 }
 0xce1   : > { %v1219_v59 = vadd.f32 1e-05, %v1218_v56 }
 0xce3   : > { %2681 = vrsqrt.f32 %v1219_v59  ;;  %vm1226_vm9 = vweird.f32 %v1219_v59 }
 0xce9   : > { %v2682_v60 = vpop.eup %2681 }
 0xcea   : > { %v1221_v61 = vmul.f32 %v2682_v60, %v1219_v59  ;;  %vm1227_vm8 = vweird.f32 %v2682_v60 }
 0xceb   : > { %vm1228_vm10 = vmor %vm1226_vm9, %vm1227_vm8 }
 0xcec   : > { %v1222_v62 = vmul.f32 %v2682_v60, %v1221_v61 }
 0xcee   : > { %v1223_v63 = vmul.f32 0.5, %v1222_v62 }
 0xcf0   : > { %v1224_v9 = vsub.f32 1.5, %v1223_v63 }
 0xcf2   : > { %v1225_v11 = vmul.f32 %v2682_v60, %v1224_v9 }
 0xcf4   : > { %v1229_v1 = vsel %vm1228_vm10, %v2682_v60, %v1225_v11 }
 0xcf5   : > { %v1230_v2 = vmul.f32 %v1229_v1, %v1213_v45 }
 0xcf7   : > { %v1232_v4 = vmul.f32 %v1231_v0, %v1230_v2 }
 0xcf9   : > { %v1234_v5 = vadd.f32 %v1233_v3, %v1232_v4 }
 0xcfb   : > { %2413 = vmatmul.msk.f32.vlgmr.msra.gmra.mxu3 %vm407_vm0, %v1234_v5 }
 0xd7e   : > { %v1263_v16 = vpop.f32.mrf.mxu3 }
 0xd7f   : > { %v1264_v17 = vadd.f32 %v2643_v15, %v1263_v16 }
 0xd81   : > { %v1266_v18 = vmax.f32 %v1264_v17, 0.0 }
 0xd83   : > { %2414 = vmatmul.msk.f32.vlgmr.msra.gmra.mxu0 %vm1276_vm11, %v1266_v18 }
 0xe00   : > { %v1297_v20 = vpop.f32.mrf.mxu0 }
 0xe01   : > { %v1298_v12 = vadd.f32 %v1297_v20, %v1275_v19 }
 0xe03   : > { %v1300_v21 = vadd.f32 %v1298_v12, %v1234_v5 }
 0xe05   : > { %v1301_v22 = vsel %vm407_vm0, %v1300_v21, 0.0 }
 0xe06   : > { %1302 = vadd.xlane.f32.xlu1 %v1301_v22 }
 0xe79   : > { %v1303_v23 = vpop.xlane.xlu1 %1302 }
 0xe7a   : > { %v1304_v24 = vmul.f32 %v1303_v23, %v3133_v44 }
 0xe7c   : > { %v1305_v25 = vsub.f32 %v1300_v21, %v1304_v24 }
 0xe7e   : > { %v1306_v26 = vmul.f32 %v1305_v25, %v1305_v25 }
 0xe80   : > { %v1307_v27 = vsel %vm407_vm0, %v1306_v26, 0.0 }
 0xe81   : > { %1308 = vadd.xlane.f32.xlu2 %v1307_v27 }
 0xef4   : > { %v1309_v33 = vpop.xlane.xlu2 %1308 }
 0xef5   : > { %v1310_v34 = vmul.f32 %v1309_v33, %v3133_v44 }
 0xef7   : > { %v1311_v35 = vadd.f32 1e-05, %v1310_v34 }
 0xef9   : > { %2683 = vrsqrt.f32 %v1311_v35  ;;  %vm1318_vm13 = vweird.f32 %v1311_v35 }
 0xeff   : > { %v2684_v36 = vpop.eup %2683 }
 0xf00   : > { %v1313_v37 = vmul.f32 %v2684_v36, %v1311_v35  ;;  %vm1319_vm12 = vweird.f32 %v2684_v36 }
 0xf01   : > { %vm1320_vm14 = vmor %vm1318_vm13, %vm1319_vm12 }
 0xf02   : > { %v1314_v38 = vmul.f32 %v2684_v36, %v1313_v37 }
 0xf04   : > { %v1315_v39 = vmul.f32 0.5, %v1314_v38 }
 0xf06   : > { %v1316_v40 = vsub.f32 1.5, %v1315_v39 }
 0xf08   : > { %v1317_v41 = vmul.f32 %v2684_v36, %v1316_v40 }
 0xf0a   : > { %v1321_v45 = vsel %vm1320_vm14, %v2684_v36, %v1317_v41 }
 0xf0b   : > { %v1322_v46 = vmul.f32 %v1321_v45, %v1305_v25 }
 0xf0d   : > { %v1324_v48 = vmul.f32 %v1323_v42, %v1322_v46 }
 0xf0f   : > { %v3299_v10 = vadd.f32 %v1325_v47, %v1324_v48 }
 0xf11   : > { %2421 = vmatmul.msk.f32.vlgmr.msrb.gmra.mxu2 %vm407_vm0, %v3299_v10 }
 0xf94   : > { %v1357_v52 = vpop.f32.mrf.mxu2 }
 0xf95   : > { %v3311_v53 = vadd.f32 %v1357_v52, %v1336_v51 }
 0xf97   : > { %1399 = vrot.lane.b32.xlu2 %v3311_v53, %s3645_s0  ;;  %1361 = vrot.lane.b32.xlu0 %v3311_v53, %s3646_s1 }
 0xf9f   : > { %1425 = vrot.lane.b32.xlu0 %v3311_v53, %s3647_s23 }
 0xfa7   : > { %1493 = vrot.lane.b32.xlu0 %v3311_v53, %s3640_s30 }
 0xfaf   : > { %1557 = vrot.lane.b32.xlu0 %v3311_v53, %s3648_s27 }
 0xff1   : > { %v1400_v58 = vpop.permute.xlu2 %1399 }
 0xff2   : > { %1420 = vmatpush.msrb.mxu3 %v1400_v58 }
0x1009   : > { %v1362_v54 = vpop.permute.xlu0 %1361 }
0x100a   : > { %2422 = vmatpush.xpose.msk.msra.mxu1 %vm434_vm1, %v1362_v54 }
0x100d   : > { %2423 = vmatmul.msk.f32.vlgmr.msra.gmra.mxu1 %vm434_vm1, %v3311_v53 }
0x1011   : > { %v1426_v55 = vpop.permute.xlu0 %1425 }
0x1019   : > { %v1494_v56 = vpop.permute.xlu0 %1493 }
0x101a   : > { %2428 = vmatpush.xpose.msk.msra.mxu3 %vm434_vm1, %v1494_v56 }
0x1021   : > { %v1558_v4 = vpop.permute.xlu0 %1557 }
0x108a   : > { %v1384_v57 = vpop.f32.mrf.mxu1 }
0x108b   : > { %v1387_v59 = vmul.f32 0.35355338, %v1384_v57 }
0x108d   : > { %v1388_v7 = vsel %vm434_vm1, %v1387_v59, -inf }
0x108e   : > { %1389 = vmax.xlane.f32.xlu1 %v1388_v7 }
0x10a7   : > { %1427 = vrot.lane.b32.xlu1 %v3311_v53, %s3649_s20 }
0x10af   : > { %1491 = vrot.lane.b32.xlu1 %v3311_v53, %s3650_s28 }
0x1101   : > { %v1390_v60 = vpop.xlane.xlu1 %1389 }
0x1102   : > { %v1391_v61 = vsub.f32 %v1387_v59, %v1390_v60 }
0x1104   : > { %v1392_v62 = vmul.f32 1.442695, %v1391_v61 }
0x1106   : > { %2685 = vpow2.f32 %v1392_v62 }
0x110c   : > { %v2686_v63 = vpop.eup %2685 }
0x110d   : > { %v1394_v9 = vsel %vm434_vm1, %v2686_v63, 0.0 }
0x110e   : > { %1395 = vadd.xlane.f32.xlu2 %v1394_v9 }
0x1119   : > { %v1428_v11 = vpop.permute.xlu1 %1427 }
0x111a   : > { %2425 = vmatpush.xpose.msk.msra.mxu2 %vm434_vm1, %v1428_v11  ;;  %v2437_v11 = vld [vmem:[%s3582_s3 + $0x30] sm:$0xff] }
0x111d   : > { %2426 = vmatmul.msk.f32.vlgmr.msra.gmra.mxu2 %vm434_vm1, %v1426_v55 }
0x1121   : > { %v1492_v5 = vpop.permute.xlu1 %1491 }
0x1126   : > { %1559 = vrot.lane.b32.xlu2 %v3311_v53, %s3639_s24 }
0x1181   : > { %v1396_v0 = vpop.xlane.xlu2 %1395 }
0x1182   : > { %2687 = vrcp.f32 %v1396_v0  ;;  %v2438_v0 = vld [vmem:[%s3582_s3 + $0x38] sm:$0xff] }
0x1188   : > { %v2688_v1 = vpop.eup %2687 }
0x1189   : > { %v1398_v2 = vmul.f32 %v2688_v1, %v2686_v63  ;;  %v1560_v3 = vpop.permute.xlu2 %1559  ;;  %v3383_v1 = vpack.i.bf16 %v2437_v11, %v2438_v0 }
0x118a   : > { %2431 = vmatpush.xpose.msk.msrb.mxu2 %vm434_vm1, %v1560_v3  ;;  %v2436_v3 = vld [vmem:[%s3582_s3 + $0x28] sm:$0xff] }
0x118b   : > { %2424 = vmatmul.msk.f32.vlgmr.msrb.gmra.mxu3 %vm434_vm1, %v1398_v2  ;;  %v2435_v2 = vld [vmem:[%s3582_s3 + $0x20] sm:$0xff] }
0x118d   : > { %2432 = vmatmul.msk.f32.vlgmr.msrb.gmra.mxu2 %vm434_vm1, %v1558_v4  ;;  %v3393_v4 = vpack.i.bf16 %v2435_v2, %v2436_v3 }
0x1193   : > { %2429 = vmatmul.msk.f32.vlgmr.msra.gmra.mxu3 %vm434_vm1, %v1492_v5 }
0x11a0   : > { %v1450_v13 = vpop.f32.mrf.mxu2 }
0x11a1   : > { %v1453_v8 = vmul.f32 0.35355338, %v1450_v13 }
0x11a3   : > { %v1454_v14 = vsel %vm434_vm1, %v1453_v8, -inf }
0x11a4   : > { %1455 = vmax.xlane.f32.xlu2 %v1454_v14 }
0x120e   : > { %v3342_v15 = vpop.f32.mrf.mxu3 }
0x1210   : > { %v1582_v16 = vpop.f32.mrf.mxu2 }
0x1211   : > { %v1585_v17 = vmul.f32 0.35355338, %v1582_v16 }
0x1213   : > { %v1586_v18 = vsel %vm434_vm1, %v1585_v17, -inf }
0x1214   : > { %1587 = vmax.xlane.f32.xlu0 %v1586_v18 }
0x1216   : > { %v1516_v19 = vpop.f32.mrf.mxu3 }
0x1217   : > { %v1519_v20 = vmul.f32 0.35355338, %v1516_v19  ;;  %v1456_v12 = vpop.xlane.xlu2 %1455 }
0x1218   : > { %v1457_v21 = vsub.f32 %v1453_v8, %v1456_v12 }
0x1219   : > { %v1520_v22 = vsel %vm434_vm1, %v1519_v20, -inf }
0x121a   : > { %v1458_v23 = vmul.f32 1.442695, %v1457_v21  ;;  %1521 = vmax.xlane.f32.xlu1 %v1520_v22 }
0x121c   : > { %2689 = vpow2.f32 %v1458_v23 }
0x1222   : > { %v2690_v24 = vpop.eup %2689 }
0x1223   : > { %v1460_v25 = vsel %vm434_vm1, %v2690_v24, 0.0 }
0x1224   : > { %1461 = vadd.xlane.f32.xlu2 %v1460_v25 }
0x123c   : > { %1465 = vrot.lane.b32.xlu2 %v3311_v53, %s3651_s11 }
0x1244   : > { %2594 = vrot.lane.b32.xlu2 %v2593_v30, %s3641_s12 }
0x1287   : > { %v1588_v26 = vpop.xlane.xlu0 %1587 }
0x1288   : > { %v1589_v27 = vsub.f32 %v1585_v17, %v1588_v26  ;;  %v3400_v17 = vperm.slane %v3306_v49, 1 }
0x128a   : > { %v1590_v33 = vmul.f32 1.442695, %v1589_v27 }
0x128c   : > { %2691 = vpow2.f32 %v1590_v33 }
0x128d   : > { %v1522_v34 = vpop.xlane.xlu1 %1521 }
0x128e   : > { %v1523_v35 = vsub.f32 %v1519_v20, %v1522_v34 }
0x1290   : > { %v1524_v36 = vmul.f32 1.442695, %v1523_v35 }
0x1292   : > { %v2692_v37 = vpop.eup %2691  ;;  %2693 = vpow2.f32 %v1524_v36 }
0x1293   : > { %v1592_v38 = vsel %vm434_vm1, %v2692_v37, 0.0 }
0x1294   : > { %1593 = vadd.xlane.f32.xlu0 %v1592_v38 }
0x1297   : > { %v1462_v39 = vpop.xlane.xlu2 %1461 }
0x1298   : > { %v2694_v40 = vpop.eup %2693  ;;  %2695 = vrcp.f32 %v1462_v39 }
0x1299   : > { %v1526_v41 = vsel %vm434_vm1, %v2694_v40, 0.0 }
0x129a   : > { %1527 = vadd.xlane.f32.xlu1 %v1526_v41  ;;  %v3422_v41 = vld [vmem:[%s3587_s8 + $0x8] sm:$0x7f] }
0x129e   : > { %v2696_v28 = vpop.eup %2695 }
0x129f   : > { %v1464_v29 = vmul.f32 %v2696_v28, %v2690_v24  ;;  %v1466_v30 = vpop.permute.xlu2 %1465 }
0x12a0   : > { %1486 = vmatpush.msrb.mxu1 %v1466_v30  ;;  %v1704_v30 = vperm.slane %v3422_v41, 1 }
0x12a1   : > { %2427 = vmatmul.msk.f32.vlgmr.msrb.gmra.mxu1 %vm434_vm1, %v1464_v29 }
0x12a8   : > { %1597 = vrot.lane.b32.xlu0 %v3311_v53, %s3652_s21 }
0x12b3   : > { %1531 = vrot.lane.b32.xlu1 %v3311_v53, %s3653_s22 }
0x12bb   : > { %2599 = vrot.lane.b32.xlu1 %v2598_v32, %s3641_s12  ;;  %v2595_v32 = vpop.permute.xlu2 %2594 }
0x12bc   : > { %v2596_v58 = vunpack.i.l.bf16 %v2595_v32 }
0x12be   : > { %1673 = vmatpush.msrb.mxu3 %v2596_v58 }
0x12c3   : > { %1655 = vrot.lane.b32.xlu1 %v1336_v51, %s3641_s12  ;;  %v2597_v51 = vunpack.i.h.bf16 %v2595_v32 }
0x12c5   : > { %1674 = vmatpush.msrb.mxu3 %v2597_v51 }
0x12cb   : > { %2604 = vrot.lane.b32.xlu1 %v3383_v1, %s3646_s1 }
0x12d3   : > { %2609 = vrot.lane.b32.xlu1 %v3393_v4, %s3646_s1 }
0x12db   : > { %1754 = vrot.lane.b32.xlu1 %v3400_v17, %s3646_s1 }
0x1307   : > { %v1594_v42 = vpop.xlane.xlu0 %1593 }
0x1308   : > { %2697 = vrcp.f32 %v1594_v42 }
0x130d   : > { %v1528_v46 = vpop.xlane.xlu1 %1527 }
0x130e   : > { %v2698_v45 = vpop.eup %2697  ;;  %2699 = vrcp.f32 %v1528_v46  ;;  %v1706_v46 = vperm.slane %v3422_v41, 2 }
0x130f   : > { %v1596_v47 = vmul.f32 %v2698_v45, %v2692_v37 }
0x1314   : > { %v2700_v53 = vpop.eup %2699 }
0x1315   : > { %v1530_v50 = vmul.f32 %v2700_v53, %v2694_v40 }
0x131a   : > { %v1598_v48 = vpop.permute.xlu0 %1597 }
0x131b   : > { %1618 = vmatpush.msra.mxu1 %v1598_v48 }
0x131c   : > { %2433 = vmatmul.msk.f32.vlgmr.msra.gmra.mxu1 %vm434_vm1, %v1596_v47 }
0x131e   : > { %v1488_v52 = vpop.f32.mrf.mxu1 }
0x131f   : > { %1624 = vrot.lane.b32.xlu0 %v1488_v52, %s3642_s19 }
0x1325   : > { %v1532_v31 = vpop.permute.xlu1 %1531 }
0x1326   : > { %1552 = vmatpush.msrb.mxu0 %v1532_v31 }
0x1327   : > { %2430 = vmatmul.msk.f32.vlgmr.msrb.gmra.mxu0 %vm434_vm1, %v1530_v50 }
0x1328   : > { %1729 = vmatpush.msra.mxu0 %v2438_v0 }
0x132a   : > { %1730 = vmatpush.msra.mxu0 %v2437_v11 }
0x132c   : > { %1731 = vmatpush.msra.mxu0 %v2436_v3 }
0x132d   : > { %v2600_v56 = vpop.permute.xlu1 %2599 }
0x132e   : > { %v2602_v57 = vunpack.i.h.bf16 %v2600_v56  ;;  %v2601_v59 = vunpack.i.l.bf16 %v2600_v56  ;;  %1732 = vmatpush.msra.mxu0 %v2435_v2 }
0x1330   : > { %1675 = vmatpush.msrb.mxu3 %v2601_v59 }
0x1332   : > { %1676 = vmatpush.msrb.mxu3 %v2602_v57 }
0x1335   : > { %v1656_v5 = vpop.permute.xlu1 %1655 }
0x133d   : > { %v2605_v16 = vpop.permute.xlu1 %2604 }
0x133e   : > { %v2607_v18 = vunpack.i.h.bf16 %v2605_v16  ;;  %v2606_v19 = vunpack.i.l.bf16 %v2605_v16 }
0x1340   : > { %1769 = vmatpush.msra.mxu2 %v2606_v19 }
0x1342   : > { %1770 = vmatpush.msra.mxu2 %v2607_v18 }
0x1345   : > { %v2610_v20 = vpop.permute.xlu1 %2609 }
0x1346   : > { %v2612_v12 = vunpack.i.h.bf16 %v2610_v20  ;;  %v2611_v21 = vunpack.i.l.bf16 %v2610_v20 }
0x1348   : > { %1771 = vmatpush.msra.mxu2 %v2611_v21 }
0x134a   : > { %1772 = vmatpush.msra.mxu2 %v2612_v12 }
0x134b   : > { %2440 = vmatmul.msk.f32.vlgmr.msra.gmra.mxu2 %vm407_vm0, %v3126_v6 }
0x134d   : > { %v1755_v33 = vpop.permute.xlu1 %1754 }
0x1353   : > { %2441 = vmatmul.msk.f32.gmra.mxu2 %vm407_vm0, %v3131_v43 }
0x1391   : > { %v1625_v7 = vpop.permute.xlu0 %1624 }
0x1392   : > { %v1635_v61 = vsel %vm434_vm1, %v3342_v15, %v1625_v7 }
0x1399   : > { %v1620_v54 = vpop.f32.mrf.mxu1 }
0x139a   : > { %1632 = vrot.lane.b32.xlu0 %v1620_v54, %s3644_s15 }
0x13a4   : > { %v1554_v55 = vpop.f32.mrf.mxu0 }
0x13a5   : > { %1628 = vrot.lane.b32.xlu2 %v1554_v55, %s3643_s26 }
0x13ce   : > { %v1774_v25 = vpop.f32.mrf.mxu2 }
0x13cf   : > { %v1775_v35 = vadd.f32 %v1774_v25, %v1755_v33 }
0x13d6   : > { %v1777_v6 = vpop.f32.mrf.mxu2 }
0x13d7   : > { %v1778_v36 = vadd.f32 %v1777_v6, %v1755_v33 }
0x13d9   : > { %v3411_v37 = vpack.i.bf16 %v1775_v35, %v1778_v36  ;;  %2442 = vmatpush.xpose.msk.msrb.mxu1 %vm434_vm1, %v1778_v36 }
0x13dd   : > { %2443 = vmatpush.xpose.msk.msrb.mxu1 %vm434_vm1, %v1775_v35 }
0x13ff   : > { %v1629_v60 = vpop.permute.xlu2 %1628 }
0x1400   : > { %v1636_v62 = vsel %vm708_vm2, %v1635_v61, %v1629_v60 }
0x140c   : > { %v1633_v63 = vpop.permute.xlu0 %1632 }
0x140d   : > { %v1637_v9 = vsel %vm710_vm3, %v1636_v62, %v1633_v63 }
0x140e   : > { %2434 = vmatmul.msk.f32.vlgmr.msrb.gmra.mxu3 %vm407_vm0, %v1637_v9 }
0x1491   : > { %v1678_v13 = vpop.f32.mrf.mxu3 }
0x1492   : > { %v1679_v8 = vadd.f32 %v1678_v13, %v1656_v5 }
0x1494   : > { %v1681_v14 = vadd.f32 %v1679_v8, %v3299_v10 }
0x1496   : > { %v1682_v15 = vsel %vm407_vm0, %v1681_v14, 0.0 }
0x1497   : > { %1683 = vadd.xlane.f32.xlu2 %v1682_v15 }
0x14af   : > { %1854 = vrot.lane.b32.xlu2 %v1778_v36, %s3647_s23 }
0x14b7   : > { %1925 = vrot.lane.b32.xlu2 %v1775_v35, %s3650_s28 }
0x150a   : > { %v1684_v10 = vpop.xlane.xlu2 %1683 }
0x150b   : > { %v1685_v49 = vmul.f32 %v1684_v10, %v3133_v44 }
0x150d   : > { %v1686_v22 = vsub.f32 %v1681_v14, %v1685_v49 }
0x150f   : > { %v1687_v23 = vmul.f32 %v1686_v22, %v1686_v22 }
0x1511   : > { %v1688_v24 = vsel %vm407_vm0, %v1687_v23, 0.0 }
0x1512   : > { %1689 = vadd.xlane.f32.xlu0 %v1688_v24  ;;  %v1855_v53 = vpop.permute.xlu2 %1854 }
0x1513   : > { %2446 = vmatpush.xpose.msk.msrb.mxu0 %vm434_vm1, %v1855_v53 }
0x151a   : > { %v1926_v51 = vpop.permute.xlu2 %1925 }
0x1526   : > { %2614 = vrot.lane.b32.xlu0 %v3411_v37, %s3646_s1 }
0x152e   : > { %1927 = vrot.lane.b32.xlu0 %v1778_v36, %s3650_s28 }
0x1536   : > { %1852 = vrot.lane.b32.xlu0 %v1775_v35, %s3647_s23 }
0x153e   : > { %1998 = vrot.lane.b32.xlu0 %v1775_v35, %s3648_s27 }
0x1585   : > { %v1690_v26 = vpop.xlane.xlu0 %1689 }
0x1586   : > { %v1691_v27 = vmul.f32 %v1690_v26, %v3133_v44 }
0x1588   : > { %v1692_v34 = vadd.f32 1e-05, %v1691_v27 }
0x158a   : > { %2701 = vrsqrt.f32 %v1692_v34  ;;  %vm1699_vm4 = vweird.f32 %v1692_v34 }
0x1590   : > { %v2702_v43 = vpop.eup %2701 }
0x1591   : > { %v1694_v38 = vmul.f32 %v2702_v43, %v1692_v34  ;;  %vm1700_vm15 = vweird.f32 %v2702_v43 }
0x1592   : > { %vm1701_vm5 = vmor %vm1699_vm4, %vm1700_vm15 }
0x1593   : > { %v1695_v39 = vmul.f32 %v2702_v43, %v1694_v38 }
0x1595   : > { %v1696_v40 = vmul.f32 0.5, %v1695_v39 }
0x1597   : > { %v1697_v28 = vsub.f32 1.5, %v1696_v40 }
0x1598   : > { %v2615_v52 = vpop.permute.xlu0 %2614 }
0x1599   : > { %v1698_v29 = vmul.f32 %v2702_v43, %v1697_v28  ;;  %v2617_v50 = vunpack.i.h.bf16 %v2615_v52  ;;  %v2616_v31 = vunpack.i.l.bf16 %v2615_v52 }
0x159b   : > { %v1702_v42 = vsel %vm1701_vm5, %v2702_v43, %v1698_v29  ;;  %1844 = vmatpush.msra.mxu3 %v2616_v31 }
0x159c   : > { %v1703_v45 = vmul.f32 %v1702_v42, %v1686_v22 }
0x159d   : > { %1845 = vmatpush.msra.mxu3 %v2617_v50 }
0x159e   : > { %v1705_v47 = vmul.f32 %v1704_v30, %v1703_v45 }
0x15a0   : > { %v3427_v48 = vadd.f32 %v1706_v46, %v1705_v47  ;;  %v1928_v32 = vpop.permute.xlu0 %1927 }
0x15a1   : > { %2450 = vmatpush.xpose.msk.msrb.mxu3 %vm434_vm1, %v1928_v32 }
0x15a2   : > { %2439 = vmatmul.msk.f32.vlgmr.msra.gmra.mxu0 %vm407_vm0, %v3427_v48 }
0x15a5   : > { %2451 = vmatpush.xpose.msk.msrb.mxu3 %vm434_vm1, %v1926_v51 }
0x15a8   : > { %v1853_v58 = vpop.permute.xlu0 %1852 }
0x15a9   : > { %2447 = vmatpush.xpose.msk.msrb.mxu0 %vm434_vm1, %v1853_v58 }
0x15b0   : > { %v1999_v5 = vpop.permute.xlu0 %1998 }
0x161f   : > { %v1734_v54 = vpop.f32.mrf.mxu0 }
0x1620   : > { %v1735_v55 = vadd.f32 %v1734_v54, %v3400_v17 }
0x1622   : > { %1923 = vrot.lane.b32.xlu0 %v1735_v55, %s3650_s28  ;;  %1850 = vrot.lane.b32.xlu2 %v1735_v55, %s3647_s23 }
0x1623   : > { %2444 = vmatmul.msk.f32.vlgmr.msrb.gmra.mxu1 %vm434_vm1, %v1735_v55 }
0x167c   : > { %v1851_v56 = vpop.permute.xlu2 %1850 }
0x167d   : > { %2448 = vmatmul.msk.f32.vlgmr.msrb.gmra.mxu0 %vm434_vm1, %v1851_v56 }
0x1694   : > { %v1924_v21 = vpop.permute.xlu0 %1923 }
0x16a0   : > { %v1806_v57 = vpop.f32.mrf.mxu1 }
0x16a1   : > { %v1809_v59 = vmul.f32 0.35355338, %v1806_v57 }
0x16a3   : > { %v1810_v7 = vsel %vm708_vm2, %v1809_v59, -inf }
0x16a4   : > { %1811 = vmax.xlane.f32.xlu1 %v1810_v7 }
0x16bd   : > { %2000 = vrot.lane.b32.xlu1 %v1778_v36, %s3648_s27 }
0x16fa   : > { %v1879_v60 = vpop.f32.mrf.mxu0 }
0x16fb   : > { %v1882_v61 = vmul.f32 0.35355338, %v1879_v60 }
0x16fd   : > { %v1883_v62 = vsel %vm708_vm2, %v1882_v61, -inf }
0x16fe   : > { %1884 = vmax.xlane.f32.xlu1 %v1883_v62 }
0x1717   : > { %v1812_v63 = vpop.xlane.xlu1 %1811 }
0x1718   : > { %v1813_v9 = vsub.f32 %v1809_v59, %v1812_v63 }
0x171a   : > { %v1814_v11 = vmul.f32 1.442695, %v1813_v9 }
0x171c   : > { %2703 = vpow2.f32 %v1814_v11 }
0x1722   : > { %v2704_v0 = vpop.eup %2703 }
0x1723   : > { %v1816_v2 = vsel %vm708_vm2, %v2704_v0, 0.0 }
0x1724   : > { %1817 = vadd.xlane.f32.xlu2 %v1816_v2 }
0x172f   : > { %v2001_v3 = vpop.permute.xlu1 %2000 }
0x1730   : > { %2454 = vmatpush.xpose.msk.msrb.mxu2 %vm434_vm1, %v2001_v3 }
0x1734   : > { %2455 = vmatpush.xpose.msk.msrb.mxu2 %vm434_vm1, %v1999_v5 }
0x173c   : > { %1996 = vrot.lane.b32.xlu2 %v1735_v55, %s3648_s27  ;;  %s2377_s27 = sshll.u32 %s2982_s18, 3 }
0x173d   : > { %s392_s11 = scalar_lea.vmem [#allocation5], %s2377_s27 }
0x173e   : > { %s2284_s21 = sshll.u32 %s392_s11, 4  ;;  %s2285_s21 = int_to_ptr.vmem [resolvable:$true] %s2284_s21 }
0x1771   : > { %v1885_v13 = vpop.xlane.xlu1 %1884 }
0x1772   : > { %v1886_v8 = vsub.f32 %v1882_v61, %v1885_v13 }
0x1774   : > { %v1887_v14 = vmul.f32 1.442695, %v1886_v8 }
0x1776   : > { %2705 = vpow2.f32 %v1887_v14 }
0x177c   : > { %v2706_v15 = vpop.eup %2705 }
0x177d   : > { %v1889_v16 = vsel %vm708_vm2, %v2706_v15, 0.0 }
0x177e   : > { %1890 = vadd.xlane.f32.xlu1 %v1889_v16 }
0x1797   : > { %v1818_v18 = vpop.xlane.xlu2 %1817 }
0x1798   : > { %2707 = vrcp.f32 %v1818_v18 }
0x179e   : > { %v2708_v19 = vpop.eup %2707 }
0x179f   : > { %v1820_v20 = vmul.f32 %v2708_v19, %v2704_v0  ;;  %v1997_v12 = vpop.permute.xlu2 %1996 }
0x17a0   : > { %2456 = vmatmul.msk.f32.vlgmr.msrb.gmra.mxu2 %vm434_vm1, %v1997_v12 }
0x17a1   : > { %2445 = vmatmul.msk.f32.vlgmr.msra.gmra.mxu3 %vm708_vm2, %v1820_v20 }
0x17a9   : > { %2452 = vmatmul.msk.f32.vlgmr.msrb.gmra.mxu3 %vm434_vm1, %v1924_v21  ;;  %v2462_v21 = vld [vmem:[%s3584_s5 + $0x38] sm:$0xff] }
0x17f1   : > { %v1891_v40 = vpop.xlane.xlu1 %1890 }
0x1823   : > { %v2025_v10 = vpop.f32.mrf.mxu2 }
0x1824   : > { %v2028_v49 = vmul.f32 0.35355338, %v2025_v10  ;;  %v3453_v22 = vpop.f32.mrf.mxu3  ;;  %v2460_v10 = vld [vmem:[%s3584_s5 + $0x28] sm:$0xff] }
0x1826   : > { %v2029_v23 = vsel %vm708_vm2, %v2028_v49, -inf }
0x1827   : > { %2030 = vmax.xlane.f32.xlu2 %v2029_v23  ;;  %v2471_v23 = vld [vmem:[%s3586_s7 + $0x70] sm:$0xff] }
0x182c   : > { %v1952_v24 = vpop.f32.mrf.mxu3 }
0x182d   : > { %v1955_v25 = vmul.f32 0.35355338, %v1952_v24  ;;  %v2470_v24 = vld [vmem:[%s3586_s7 + $0x68] sm:$0xff] }
0x182f   : > { %v1956_v26 = vsel %vm708_vm2, %v1955_v25, -inf }
0x1830   : > { %1957 = vmax.xlane.f32.xlu0 %v1956_v26 }
0x1844   : > { %2619 = vrot.lane.b32.xlu0 %v3411_v37, %s3649_s20  ;;  %s2475_s20 = sshll.u32 %s2917_s17, 3  ;;  %s2272_s17 = scalar_lea.sflag [#allocation4], %s2982_s18 }
0x1845   : > { %s2282_s0 = scalar_lea.hbm %s3589_s10, %s2475_s20 }
0x1846   : > { %s2286_s22 = sshll.u32 %s2282_s0, 4  ;;  %s2287_s22 = int_to_ptr.hbm [resolvable:$true] %s2286_s22 }
0x1847   : > { %s2769_s2 = sshra.s32 %s2287_s22, 4  ;;  %s2770_s2 = int_to_ptr.hbm [resolvable:$true] %s2769_s2 }
0x1848   : > { %s2771_s4 = scalar_lea.hbm %s2770_s2, 8  ;;  %p2776_p1 = scmp.lt.s32.totalorder %s2770_s2, %s3589_s10 }
0x1849   : > { %p2772_p6 = scmp.ne.s32.totalorder %s2770_s2, %s2771_s4 }
0x184b   : > { %p2773_p13 = pnand %p2772_p6, %p2946_p11 }
0x184c   : > { %2634 = vrot.lane.b32.xlu0 %v3383_v1, %s3641_s12 }
0x184d   : > { %p2774_p0 = pneg %p2773_p13 }
0x189a   : > { %v2031_v27 = vpop.xlane.xlu2 %2030 }
0x189b   : > { %v2032_v33 = vsub.f32 %v2028_v49, %v2031_v27  ;;  %v2459_v49 = vld [vmem:[%s3584_s5 + $0x20] sm:$0xff] }
0x189c   : > { %v2469_v27 = vld [vmem:[%s3586_s7 + $0x60] sm:$0xff] }
0x189d   : > { %v2033_v34 = vmul.f32 1.442695, %v2032_v33 }
0x189f   : > { %2709 = vpow2.f32 %v2033_v34  ;;  %v2468_v34 = vld [vmem:[%s3586_s7 + $0x58] sm:$0xff] }
0x18a3   : > { %v1958_v35 = vpop.xlane.xlu0 %1957 }
0x18a4   : > { %v1959_v6 = vsub.f32 %v1955_v25, %v1958_v35 }
0x18a5   : > { %v2710_v36 = vpop.eup %2709 }
0x18a6   : > { %v1960_v43 = vmul.f32 1.442695, %v1959_v6  ;;  %v2035_v38 = vsel %vm708_vm2, %v2710_v36, 0.0 }
0x18a7   : > { %2036 = vadd.xlane.f32.xlu1 %v2035_v38 }
0x18a8   : > { %2711 = vpow2.f32 %v1960_v43 }
0x18a9   : > { %2713 = vrcp.f32 %v1891_v40  ;;  %v2145_v40 = vperm.slane %v3422_v41, 3 }
0x18ae   : > { %v2712_v39 = vpop.eup %2711 }
0x18af   : > { %v1962_v28 = vsel %vm708_vm2, %v2712_v39, 0.0  ;;  %v2714_v30 = vpop.eup %2713 }
0x18b0   : > { %1963 = vadd.xlane.f32.xlu2 %v1962_v28  ;;  %v1893_v46 = vmul.f32 %v2714_v30, %v2706_v15  ;;  %v2147_v30 = vperm.slane %v3422_v41, 4 }
0x18b6   : > { %v2620_v29 = vpop.permute.xlu0 %2619 }
0x18b7   : > { %v2621_v42 = vunpack.i.l.bf16 %v2620_v29  ;;  %v2622_v45 = vunpack.i.h.bf16 %v2620_v29 }
0x18b9   : > { %1917 = vmatpush.msra.mxu1 %v2621_v42 }
0x18bb   : > { %1918 = vmatpush.msra.mxu1 %v2622_v45 }
0x18bc   : > { %2449 = vmatmul.msk.f32.vlgmr.msra.gmra.mxu1 %vm708_vm2, %v1893_v46  ;;  %v2467_v46 = vld [vmem:[%s3586_s7 + $0x50] sm:$0xff] }
0x18be   : > { %v2635_v57 = vpop.permute.xlu0 %2634 }
0x18bf   : > { %v2637_v59 = vunpack.i.h.bf16 %v2635_v57  ;;  %v2636_v7 = vunpack.i.l.bf16 %v2635_v57 }
0x18c0   : > { %2629 = vrot.lane.b32.xlu1 %v3411_v37, %s3639_s24 }
0x18c1   : > { %2114 = vmatpush.msra.mxu3 %v2636_v7 }
0x18c3   : > { %2115 = vmatpush.msra.mxu3 %v2637_v59 }
0x18c8   : > { %2624 = vrot.lane.b32.xlu2 %v3411_v37, %s3640_s30  ;;  %s2775_s30 = scalar_lea.hbm %s3589_s10, 16 }
0x18c9   : > { %p2777_p3 = scmp.lt.s32.totalorder %s2775_s30, %s2771_s4 }
0x18cb   : > { %p2778_p4 = por %p2777_p3, %p2776_p1 }
0x18cd   : > { %p2779_p7 = pnand %p2778_p4, %p2774_p0 }
0x18d0   : > { %2639 = vrot.lane.b32.xlu2 %v3393_v4, %s3641_s12 }
0x18d8   : > { %2096 = vrot.lane.b32.xlu2 %v3400_v17, %s3641_s12 }
0x191a   : > { %v2037_v52 = vpop.xlane.xlu1 %2036 }
0x1923   : > { %v1964_v47 = vpop.xlane.xlu2 %1963 }
0x1924   : > { %2715 = vrcp.f32 %v1964_v47  ;;  %v2466_v47 = vld [vmem:[%s3586_s7 + $0x48] sm:$0xff] }
0x1925   : > { %2717 = vrcp.f32 %v2037_v52  ;;  %v2465_v52 = vld [vmem:[%s3586_s7 + $0x40] sm:$0xff] }
0x192a   : > { %v2716_v50 = vpop.eup %2715 }
0x192b   : > { %v2625_v53 = vpop.permute.xlu2 %2624  ;;  %v1966_v51 = vmul.f32 %v2716_v50, %v2712_v39  ;;  %v2718_v54 = vpop.eup %2717 }
0x192c   : > { %v2626_v31 = vunpack.i.l.bf16 %v2625_v53  ;;  %v2627_v32 = vunpack.i.h.bf16 %v2625_v53  ;;  %v2039_v56 = vmul.f32 %v2718_v54, %v2710_v36  ;;  %v2644_v53 = vld [vmem:[%s3585_s6 + $0x1] ss:$0 sm:$0xff] }
0x192e   : > { %1990 = vmatpush.msra.mxu0 %v2626_v31 }
0x1930   : > { %1991 = vmatpush.msra.mxu0 %v2627_v32 }
0x1931   : > { %2453 = vmatmul.msk.f32.vlgmr.msra.gmra.mxu0 %vm708_vm2, %v1966_v51  ;;  %v2192_v51 = vperm.slane %v3422_v41, 0 }
0x1932   : > { %v2630_v58 = vpop.permute.xlu1 %2629  ;;  %2174 = vmatpush.msrb.mxu0 %v2462_v21 }
0x1933   : > { %v2631_v55 = vunpack.i.l.bf16 %v2630_v58  ;;  %v2632_v37 = vunpack.i.h.bf16 %v2630_v58  ;;  %v2640_v62 = vpop.permute.xlu2 %2639 }
0x1934   : > { %v2642_v63 = vunpack.i.h.bf16 %v2640_v62  ;;  %v2641_v9 = vunpack.i.l.bf16 %v2640_v62 }
0x1935   : > { %2063 = vmatpush.msrb.mxu1 %v2631_v55 }
0x1936   : > { %2116 = vmatpush.msra.mxu3 %v2641_v9 }
0x1937   : > { %2064 = vmatpush.msrb.mxu1 %v2632_v37 }
0x1938   : > { %2457 = vmatmul.msk.f32.vlgmr.msrb.gmra.mxu1 %vm708_vm2, %v2039_v56  ;;  %2117 = vmatpush.msra.mxu3 %v2642_v63 }
0x1939   : > { %v1920_v1 = vpop.f32.mrf.mxu1 }
0x193a   : > { %2070 = vrot.lane.b32.xlu0 %v1920_v1, %s3642_s19 }
0x193b   : > { %v2097_v5 = vpop.permute.xlu2 %2096 }
0x19ac   : > { %v2071_v11 = vpop.permute.xlu0 %2070 }
0x19ad   : > { %v2081_v2 = vsel %vm434_vm1, %v3453_v22, %v2071_v11  ;;  %v2472_v22 = vld [vmem:[%s3586_s7 + $0x78] sm:$0xff] }
0x19ae   : > { %v1993_v60 = vpop.f32.mrf.mxu0  ;;  %2204 = vmatpush.msra.mxu2 %v2472_v22 }
0x19af   : > { %2074 = vrot.lane.b32.xlu0 %v1993_v60, %s3643_s26 }
0x19b0   : > { %2205 = vmatpush.msra.mxu2 %v2471_v23 }
0x19b2   : > { %2206 = vmatpush.msra.mxu2 %v2470_v24  ;;  %v2243_v24 = vld [vmem:[%s3588_s9] sm:$0x3] }
0x19b4   : > { %2207 = vmatpush.msra.mxu2 %v2469_v27  ;;  %v2266_v27 = vperm.slane %v2243_v24, 0 }
0x19b5   : > { %v2066_v61 = vpop.f32.mrf.mxu1 }
0x19b6   : > { %2078 = vrot.lane.b32.xlu1 %v2066_v61, %s3644_s15  ;;  %2208 = vmatpush.msra.mxu2 %v2468_v34  ;;  %v2268_v34 = vperm.slane %v2243_v24, 1 }
0x19b8   : > { %2209 = vmatpush.msra.mxu2 %v2467_v46 }
0x19ba   : > { %2210 = vmatpush.msra.mxu2 %v2466_v47 }
0x19bc   : > { %2211 = vmatpush.msra.mxu2 %v2465_v52 }
0x1a21   : > { %v2075_v0 = vpop.permute.xlu0 %2074 }
0x1a22   : > { %v2082_v4 = vsel %vm708_vm2, %v2081_v2, %v2075_v0 }
0x1a28   : > { %v2079_v3 = vpop.permute.xlu1 %2078 }
0x1a29   : > { %v2083_v17 = vsel %vm710_vm3, %v2082_v4, %v2079_v3  ;;  %v2239_v3 = vperm.slane %v3422_v41, 5 }
0x1a2a   : > { %2458 = vmatmul.msk.f32.vlgmr.msra.gmra.mxu3 %vm407_vm0, %v2083_v17 }
0x1aad   : > { %v2119_v13 = vpop.f32.mrf.mxu3 }
0x1aae   : > { %v2120_v8 = vadd.f32 %v2119_v13, %v2097_v5  ;;  %v2241_v13 = vperm.slane %v3422_v41, 6 }
0x1ab0   : > { %v2122_v14 = vadd.f32 %v2120_v8, %v3427_v48  ;;  %v2461_v48 = vld [vmem:[%s3584_s5 + $0x30] sm:$0xff] }
0x1ab1   : > { %2175 = vmatpush.msrb.mxu0 %v2461_v48 }
0x1ab2   : > { %v2123_v15 = vsel %vm407_vm0, %v2122_v14, 0.0 }
0x1ab3   : > { %2124 = vadd.xlane.f32.xlu0 %v2123_v15  ;;  %2176 = vmatpush.msrb.mxu0 %v2460_v10 }
0x1ab5   : > { %2177 = vmatpush.msrb.mxu0 %v2459_v49 }
0x1b26   : > { %v2125_v16 = vpop.xlane.xlu0 %2124 }
0x1b27   : > { %v2126_v18 = vmul.f32 %v2125_v16, %v3133_v44 }
0x1b29   : > { %v2127_v19 = vsub.f32 %v2122_v14, %v2126_v18 }
0x1b2b   : > { %v2128_v20 = vmul.f32 %v2127_v19, %v2127_v19 }
0x1b2d   : > { %v2129_v12 = vsel %vm407_vm0, %v2128_v20, 0.0 }
0x1b2e   : > { %2130 = vadd.xlane.f32.xlu1 %v2129_v12 }
0x1ba1   : > { %v2131_v25 = vpop.xlane.xlu1 %2130 }
0x1ba2   : > { %v2132_v26 = vmul.f32 %v2131_v25, %v3133_v44 }
0x1ba4   : > { %v2133_v33 = vadd.f32 1e-05, %v2132_v26 }
0x1ba6   : > { %2719 = vrsqrt.f32 %v2133_v33  ;;  %vm2140_vm2 = vweird.f32 %v2133_v33 }
0x1bac   : > { %v2720_v35 = vpop.eup %2719 }
0x1bad   : > { %v2135_v6 = vmul.f32 %v2720_v35, %v2133_v33  ;;  %vm2141_vm1 = vweird.f32 %v2720_v35 }
0x1bae   : > { %vm2142_vm3 = vmor %vm2140_vm2, %vm2141_vm1 }
0x1baf   : > { %v2136_v36 = vmul.f32 %v2720_v35, %v2135_v6 }
0x1bb1   : > { %v2137_v43 = vmul.f32 0.5, %v2136_v36 }
0x1bb3   : > { %v2138_v38 = vsub.f32 1.5, %v2137_v43 }
0x1bb5   : > { %v2139_v39 = vmul.f32 %v2720_v35, %v2138_v38 }
0x1bb7   : > { %v2143_v28 = vsel %vm2142_vm3, %v2720_v35, %v2139_v39 }
0x1bb8   : > { %v2144_v29 = vmul.f32 %v2143_v28, %v2127_v19 }
0x1bba   : > { %v2146_v42 = vmul.f32 %v2145_v40, %v2144_v29 }
0x1bbc   : > { %v2148_v45 = vadd.f32 %v2147_v30, %v2146_v42 }
0x1bbe   : > { %2464 = vmatmul.msk.f32.vlgmr.msrb.gmra.mxu0 %vm407_vm0, %v2148_v45 }
0x1c3b   : > { %v2179_v50 = vpop.f32.mrf.mxu0 }
0x1c3c   : > { %v2180_v31 = vadd.f32 %v2644_v53, %v2179_v50 }
0x1c3e   : > { %v2182_v32 = vmax.f32 %v2180_v31, 0.0 }
0x1c40   : > { %2473 = vmatmul.msk.f32.vlgmr.msra.gmra.mxu2 %vm1276_vm11, %v2182_v32 }
0x1cc3   : > { %v2213_v58 = vpop.f32.mrf.mxu2 }
0x1cc4   : > { %v2214_v54 = vadd.f32 %v2213_v58, %v2192_v51 }
0x1cc6   : > { %v2216_v55 = vadd.f32 %v2214_v54, %v2148_v45 }
0x1cc8   : > { %v2217_v37 = vsel %vm407_vm0, %v2216_v55, 0.0 }
0x1cc9   : > { %2218 = vadd.xlane.f32.xlu2 %v2217_v37 }
0x1d3c   : > { %v2219_v56 = vpop.xlane.xlu2 %2218 }
0x1d3d   : > { %v2220_v1 = vmul.f32 %v2219_v56, %v3133_v44 }
0x1d3f   : > { %v2221_v57 = vsub.f32 %v2216_v55, %v2220_v1 }
0x1d41   : > { %v2222_v59 = vmul.f32 %v2221_v57, %v2221_v57 }
0x1d43   : > { %v2223_v7 = vsel %vm407_vm0, %v2222_v59, 0.0 }
0x1d44   : > { %2224 = vadd.xlane.f32.xlu0 %v2223_v7 }
0x1db7   : > { %v2225_v60 = vpop.xlane.xlu0 %2224 }
0x1db8   : > { %v2226_v61 = vmul.f32 %v2225_v60, %v3133_v44 }
0x1dba   : > { %v2227_v62 = vadd.f32 1e-05, %v2226_v61 }
0x1dbc   : > { %2721 = vrsqrt.f32 %v2227_v62  ;;  %vm2234_vm7 = vweird.f32 %v2227_v62 }
0x1dc2   : > { %v2722_v63 = vpop.eup %2721 }
0x1dc3   : > { %v2229_v9 = vmul.f32 %v2722_v63, %v2227_v62  ;;  %vm2235_vm6 = vweird.f32 %v2722_v63 }
0x1dc4   : > { %vm2236_vm8 = vmor %vm2234_vm7, %vm2235_vm6 }
0x1dc5   : > { %v2230_v11 = vmul.f32 %v2722_v63, %v2229_v9 }
0x1dc7   : > { %v2231_v0 = vmul.f32 0.5, %v2230_v11 }
0x1dc9   : > { %v2232_v2 = vsub.f32 1.5, %v2231_v0 }
0x1dcb   : > { %v2233_v4 = vmul.f32 %v2722_v63, %v2232_v2 }
0x1dcd   : > { %v2237_v17 = vsel %vm2236_vm8, %v2722_v63, %v2233_v4 }
0x1dce   : > { %v2238_v5 = vmul.f32 %v2237_v17, %v2221_v57 }
0x1dd0   : > { %v2240_v8 = vmul.f32 %v2239_v3, %v2238_v5 }
0x1dd2   : > { %v2242_v14 = vadd.f32 %v2241_v13, %v2240_v8 }
0x1dd4   : > { %v2244_v15 = vsel %vm407_vm0, %v2242_v14, 0.0 }
0x1dd5   : > { %2245 = vadd.xlane.f32.xlu1 %v2244_v15 }
0x1e48   : > { %v2246_v16 = vpop.xlane.xlu1 %2245 }
0x1e49   : > { %v2247_v18 = vmul.f32 %v2246_v16, %v3133_v44 }
0x1e4b   : > { %v2248_v19 = vsub.f32 %v2242_v14, %v2247_v18 }
0x1e4d   : > { %v2249_v20 = vmul.f32 %v2248_v19, %v2248_v19 }
0x1e4f   : > { %v2250_v12 = vsel %vm407_vm0, %v2249_v20, 0.0 }
0x1e50   : > { %2251 = vadd.xlane.f32.xlu2 %v2250_v12 }
0x1ec3   : > { %v2252_v21 = vpop.xlane.xlu2 %2251 }
0x1ec4   : > { %v2253_v48 = vmul.f32 %v2252_v21, %v3133_v44 }
0x1ec6   : > { %v2254_v10 = vadd.f32 1e-05, %v2253_v48 }
0x1ec8   : > { %2723 = vrsqrt.f32 %v2254_v10  ;;  %vm2261_vm10 = vweird.f32 %v2254_v10 }
0x1ece   : > { %v2724_v41 = vpop.eup %2723 }
0x1ecf   : > { %v2256_v49 = vmul.f32 %v2724_v41, %v2254_v10  ;;  %vm2262_vm9 = vweird.f32 %v2724_v41 }
0x1ed0   : > { %vm2263_vm11 = vmor %vm2261_vm10, %vm2262_vm9 }
0x1ed1   : > { %v2257_v22 = vmul.f32 %v2724_v41, %v2256_v49 }
0x1ed3   : > { %v2258_v23 = vmul.f32 0.5, %v2257_v22 }
0x1ed5   : > { %v2259_v25 = vsub.f32 1.5, %v2258_v23 }
0x1ed7   : > { %v2260_v26 = vmul.f32 %v2724_v41, %v2259_v25 }
0x1ed9   : > { %v2264_v44 = vsel %vm2263_vm11, %v2724_v41, %v2260_v26 }
0x1eda   : > { %v2265_v33 = vmul.f32 %v2264_v44, %v2248_v19 }
0x1edc   : > { %v2267_v35 = vmul.f32 %v2266_v27, %v2265_v33 }
0x1ede   : > { %v2269_v6 = vadd.f32 %v2268_v34, %v2267_v35 }
0x1ee0   : > { %2270 = vst.msk [vmem:[%s392_s11] sm:$0xff] %vm407_vm0, %v2269_v6 }
0x1ee1   : > { %2782 = shalt.err (!%p2779_p7)
}
0x1ee2   : > { %2481 = dma.vmem_to_hbm [thread:$0]  (%p2946_p11), %s2285_s21, 128, %s2287_s22, %s2272_s17  }
0x1ee3 PF: > { %s2298_s26 = sand.u32 1, %s2809_s13   ;;  %p3655_p5 = scmp.ge.s32.totalorder %s2821_s16, 2 }
0x1ee4   : > { %s2299_s15 = scalar_lea.sflag [#allocation4], %s2298_s26 }
0x1ee5   : > { %p2488_p8 = pnand %p3655_p5, %p2950_p12 }
0x1ee7   : > { %p2489_p10 = pneg %p2488_p8 }
0x1ee9   : > { %2804 = dma.done.wait (%p2489_p10), %s2299_s15, 128  }
0x1eea   : > { %2806 = vsyncadd (%p2489_p10), %s2299_s15, 4294967168  ;;  %s3656_s16 = sld [smem:[#allocation10_spill]] }
0x1eeb   : > { %s3657_s13 = sld [smem:[#allocation8_spill]] }
0x1eec   : > { %s3658_s14 = sld [smem:[#allocation9_spill]] }
0x1eed   : > { %s3659_s15 = sld [smem:[#allocation11_spill]] }
0x1ef0   : > { %p23_p2 = scmp.ge.s32.totalorder %s3656_s16, 4  }
0x1ef2   :  { %25 = sbr.rel (!%p23_p2) target bundleno = 10 (0xa), region = 115 }
0x1ef7   :  { %2305 = vsyncpa [#allocation3], 1 }
0x1ef8   :  { %2307 = vsyncpa [#allocation3 + $0x1], 1 }
0x1ef9   :  { %2308 = vsyncpa [#allocation4], 1 }
0x1efa   :  { %2310 = vsyncpa [#allocation4 + $0x1], 1 }

</bundles_post_ra>
